<compile_context>
chip_gen: v6e
topology: v6e:2x2x1
jax: 0.10.0
libtpu: 0.0.40
codegen_flags: <defaults>
</compile_context>

<pallas_src>
import functools
import random

import numpy as np
import jax
import jax.numpy as jnp
from jax import lax
from jax.experimental import pallas as pl
from jax.experimental.pallas import tpu as pltpu


# ----------------------------- shared kernel step ------------------------------

def _rscn_step(t, x_t, h, c, w_cat, b, aw_ref, hskip_sc, cskip_sc, skip_size, H):
    """One RSCN time step: fused-gate LSTMCell + circular skip queue + skip mixing."""
    xh = jnp.concatenate([x_t, h], axis=-1)                   # (B, I+H), lane-aligned halves
    gates = jnp.dot(xh, w_cat, preferred_element_type=jnp.float32) + b
    # PyTorch LSTMCell gate order: i, f, g, o  (each slice starts on a 128-lane boundary)
    i_g = jax.nn.sigmoid(gates[:, 0 * H:1 * H])
    f_g = jax.nn.sigmoid(gates[:, 1 * H:2 * H])
    g_g = jnp.tanh(gates[:, 2 * H:3 * H])
    o_g = jax.nn.sigmoid(gates[:, 3 * H:4 * H])
    c_new = f_g * c + i_g * g_g
    h_new = o_g * jnp.tanh(c_new)

    # circular skip queue: get() then put(new hidden)
    idx = t % skip_size
    h_skip = hskip_sc[idx]
    c_skip = cskip_sc[idx]
    hskip_sc[idx] = h_new
    cskip_sc[idx] = c_new

    a1 = aw_ref[2 * t]                                        # w1/(w1+w2)
    a2 = aw_ref[2 * t + 1]                                    # w2/(w1+w2)
    h_mix = a1 * h_new + a2 * jnp.tanh(h_skip)
    c_mix = a1 * c_new + a2 * jnp.tanh(c_skip)
    return h_mix, c_mix


# ----------------------------- encoder kernel ----------------------------------

def rscn_encoder_kernel(x_ref, h0_ref, c0_ref, w_ref, b_ref, aw_ref,
                        hlast_ref, clast_ref,
                        hskip_sc, cskip_sc,
                        *, skip_size, hidden_dim, time_steps):
    H = hidden_dim
    h0 = h0_ref[...]
    c0 = c0_ref[...]
    # queue pre-filled with the init hidden (single broadcast store)
    hskip_sc[...] = jnp.broadcast_to(h0, hskip_sc.shape)
    cskip_sc[...] = jnp.broadcast_to(c0, cskip_sc.shape)

    w = w_ref[...]                                            # (I+H, 4H) fused weights
    b = b_ref[...]                                            # (1, 4H)

    def step(t, carry):
        h, c = carry
        x_t = x_ref[t]                                        # (B, I) time-major slab
        return _rscn_step(t, x_t, h, c, w, b, aw_ref, hskip_sc, cskip_sc, skip_size, H)

    unroll = True if time_steps <= 32 else 8
    h, c = lax.fori_loop(0, time_steps, step, (h0, c0), unroll=unroll)

    hlast_ref[...] = h                                        # written exactly once
    clast_ref[...] = c


def rscn_encode(x_tm, h0, c0, w_cat, b, skip_w, *, skip_size, hidden_dim):
    T, Bp, _ = x_tm.shape
    Hp = hidden_dim
    kernel = functools.partial(rscn_encoder_kernel, skip_size=skip_size,
                               hidden_dim=Hp, time_steps=T)
    vmem = lambda: pl.BlockSpec(memory_space=pltpu.MemorySpace.VMEM)
    return pl.pallas_call(
        kernel,
        out_shape=(jax.ShapeDtypeStruct((Bp, Hp), jnp.float32),
                   jax.ShapeDtypeStruct((Bp, Hp), jnp.float32)),
        in_specs=[
            vmem(),                                           # x (T, Bp, Ip) time-major
            vmem(),                                           # h0
            vmem(),                                           # c0
            vmem(),                                           # fused [Wih^T; Whh^T]
            vmem(),                                           # bias (1, 4Hp)
            pl.BlockSpec(memory_space=pltpu.MemorySpace.SMEM),  # skip weights flat (2T,)
        ],
        out_specs=(vmem(), vmem()),
        scratch_shapes=[
            pltpu.VMEM((skip_size, Bp, Hp), jnp.float32),     # h skip queue
            pltpu.VMEM((skip_size, Bp, Hp), jnp.float32),     # c skip queue
        ],
    )(x_tm, h0, c0, w_cat, b, skip_w)


# ----------------------------- decoder kernel ----------------------------------

def rscn_decoder_kernel(x0_ref, h0_ref, c0_ref, w_ref, b_ref, wlin_ref, blin_ref, aw_ref,
                        out_ref,
                        hskip_sc, cskip_sc,
                        *, skip_size, hidden_dim, time_steps):
    H = hidden_dim
    h0 = h0_ref[...]
    c0 = c0_ref[...]
    hskip_sc[...] = jnp.broadcast_to(h0, hskip_sc.shape)
    cskip_sc[...] = jnp.broadcast_to(c0, cskip_sc.shape)

    w = w_ref[...]
    b = b_ref[...]
    wlin = wlin_ref[...]                                      # (Hp, Ip)
    blin = blin_ref[...]                                      # (1, Ip)

    def step(t, carry):
        x_cur, h, c = carry                                   # decoder feeds its own output back
        h_mix, c_mix = _rscn_step(t, x_cur, h, c, w, b, aw_ref,
                                  hskip_sc, cskip_sc, skip_size, H)
        h_out = jnp.dot(h_mix, wlin, preferred_element_type=jnp.float32) + blin
        out_ref[time_steps - 1 - t] = h_out                   # torch.flip folded into the store
        return h_out, h_mix, c_mix

    unroll = True if time_steps <= 32 else 8
    lax.fori_loop(0, time_steps, step, (x0_ref[...], h0, c0), unroll=unroll)


def rscn_decode(x0, h0, c0, w_cat, b, wlin_t, blin, skip_w, *, skip_size, time_steps, hidden_dim):
    Bp, Ip = x0.shape
    Hp = hidden_dim
    T = time_steps
    kernel = functools.partial(rscn_decoder_kernel, skip_size=skip_size,
                               hidden_dim=Hp, time_steps=T)
    vmem = lambda: pl.BlockSpec(memory_space=pltpu.MemorySpace.VMEM)
    return pl.pallas_call(
        kernel,
        out_shape=jax.ShapeDtypeStruct((T, Bp, Ip), jnp.float32),
        in_specs=[
            vmem(),                                           # init decoder input (Bp, Ip)
            vmem(),                                           # h0 (encoder last hidden)
            vmem(),                                           # c0
            vmem(),                                           # fused [Wih^T; Whh^T]
            vmem(),                                           # bias (1, 4Hp)
            vmem(),                                           # linear W^T (Hp, Ip)
            vmem(),                                           # linear bias (1, Ip)
            pl.BlockSpec(memory_space=pltpu.MemorySpace.SMEM),  # skip weights flat (2T,)
        ],
        out_specs=vmem(),
        scratch_shapes=[
            pltpu.VMEM((skip_size, Bp, Hp), jnp.float32),
            pltpu.VMEM((skip_size, Bp, Hp), jnp.float32),
        ],
    )(x0, h0, c0, w_cat, b, wlin_t, blin, skip_w)


# ----------------------------- padding / parameter glue -------------------------

def _round_up(n, m):
    return ((n + m - 1) // m) * m


def _pad_to(a, shape):
    return jnp.pad(a, [(0, s - d) for d, s in zip(a.shape, shape)])


def _fuse_and_pad_lstm_weights(wih_t, whh_t, b, I, H, Ip, Hp):
    """Fuse [Wih^T; Whh^T] into (Ip+Hp, 4*Hp) with each gate block padded H->Hp so every
    gate starts on a 128-lane boundary (numerically exact zero padding); bias likewise."""
    def pad_gate_cols(w, rows_to):
        r = w.shape[0]
        w4 = w.reshape(r, 4, H)
        w4 = jnp.pad(w4, ((0, rows_to - r), (0, 0), (0, Hp - H)))
        return w4.reshape(rows_to, 4 * Hp)
    w_cat = jnp.concatenate([pad_gate_cols(wih_t, Ip), pad_gate_cols(whh_t, Hp)], axis=0)
    b_pad = jnp.pad(b.reshape(1, 4, H), ((0, 0), (0, 0), (0, Hp - H))).reshape(1, 4 * Hp)
    return w_cat, b_pad


def make_skip_weights(T, skip_size, py_rng):
    """Flat (2T,) table of (w1/(w1+w2), w2/(w1+w2)) per step, exactly matching
    RSCN.random_weights + make_skip_connection."""
    a = np.zeros((2 * T,), np.float32)
    for t in range(T):
        if t < skip_size:
            w1, w2 = 1, 0
        else:
            w1 = py_rng.randint(0, 1)
            w2 = 1 if w1 == 0 else py_rng.randint(0, 1)
        norm = 1.0 / (w1 + w2)
        a[2 * t] = w1 * norm
        a[2 * t + 1] = w2 * norm
    return jnp.asarray(a)


def init_params(key, input_dim, hidden_dim, skip_max, time_steps):
    py_rng = random.Random(0)
    enc_skip = py_rng.randint(1, skip_max)   # rand_seq2seq.random_skip_lengths (deterministic here)
    dec_skip = py_rng.randint(1, skip_max)
    bound = 1.0 / np.sqrt(hidden_dim)
    keys = jax.random.split(key, 8)
    u = lambda k, shape: jax.random.uniform(k, shape, jnp.float32, -bound, bound)
    return dict(
        hidden_dim=hidden_dim,
        enc_skip=enc_skip,
        dec_skip=dec_skip,
        enc_wih_t=u(keys[0], (input_dim, 4 * hidden_dim)),
        enc_whh_t=u(keys[1], (hidden_dim, 4 * hidden_dim)),
        enc_b=u(keys[2], (1, 4 * hidden_dim)),            # combined b_ih + b_hh
        dec_wih_t=u(keys[3], (input_dim, 4 * hidden_dim)),
        dec_whh_t=u(keys[4], (hidden_dim, 4 * hidden_dim)),
        dec_b=u(keys[5], (1, 4 * hidden_dim)),
        dec_wlin_t=u(keys[6], (hidden_dim, input_dim)),
        dec_blin=u(keys[7], (1, input_dim)),
        enc_skip_w=make_skip_weights(time_steps, enc_skip, py_rng),
        dec_skip_w=make_skip_weights(time_steps, dec_skip, py_rng),
    )


def rand_seq2seq_forward(x, params, key):
    """x: (B, T, input_dim) -> (B, T, input_dim) (decoder output flipped along time)."""
    B, T, I = x.shape
    H = params["hidden_dim"]
    Bp, Hp, Ip = _round_up(B, 8), _round_up(H, 128), _round_up(I, 128)

    k1, k2, k3 = jax.random.split(key, 3)
    enc_h0 = jax.random.uniform(k1, (B, H), jnp.float32)      # encoder torch.rand init hidden
    enc_c0 = jax.random.uniform(k2, (B, H), jnp.float32)
    init_dec = jax.random.uniform(k3, (B, 1, I), jnp.float32)  # torch.rand decoder seed input

    enc_w, enc_b = _fuse_and_pad_lstm_weights(params["enc_wih_t"], params["enc_whh_t"],
                                              params["enc_b"], I, H, Ip, Hp)
    dec_w, dec_b = _fuse_and_pad_lstm_weights(params["dec_wih_t"], params["dec_whh_t"],
                                              params["dec_b"], I, H, Ip, Hp)
    dec_wlin = _pad_to(params["dec_wlin_t"], (Hp, Ip))
    dec_blin = _pad_to(params["dec_blin"], (1, Ip))

    # Time-major + zero-pad (B->8 sublanes, I/H->128-lane multiples).  The transpose fuses
    # with this mandatory padding copy; padded rows/lanes stay exactly zero in the kernels.
    x_tm = _pad_to(jnp.transpose(x, (1, 0, 2)), (T, Bp, Ip))
    h0 = _pad_to(enc_h0, (Bp, Hp))
    c0 = _pad_to(enc_c0, (Bp, Hp))
    x0 = _pad_to(init_dec[:, 0, :], (Bp, Ip))

    h_last, c_last = rscn_encode(x_tm, h0, c0, enc_w, enc_b, params["enc_skip_w"],
                                 skip_size=params["enc_skip"], hidden_dim=Hp)

    dec_tm = rscn_decode(x0, h_last, c_last, dec_w, dec_b, dec_wlin, dec_blin,
                         params["dec_skip_w"], skip_size=params["dec_skip"],
                         time_steps=T, hidden_dim=Hp)

    # dec_tm is (T, Bp, Ip) and already time-reversed (torch.flip folded into the kernel);
    # the un-pad slice fuses with the transpose back to batch-major.
    return jnp.transpose(dec_tm[:, :B, :I], (1, 0, 2))


# ----------------------------- pure-JAX reference -------------------------------

def _ref_rscn(x, h0, c0, wih_t, whh_t, b, skip_w, skip_size, time_steps,
              is_decoder=False, wlin_t=None, blin=None):
    H = h0.shape[-1]
    h, c = h0, c0
    skip_q = [(h0, c0)] * skip_size
    out = []
    cur = x[:, 0, :]
    for t in range(time_steps):
        if not is_decoder:
            cur = x[:, t, :]
        gates = cur @ wih_t + h @ whh_t + b
        i_g = jax.nn.sigmoid(gates[:, :H]); f_g = jax.nn.sigmoid(gates[:, H:2 * H])
        g_g = jnp.tanh(gates[:, 2 * H:3 * H]); o_g = jax.nn.sigmoid(gates[:, 3 * H:4 * H])
        c_new = f_g * c + i_g * g_g
        h_new = o_g * jnp.tanh(c_new)
        hs, cs = skip_q.pop(0)
        skip_q.append((h_new, c_new))
        a1 = skip_w[2 * t]; a2 = skip_w[2 * t + 1]
        h = a1 * h_new + a2 * jnp.tanh(hs)
        c = a1 * c_new + a2 * jnp.tanh(cs)
        ho = h
        if is_decoder:
            ho = h @ wlin_t + blin
            cur = ho
        out.append(ho)
    return jnp.stack(out, axis=1), (h, c)


def _ref_forward(x, params, key):
    B, T, I = x.shape
    H = params["hidden_dim"]
    k1, k2, k3 = jax.random.split(key, 3)
    enc_h0 = jax.random.uniform(k1, (B, H), jnp.float32)
    enc_c0 = jax.random.uniform(k2, (B, H), jnp.float32)
    init_dec = jax.random.uniform(k3, (B, 1, I), jnp.float32)
    _, (h_last, c_last) = _ref_rscn(x, enc_h0, enc_c0, params["enc_wih_t"],
                                    params["enc_whh_t"], params["enc_b"],
                                    params["enc_skip_w"], params["enc_skip"], T)
    dec, _ = _ref_rscn(init_dec, h_last, c_last, params["dec_wih_t"],
                       params["dec_whh_t"], params["dec_b"],
                       params["dec_skip_w"], params["dec_skip"], T,
                       is_decoder=True, wlin_t=params["dec_wlin_t"], blin=params["dec_blin"])
    return jnp.flip(dec, axis=1)


# ----------------------------- main ---------------------------------------------

if __name__ == "__main__":
    B, T, I, H, SKIP_MAX = 2, 8, 8, 32, 3

    key = jax.random.PRNGKey(0)
    k_params, k_x, k_fwd = jax.random.split(key, 3)

    params = init_params(k_params, input_dim=I, hidden_dim=H, skip_max=SKIP_MAX, time_steps=T)
    x = jax.random.normal(k_x, (B, T, I), jnp.float32)

    out = rand_seq2seq_forward(x, params, k_fwd)
    out = jax.block_until_ready(out)
    assert out.shape == (B, T, I), out.shape

    ref = jax.block_until_ready(_ref_forward(x, params, k_fwd))
    np.testing.assert_allclose(np.asarray(out), np.asarray(ref), rtol=2e-3, atol=2e-3)

    print("KERNEL_OK")
</pallas_src>

<mosaic_0001>
module attributes {stable_mosaic.version = 11 : i64} {
  func.func @rscn_encoder_kernel(%arg0: memref<8x8x128xf32, #tpu.memory_space<vmem>>, %arg1: memref<8x128xf32, #tpu.memory_space<vmem>>, %arg2: memref<8x128xf32, #tpu.memory_space<vmem>>, %arg3: memref<256x512xf32, #tpu.memory_space<vmem>>, %arg4: memref<1x512xf32, #tpu.memory_space<vmem>>, %arg5: memref<16xf32, #tpu.memory_space<smem>>, %arg6: memref<8x128xf32, #tpu.memory_space<vmem>>, %arg7: memref<8x128xf32, #tpu.memory_space<vmem>>, %arg8: memref<2x8x128xf32, #tpu.memory_space<vmem>>, %arg9: memref<2x8x128xf32, #tpu.memory_space<vmem>>) attributes {dimension_semantics = [], scalar_prefetch = 0 : i64, scratch_operands = 2 : i64, tpu.core_type = #tpu.core_type<tc>} {
    %c0 = arith.constant 0 : index
    %c0_0 = arith.constant 0 : index
    %0 = vector.load %arg1[%c0, %c0_0] : memref<8x128xf32, #tpu.memory_space<vmem>>, vector<8x128xf32>
    %c0_1 = arith.constant 0 : index
    %c0_2 = arith.constant 0 : index
    %1 = vector.load %arg2[%c0_1, %c0_2] : memref<8x128xf32, #tpu.memory_space<vmem>>, vector<8x128xf32>
    %2 = vector.shape_cast %0 : vector<8x128xf32> to vector<1x8x128xf32>
    %3 = vector.broadcast %2 : vector<1x8x128xf32> to vector<2x8x128xf32>
    %c0_3 = arith.constant 0 : index
    %c0_4 = arith.constant 0 : index
    %c0_5 = arith.constant 0 : index
    %4 = vector.load %arg8[%c0_3, %c0_4, %c0_5] : memref<2x8x128xf32, #tpu.memory_space<vmem>>, vector<2x8x128xf32>
    tpu.vector_store %arg8[%c0_3, %c0_4, %c0_5], %3 {strides = array<i32>} : memref<2x8x128xf32, #tpu.memory_space<vmem>>, vector<2x8x128xf32>,
    %5 = vector.shape_cast %1 : vector<8x128xf32> to vector<1x8x128xf32>
    %6 = vector.broadcast %5 : vector<1x8x128xf32> to vector<2x8x128xf32>
    %c0_6 = arith.constant 0 : index
    %c0_7 = arith.constant 0 : index
    %c0_8 = arith.constant 0 : index
    %7 = vector.load %arg9[%c0_6, %c0_7, %c0_8] : memref<2x8x128xf32, #tpu.memory_space<vmem>>, vector<2x8x128xf32>
    tpu.vector_store %arg9[%c0_6, %c0_7, %c0_8], %6 {strides = array<i32>} : memref<2x8x128xf32, #tpu.memory_space<vmem>>, vector<2x8x128xf32>,
    %c0_9 = arith.constant 0 : index
    %c0_10 = arith.constant 0 : index
    %8 = vector.load %arg3[%c0_9, %c0_10] : memref<256x512xf32, #tpu.memory_space<vmem>>, vector<256x512xf32>
    %c0_11 = arith.constant 0 : index
    %c0_12 = arith.constant 0 : index
    %9 = vector.load %arg4[%c0_11, %c0_12] : memref<1x512xf32, #tpu.memory_space<vmem>>, vector<1x512xf32>
    %c0_i32 = arith.constant 0 : i32
    %10 = arith.index_cast %c0_i32 : i32 to index
    %c0_13 = arith.constant 0 : index
    %c0_14 = arith.constant 0 : index
    %11 = vector.load %arg0[%10, %c0_13, %c0_14] : memref<8x8x128xf32, #tpu.memory_space<vmem>>, vector<1x8x128xf32>
    %12 = vector.shape_cast %11 : vector<1x8x128xf32> to vector<8x128xf32>
    %13 = tpu.concatenate %12, %0 in 1 : vector<8x128xf32>, vector<8x128xf32> -> vector<8x256xf32>
    %cst = arith.constant dense<0.000000e+00> : vector<8x512xf32>
    %14 = tpu.matmul %13, %8, %cst {dimension_numbers = #tpu.dot_dimension_numbers<[1], [0], [0], [1], [0, 0, 1, 1], [], []>} : vector<8x256xf32>, vector<256x512xf32>, vector<8x512xf32> -> vector<8x512xf32>
    %15 = vector.broadcast %9 : vector<1x512xf32> to vector<8x512xf32>
    %16 = arith.addf %14, %15 : vector<8x512xf32>
    %17 = vector.extract_strided_slice %16 {offsets = [0, 0], sizes = [8, 128], strides = [1, 1]} : vector<8x512xf32> to vector<8x128xf32>
    %18 = arith.negf %17 : vector<8x128xf32>
    %19 = math.exp %18 : vector<8x128xf32>
    %cst_15 = arith.constant 1.000000e+00 : f32
    %20 = vector.broadcast %cst_15 : f32 to vector<8x128xf32>
    %21 = arith.addf %20, %19 : vector<8x128xf32>
    %22 = arith.divf %20, %21 : vector<8x128xf32>
    %23 = vector.extract_strided_slice %16 {offsets = [0, 128], sizes = [8, 128], strides = [1, 1]} : vector<8x512xf32> to vector<8x128xf32>
    %24 = arith.negf %23 : vector<8x128xf32>
    %25 = math.exp %24 : vector<8x128xf32>
    %cst_16 = arith.constant 1.000000e+00 : f32
    %26 = vector.broadcast %cst_16 : f32 to vector<8x128xf32>
    %27 = arith.addf %26, %25 : vector<8x128xf32>
    %28 = arith.divf %26, %27 : vector<8x128xf32>
    %29 = vector.extract_strided_slice %16 {offsets = [0, 256], sizes = [8, 128], strides = [1, 1]} : vector<8x512xf32> to vector<8x128xf32>
    %30 = math.tanh %29 : vector<8x128xf32>
    %31 = vector.extract_strided_slice %16 {offsets = [0, 384], sizes = [8, 128], strides = [1, 1]} : vector<8x512xf32> to vector<8x128xf32>
    %32 = arith.negf %31 : vector<8x128xf32>
    %33 = math.exp %32 : vector<8x128xf32>
    %cst_17 = arith.constant 1.000000e+00 : f32
    %34 = vector.broadcast %cst_17 : f32 to vector<8x128xf32>
    %35 = arith.addf %34, %33 : vector<8x128xf32>
    %36 = arith.divf %34, %35 : vector<8x128xf32>
    %37 = arith.mulf %28, %1 : vector<8x128xf32>
    %38 = arith.mulf %22, %30 : vector<8x128xf32>
    %39 = arith.addf %37, %38 : vector<8x128xf32>
    %40 = math.tanh %39 : vector<8x128xf32>
    %41 = arith.mulf %36, %40 : vector<8x128xf32>
    %c2_i32 = arith.constant 2 : i32
    %c0_i32_18 = arith.constant 0 : i32
    %42 = arith.cmpi eq, %c2_i32, %c0_i32_18 : i32
    %c1_i32 = arith.constant 1 : i32
    %43 = arith.select %42, %c1_i32, %c2_i32 : i32
    %44 = arith.remsi %c0_i32, %43 : i32
    %c0_i32_19 = arith.constant 0 : i32
    %45 = arith.cmpi ne, %44, %c0_i32_19 : i32
    %c0_i32_20 = arith.constant 0 : i32
    %46 = arith.cmpi slt, %44, %c0_i32_20 : i32
    %c0_i32_21 = arith.constant 0 : i32
    %47 = arith.cmpi slt, %43, %c0_i32_21 : i32
    %48 = arith.xori %46, %47 : i1
    %49 = arith.andi %48, %45 : i1
    %50 = arith.addi %44, %43 : i32
    %51 = arith.select %49, %50, %44 : i32
    %52 = arith.index_cast %51 : i32 to index
    %c0_22 = arith.constant 0 : index
    %c0_23 = arith.constant 0 : index
    %53 = vector.load %arg8[%52, %c0_22, %c0_23] : memref<2x8x128xf32, #tpu.memory_space<vmem>>, vector<1x8x128xf32>
    %54 = vector.shape_cast %53 : vector<1x8x128xf32> to vector<8x128xf32>
    %55 = arith.index_cast %51 : i32 to index
    %c0_24 = arith.constant 0 : index
    %c0_25 = arith.constant 0 : index
    %56 = vector.load %arg9[%55, %c0_24, %c0_25] : memref<2x8x128xf32, #tpu.memory_space<vmem>>, vector<1x8x128xf32>
    %57 = vector.shape_cast %56 : vector<1x8x128xf32> to vector<8x128xf32>
    %58 = arith.index_cast %51 : i32 to index
    %c0_26 = arith.constant 0 : index
    %c0_27 = arith.constant 0 : index
    %59 = vector.load %arg8[%58, %c0_26, %c0_27] : memref<2x8x128xf32, #tpu.memory_space<vmem>>, vector<1x8x128xf32>
    %60 = vector.shape_cast %59 : vector<1x8x128xf32> to vector<8x128xf32>
    %61 = vector.shape_cast %41 : vector<8x128xf32> to vector<1x8x128xf32>
    tpu.vector_store %arg8[%58, %c0_26, %c0_27], %61 {strides = array<i32>} : memref<2x8x128xf32, #tpu.memory_space<vmem>>, vector<1x8x128xf32>,
    %62 = arith.index_cast %51 : i32 to index
    %c0_28 = arith.constant 0 : index
    %c0_29 = arith.constant 0 : index
    %63 = vector.load %arg9[%62, %c0_28, %c0_29] : memref<2x8x128xf32, #tpu.memory_space<vmem>>, vector<1x8x128xf32>
    %64 = vector.shape_cast %63 : vector<1x8x128xf32> to vector<8x128xf32>
    %65 = vector.shape_cast %39 : vector<8x128xf32> to vector<1x8x128xf32>
    tpu.vector_store %arg9[%62, %c0_28, %c0_29], %65 {strides = array<i32>} : memref<2x8x128xf32, #tpu.memory_space<vmem>>, vector<1x8x128xf32>,
    %c2_i32_30 = arith.constant 2 : i32
    %66 = arith.muli %c2_i32_30, %c0_i32 : i32
    %67 = arith.index_cast %66 : i32 to index
    %68 = memref.load %arg5[%67] : memref<16xf32, #tpu.memory_space<smem>>
    %c2_i32_31 = arith.constant 2 : i32
    %69 = arith.muli %c2_i32_31, %c0_i32 : i32
    %c1_i32_32 = arith.constant 1 : i32
    %70 = arith.addi %69, %c1_i32_32 : i32
    %71 = arith.index_cast %70 : i32 to index
    %72 = memref.load %arg5[%71] : memref<16xf32, #tpu.memory_space<smem>>
    %73 = vector.broadcast %68 : f32 to vector<8x128xf32>
    %74 = arith.mulf %73, %41 : vector<8x128xf32>
    %75 = math.tanh %54 : vector<8x128xf32>
    %76 = vector.broadcast %72 : f32 to vector<8x128xf32>
    %77 = arith.mulf %76, %75 : vector<8x128xf32>
    %78 = arith.addf %74, %77 : vector<8x128xf32>
    %79 = vector.broadcast %68 : f32 to vector<8x128xf32>
    %80 = arith.mulf %79, %39 : vector<8x128xf32>
    %81 = math.tanh %57 : vector<8x128xf32>
    %82 = vector.broadcast %72 : f32 to vector<8x128xf32>
    %83 = arith.mulf %82, %81 : vector<8x128xf32>
    %84 = arith.addf %80, %83 : vector<8x128xf32>
    %c1_i32_33 = arith.constant 1 : i32
    %85 = arith.index_cast %c1_i32_33 : i32 to index
    %c0_34 = arith.constant 0 : index
    %c0_35 = arith.constant 0 : index
    %86 = vector.load %arg0[%85, %c0_34, %c0_35] : memref<8x8x128xf32, #tpu.memory_space<vmem>>, vector<1x8x128xf32>
    %87 = vector.shape_cast %86 : vector<1x8x128xf32> to vector<8x128xf32>
    %88 = tpu.concatenate %87, %78 in 1 : vector<8x128xf32>, vector<8x128xf32> -> vector<8x256xf32>
    %cst_36 = arith.constant dense<0.000000e+00> : vector<8x512xf32>
    %89 = tpu.matmul %88, %8, %cst_36 {dimension_numbers = #tpu.dot_dimension_numbers<[1], [0], [0], [1], [0, 0, 1, 1], [], []>} : vector<8x256xf32>, vector<256x512xf32>, vector<8x512xf32> -> vector<8x512xf32>
    %90 = vector.broadcast %9 : vector<1x512xf32> to vector<8x512xf32>
    %91 = arith.addf %89, %90 : vector<8x512xf32>
    %92 = vector.extract_strided_slice %91 {offsets = [0, 0], sizes = [8, 128], strides = [1, 1]} : vector<8x512xf32> to vector<8x128xf32>
    %93 = arith.negf %92 : vector<8x128xf32>
    %94 = math.exp %93 : vector<8x128xf32>
    %cst_37 = arith.constant 1.000000e+00 : f32
    %95 = vector.broadcast %cst_37 : f32 to vector<8x128xf32>
    %96 = arith.addf %95, %94 : vector<8x128xf32>
    %97 = arith.divf %95, %96 : vector<8x128xf32>
    %98 = vector.extract_strided_slice %91 {offsets = [0, 128], sizes = [8, 128], strides = [1, 1]} : vector<8x512xf32> to vector<8x128xf32>
    %99 = arith.negf %98 : vector<8x128xf32>
    %100 = math.exp %99 : vector<8x128xf32>
    %cst_38 = arith.constant 1.000000e+00 : f32
    %101 = vector.broadcast %cst_38 : f32 to vector<8x128xf32>
    %102 = arith.addf %101, %100 : vector<8x128xf32>
    %103 = arith.divf %101, %102 : vector<8x128xf32>
    %104 = vector.extract_strided_slice %91 {offsets = [0, 256], sizes = [8, 128], strides = [1, 1]} : vector<8x512xf32> to vector<8x128xf32>
    %105 = math.tanh %104 : vector<8x128xf32>
    %106 = vector.extract_strided_slice %91 {offsets = [0, 384], sizes = [8, 128], strides = [1, 1]} : vector<8x512xf32> to vector<8x128xf32>
    %107 = arith.negf %106 : vector<8x128xf32>
    %108 = math.exp %107 : vector<8x128xf32>
    %cst_39 = arith.constant 1.000000e+00 : f32
    %109 = vector.broadcast %cst_39 : f32 to vector<8x128xf32>
    %110 = arith.addf %109, %108 : vector<8x128xf32>
    %111 = arith.divf %109, %110 : vector<8x128xf32>
    %112 = arith.mulf %103, %84 : vector<8x128xf32>
    %113 = arith.mulf %97, %105 : vector<8x128xf32>
    %114 = arith.addf %112, %113 : vector<8x128xf32>
    %115 = math.tanh %114 : vector<8x128xf32>
    %116 = arith.mulf %111, %115 : vector<8x128xf32>
    %c2_i32_40 = arith.constant 2 : i32
    %c0_i32_41 = arith.constant 0 : i32
    %117 = arith.cmpi eq, %c2_i32_40, %c0_i32_41 : i32
    %c1_i32_42 = arith.constant 1 : i32
    %118 = arith.select %117, %c1_i32_42, %c2_i32_40 : i32
    %119 = arith.remsi %c1_i32_33, %118 : i32
    %c0_i32_43 = arith.constant 0 : i32
    %120 = arith.cmpi ne, %119, %c0_i32_43 : i32
    %c0_i32_44 = arith.constant 0 : i32
    %121 = arith.cmpi slt, %119, %c0_i32_44 : i32
    %c0_i32_45 = arith.constant 0 : i32
    %122 = arith.cmpi slt, %118, %c0_i32_45 : i32
    %123 = arith.xori %121, %122 : i1
    %124 = arith.andi %123, %120 : i1
    %125 = arith.addi %119, %118 : i32
    %126 = arith.select %124, %125, %119 : i32
    %127 = arith.index_cast %126 : i32 to index
    %c0_46 = arith.constant 0 : index
    %c0_47 = arith.constant 0 : index
    %128 = vector.load %arg8[%127, %c0_46, %c0_47] : memref<2x8x128xf32, #tpu.memory_space<vmem>>, vector<1x8x128xf32>
    %129 = vector.shape_cast %128 : vector<1x8x128xf32> to vector<8x128xf32>
    %130 = arith.index_cast %126 : i32 to index
    %c0_48 = arith.constant 0 : index
    %c0_49 = arith.constant 0 : index
    %131 = vector.load %arg9[%130, %c0_48, %c0_49] : memref<2x8x128xf32, #tpu.memory_space<vmem>>, vector<1x8x128xf32>
    %132 = vector.shape_cast %131 : vector<1x8x128xf32> to vector<8x128xf32>
    %133 = arith.index_cast %126 : i32 to index
    %c0_50 = arith.constant 0 : index
    %c0_51 = arith.constant 0 : index
    %134 = vector.load %arg8[%133, %c0_50, %c0_51] : memref<2x8x128xf32, #tpu.memory_space<vmem>>, vector<1x8x128xf32>
    %135 = vector.shape_cast %134 : vector<1x8x128xf32> to vector<8x128xf32>
    %136 = vector.shape_cast %116 : vector<8x128xf32> to vector<1x8x128xf32>
    tpu.vector_store %arg8[%133, %c0_50, %c0_51], %136 {strides = array<i32>} : memref<2x8x128xf32, #tpu.memory_space<vmem>>, vector<1x8x128xf32>,
    %137 = arith.index_cast %126 : i32 to index
    %c0_52 = arith.constant 0 : index
    %c0_53 = arith.constant 0 : index
    %138 = vector.load %arg9[%137, %c0_52, %c0_53] : memref<2x8x128xf32, #tpu.memory_space<vmem>>, vector<1x8x128xf32>
    %139 = vector.shape_cast %138 : vector<1x8x128xf32> to vector<8x128xf32>
    %140 = vector.shape_cast %114 : vector<8x128xf32> to vector<1x8x128xf32>
    tpu.vector_store %arg9[%137, %c0_52, %c0_53], %140 {strides = array<i32>} : memref<2x8x128xf32, #tpu.memory_space<vmem>>, vector<1x8x128xf32>,
    %c2_i32_54 = arith.constant 2 : i32
    %141 = arith.muli %c2_i32_54, %c1_i32_33 : i32
    %142 = arith.index_cast %141 : i32 to index
    %143 = memref.load %arg5[%142] : memref<16xf32, #tpu.memory_space<smem>>
    %c2_i32_55 = arith.constant 2 : i32
    %144 = arith.muli %c2_i32_55, %c1_i32_33 : i32
    %c1_i32_56 = arith.constant 1 : i32
    %145 = arith.addi %144, %c1_i32_56 : i32
    %146 = arith.index_cast %145 : i32 to index
    %147 = memref.load %arg5[%146] : memref<16xf32, #tpu.memory_space<smem>>
    %148 = vector.broadcast %143 : f32 to vector<8x128xf32>
    %149 = arith.mulf %148, %116 : vector<8x128xf32>
    %150 = math.tanh %129 : vector<8x128xf32>
    %151 = vector.broadcast %147 : f32 to vector<8x128xf32>
    %152 = arith.mulf %151, %150 : vector<8x128xf32>
    %153 = arith.addf %149, %152 : vector<8x128xf32>
    %154 = vector.broadcast %143 : f32 to vector<8x128xf32>
    %155 = arith.mulf %154, %114 : vector<8x128xf32>
    %156 = math.tanh %132 : vector<8x128xf32>
    %157 = vector.broadcast %147 : f32 to vector<8x128xf32>
    %158 = arith.mulf %157, %156 : vector<8x128xf32>
    %159 = arith.addf %155, %158 : vector<8x128xf32>
    %c2_i32_57 = arith.constant 2 : i32
    %160 = arith.index_cast %c2_i32_57 : i32 to index
    %c0_58 = arith.constant 0 : index
    %c0_59 = arith.constant 0 : index
    %161 = vector.load %arg0[%160, %c0_58, %c0_59] : memref<8x8x128xf32, #tpu.memory_space<vmem>>, vector<1x8x128xf32>
    %162 = vector.shape_cast %161 : vector<1x8x128xf32> to vector<8x128xf32>
    %163 = tpu.concatenate %162, %153 in 1 : vector<8x128xf32>, vector<8x128xf32> -> vector<8x256xf32>
    %cst_60 = arith.constant dense<0.000000e+00> : vector<8x512xf32>
    %164 = tpu.matmul %163, %8, %cst_60 {dimension_numbers = #tpu.dot_dimension_numbers<[1], [0], [0], [1], [0, 0, 1, 1], [], []>} : vector<8x256xf32>, vector<256x512xf32>, vector<8x512xf32> -> vector<8x512xf32>
    %165 = vector.broadcast %9 : vector<1x512xf32> to vector<8x512xf32>
    %166 = arith.addf %164, %165 : vector<8x512xf32>
    %167 = vector.extract_strided_slice %166 {offsets = [0, 0], sizes = [8, 128], strides = [1, 1]} : vector<8x512xf32> to vector<8x128xf32>
    %168 = arith.negf %167 : vector<8x128xf32>
    %169 = math.exp %168 : vector<8x128xf32>
    %cst_61 = arith.constant 1.000000e+00 : f32
    %170 = vector.broadcast %cst_61 : f32 to vector<8x128xf32>
    %171 = arith.addf %170, %169 : vector<8x128xf32>
    %172 = arith.divf %170, %171 : vector<8x128xf32>
    %173 = vector.extract_strided_slice %166 {offsets = [0, 128], sizes = [8, 128], strides = [1, 1]} : vector<8x512xf32> to vector<8x128xf32>
    %174 = arith.negf %173 : vector<8x128xf32>
    %175 = math.exp %174 : vector<8x128xf32>
    %cst_62 = arith.constant 1.000000e+00 : f32
    %176 = vector.broadcast %cst_62 : f32 to vector<8x128xf32>
    %177 = arith.addf %176, %175 : vector<8x128xf32>
    %178 = arith.divf %176, %177 : vector<8x128xf32>
    %179 = vector.extract_strided_slice %166 {offsets = [0, 256], sizes = [8, 128], strides = [1, 1]} : vector<8x512xf32> to vector<8x128xf32>
    %180 = math.tanh %179 : vector<8x128xf32>
    %181 = vector.extract_strided_slice %166 {offsets = [0, 384], sizes = [8, 128], strides = [1, 1]} : vector<8x512xf32> to vector<8x128xf32>
    %182 = arith.negf %181 : vector<8x128xf32>
    %183 = math.exp %182 : vector<8x128xf32>
    %cst_63 = arith.constant 1.000000e+00 : f32
    %184 = vector.broadcast %cst_63 : f32 to vector<8x128xf32>
    %185 = arith.addf %184, %183 : vector<8x128xf32>
    %186 = arith.divf %184, %185 : vector<8x128xf32>
    %187 = arith.mulf %178, %159 : vector<8x128xf32>
    %188 = arith.mulf %172, %180 : vector<8x128xf32>
    %189 = arith.addf %187, %188 : vector<8x128xf32>
    %190 = math.tanh %189 : vector<8x128xf32>
    %191 = arith.mulf %186, %190 : vector<8x128xf32>
    %c2_i32_64 = arith.constant 2 : i32
    %c0_i32_65 = arith.constant 0 : i32
    %192 = arith.cmpi eq, %c2_i32_64, %c0_i32_65 : i32
    %c1_i32_66 = arith.constant 1 : i32
    %193 = arith.select %192, %c1_i32_66, %c2_i32_64 : i32
    %194 = arith.remsi %c2_i32_57, %193 : i32
    %c0_i32_67 = arith.constant 0 : i32
    %195 = arith.cmpi ne, %194, %c0_i32_67 : i32
    %c0_i32_68 = arith.constant 0 : i32
    %196 = arith.cmpi slt, %194, %c0_i32_68 : i32
    %c0_i32_69 = arith.constant 0 : i32
    %197 = arith.cmpi slt, %193, %c0_i32_69 : i32
    %198 = arith.xori %196, %197 : i1
    %199 = arith.andi %198, %195 : i1
    %200 = arith.addi %194, %193 : i32
    %201 = arith.select %199, %200, %194 : i32
    %202 = arith.index_cast %201 : i32 to index
    %c0_70 = arith.constant 0 : index
    %c0_71 = arith.constant 0 : index
    %203 = vector.load %arg8[%202, %c0_70, %c0_71] : memref<2x8x128xf32, #tpu.memory_space<vmem>>, vector<1x8x128xf32>
    %204 = vector.shape_cast %203 : vector<1x8x128xf32> to vector<8x128xf32>
    %205 = arith.index_cast %201 : i32 to index
    %c0_72 = arith.constant 0 : index
    %c0_73 = arith.constant 0 : index
    %206 = vector.load %arg9[%205, %c0_72, %c0_73] : memref<2x8x128xf32, #tpu.memory_space<vmem>>, vector<1x8x128xf32>
    %207 = vector.shape_cast %206 : vector<1x8x128xf32> to vector<8x128xf32>
    %208 = arith.index_cast %201 : i32 to index
    %c0_74 = arith.constant 0 : index
    %c0_75 = arith.constant 0 : index
    %209 = vector.load %arg8[%208, %c0_74, %c0_75] : memref<2x8x128xf32, #tpu.memory_space<vmem>>, vector<1x8x128xf32>
    %210 = vector.shape_cast %209 : vector<1x8x128xf32> to vector<8x128xf32>
    %211 = vector.shape_cast %191 : vector<8x128xf32> to vector<1x8x128xf32>
    tpu.vector_store %arg8[%208, %c0_74, %c0_75], %211 {strides = array<i32>} : memref<2x8x128xf32, #tpu.memory_space<vmem>>, vector<1x8x128xf32>,
    %212 = arith.index_cast %201 : i32 to index
    %c0_76 = arith.constant 0 : index
    %c0_77 = arith.constant 0 : index
    %213 = vector.load %arg9[%212, %c0_76, %c0_77] : memref<2x8x128xf32, #tpu.memory_space<vmem>>, vector<1x8x128xf32>
    %214 = vector.shape_cast %213 : vector<1x8x128xf32> to vector<8x128xf32>
    %215 = vector.shape_cast %189 : vector<8x128xf32> to vector<1x8x128xf32>
    tpu.vector_store %arg9[%212, %c0_76, %c0_77], %215 {strides = array<i32>} : memref<2x8x128xf32, #tpu.memory_space<vmem>>, vector<1x8x128xf32>,
    %c2_i32_78 = arith.constant 2 : i32
    %216 = arith.muli %c2_i32_78, %c2_i32_57 : i32
    %217 = arith.index_cast %216 : i32 to index
    %218 = memref.load %arg5[%217] : memref<16xf32, #tpu.memory_space<smem>>
    %c2_i32_79 = arith.constant 2 : i32
    %219 = arith.muli %c2_i32_79, %c2_i32_57 : i32
    %c1_i32_80 = arith.constant 1 : i32
    %220 = arith.addi %219, %c1_i32_80 : i32
    %221 = arith.index_cast %220 : i32 to index
    %222 = memref.load %arg5[%221] : memref<16xf32, #tpu.memory_space<smem>>
    %223 = vector.broadcast %218 : f32 to vector<8x128xf32>
    %224 = arith.mulf %223, %191 : vector<8x128xf32>
    %225 = math.tanh %204 : vector<8x128xf32>
    %226 = vector.broadcast %222 : f32 to vector<8x128xf32>
    %227 = arith.mulf %226, %225 : vector<8x128xf32>
    %228 = arith.addf %224, %227 : vector<8x128xf32>
    %229 = vector.broadcast %218 : f32 to vector<8x128xf32>
    %230 = arith.mulf %229, %189 : vector<8x128xf32>
    %231 = math.tanh %207 : vector<8x128xf32>
    %232 = vector.broadcast %222 : f32 to vector<8x128xf32>
    %233 = arith.mulf %232, %231 : vector<8x128xf32>
    %234 = arith.addf %230, %233 : vector<8x128xf32>
    %c3_i32 = arith.constant 3 : i32
    %235 = arith.index_cast %c3_i32 : i32 to index
    %c0_81 = arith.constant 0 : index
    %c0_82 = arith.constant 0 : index
    %236 = vector.load %arg0[%235, %c0_81, %c0_82] : memref<8x8x128xf32, #tpu.memory_space<vmem>>, vector<1x8x128xf32>
    %237 = vector.shape_cast %236 : vector<1x8x128xf32> to vector<8x128xf32>
    %238 = tpu.concatenate %237, %228 in 1 : vector<8x128xf32>, vector<8x128xf32> -> vector<8x256xf32>
    %cst_83 = arith.constant dense<0.000000e+00> : vector<8x512xf32>
    %239 = tpu.matmul %238, %8, %cst_83 {dimension_numbers = #tpu.dot_dimension_numbers<[1], [0], [0], [1], [0, 0, 1, 1], [], []>} : vector<8x256xf32>, vector<256x512xf32>, vector<8x512xf32> -> vector<8x512xf32>
    %240 = vector.broadcast %9 : vector<1x512xf32> to vector<8x512xf32>
    %241 = arith.addf %239, %240 : vector<8x512xf32>
    %242 = vector.extract_strided_slice %241 {offsets = [0, 0], sizes = [8, 128], strides = [1, 1]} : vector<8x512xf32> to vector<8x128xf32>
    %243 = arith.negf %242 : vector<8x128xf32>
    %244 = math.exp %243 : vector<8x128xf32>
    %cst_84 = arith.constant 1.000000e+00 : f32
    %245 = vector.broadcast %cst_84 : f32 to vector<8x128xf32>
    %246 = arith.addf %245, %244 : vector<8x128xf32>
    %247 = arith.divf %245, %246 : vector<8x128xf32>
    %248 = vector.extract_strided_slice %241 {offsets = [0, 128], sizes = [8, 128], strides = [1, 1]} : vector<8x512xf32> to vector<8x128xf32>
    %249 = arith.negf %248 : vector<8x128xf32>
    %250 = math.exp %249 : vector<8x128xf32>
    %cst_85 = arith.constant 1.000000e+00 : f32
    %251 = vector.broadcast %cst_85 : f32 to vector<8x128xf32>
    %252 = arith.addf %251, %250 : vector<8x128xf32>
    %253 = arith.divf %251, %252 : vector<8x128xf32>
    %254 = vector.extract_strided_slice %241 {offsets = [0, 256], sizes = [8, 128], strides = [1, 1]} : vector<8x512xf32> to vector<8x128xf32>
    %255 = math.tanh %254 : vector<8x128xf32>
    %256 = vector.extract_strided_slice %241 {offsets = [0, 384], sizes = [8, 128], strides = [1, 1]} : vector<8x512xf32> to vector<8x128xf32>
    %257 = arith.negf %256 : vector<8x128xf32>
    %258 = math.exp %257 : vector<8x128xf32>
    %cst_86 = arith.constant 1.000000e+00 : f32
    %259 = vector.broadcast %cst_86 : f32 to vector<8x128xf32>
    %260 = arith.addf %259, %258 : vector<8x128xf32>
    %261 = arith.divf %259, %260 : vector<8x128xf32>
    %262 = arith.mulf %253, %234 : vector<8x128xf32>
    %263 = arith.mulf %247, %255 : vector<8x128xf32>
    %264 = arith.addf %262, %263 : vector<8x128xf32>
    %265 = math.tanh %264 : vector<8x128xf32>
    %266 = arith.mulf %261, %265 : vector<8x128xf32>
    %c2_i32_87 = arith.constant 2 : i32
    %c0_i32_88 = arith.constant 0 : i32
    %267 = arith.cmpi eq, %c2_i32_87, %c0_i32_88 : i32
    %c1_i32_89 = arith.constant 1 : i32
    %268 = arith.select %267, %c1_i32_89, %c2_i32_87 : i32
    %269 = arith.remsi %c3_i32, %268 : i32
    %c0_i32_90 = arith.constant 0 : i32
    %270 = arith.cmpi ne, %269, %c0_i32_90 : i32
    %c0_i32_91 = arith.constant 0 : i32
    %271 = arith.cmpi slt, %269, %c0_i32_91 : i32
    %c0_i32_92 = arith.constant 0 : i32
    %272 = arith.cmpi slt, %268, %c0_i32_92 : i32
    %273 = arith.xori %271, %272 : i1
    %274 = arith.andi %273, %270 : i1
    %275 = arith.addi %269, %268 : i32
    %276 = arith.select %274, %275, %269 : i32
    %277 = arith.index_cast %276 : i32 to index
    %c0_93 = arith.constant 0 : index
    %c0_94 = arith.constant 0 : index
    %278 = vector.load %arg8[%277, %c0_93, %c0_94] : memref<2x8x128xf32, #tpu.memory_space<vmem>>, vector<1x8x128xf32>
    %279 = vector.shape_cast %278 : vector<1x8x128xf32> to vector<8x128xf32>
    %280 = arith.index_cast %276 : i32 to index
    %c0_95 = arith.constant 0 : index
    %c0_96 = arith.constant 0 : index
    %281 = vector.load %arg9[%280, %c0_95, %c0_96] : memref<2x8x128xf32, #tpu.memory_space<vmem>>, vector<1x8x128xf32>
    %282 = vector.shape_cast %281 : vector<1x8x128xf32> to vector<8x128xf32>
    %283 = arith.index_cast %276 : i32 to index
    %c0_97 = arith.constant 0 : index
    %c0_98 = arith.constant 0 : index
    %284 = vector.load %arg8[%283, %c0_97, %c0_98] : memref<2x8x128xf32, #tpu.memory_space<vmem>>, vector<1x8x128xf32>
    %285 = vector.shape_cast %284 : vector<1x8x128xf32> to vector<8x128xf32>
    %286 = vector.shape_cast %266 : vector<8x128xf32> to vector<1x8x128xf32>
    tpu.vector_store %arg8[%283, %c0_97, %c0_98], %286 {strides = array<i32>} : memref<2x8x128xf32, #tpu.memory_space<vmem>>, vector<1x8x128xf32>,
    %287 = arith.index_cast %276 : i32 to index
    %c0_99 = arith.constant 0 : index
    %c0_100 = arith.constant 0 : index
    %288 = vector.load %arg9[%287, %c0_99, %c0_100] : memref<2x8x128xf32, #tpu.memory_space<vmem>>, vector<1x8x128xf32>
    %289 = vector.shape_cast %288 : vector<1x8x128xf32> to vector<8x128xf32>
    %290 = vector.shape_cast %264 : vector<8x128xf32> to vector<1x8x128xf32>
    tpu.vector_store %arg9[%287, %c0_99, %c0_100], %290 {strides = array<i32>} : memref<2x8x128xf32, #tpu.memory_space<vmem>>, vector<1x8x128xf32>,
    %c2_i32_101 = arith.constant 2 : i32
    %291 = arith.muli %c2_i32_101, %c3_i32 : i32
    %292 = arith.index_cast %291 : i32 to index
    %293 = memref.load %arg5[%292] : memref<16xf32, #tpu.memory_space<smem>>
    %c2_i32_102 = arith.constant 2 : i32
    %294 = arith.muli %c2_i32_102, %c3_i32 : i32
    %c1_i32_103 = arith.constant 1 : i32
    %295 = arith.addi %294, %c1_i32_103 : i32
    %296 = arith.index_cast %295 : i32 to index
    %297 = memref.load %arg5[%296] : memref<16xf32, #tpu.memory_space<smem>>
    %298 = vector.broadcast %293 : f32 to vector<8x128xf32>
    %299 = arith.mulf %298, %266 : vector<8x128xf32>
    %300 = math.tanh %279 : vector<8x128xf32>
    %301 = vector.broadcast %297 : f32 to vector<8x128xf32>
    %302 = arith.mulf %301, %300 : vector<8x128xf32>
    %303 = arith.addf %299, %302 : vector<8x128xf32>
    %304 = vector.broadcast %293 : f32 to vector<8x128xf32>
    %305 = arith.mulf %304, %264 : vector<8x128xf32>
    %306 = math.tanh %282 : vector<8x128xf32>
    %307 = vector.broadcast %297 : f32 to vector<8x128xf32>
    %308 = arith.mulf %307, %306 : vector<8x128xf32>
    %309 = arith.addf %305, %308 : vector<8x128xf32>
    %c4_i32 = arith.constant 4 : i32
    %310 = arith.index_cast %c4_i32 : i32 to index
    %c0_104 = arith.constant 0 : index
    %c0_105 = arith.constant 0 : index
    %311 = vector.load %arg0[%310, %c0_104, %c0_105] : memref<8x8x128xf32, #tpu.memory_space<vmem>>, vector<1x8x128xf32>
    %312 = vector.shape_cast %311 : vector<1x8x128xf32> to vector<8x128xf32>
    %313 = tpu.concatenate %312, %303 in 1 : vector<8x128xf32>, vector<8x128xf32> -> vector<8x256xf32>
    %cst_106 = arith.constant dense<0.000000e+00> : vector<8x512xf32>
    %314 = tpu.matmul %313, %8, %cst_106 {dimension_numbers = #tpu.dot_dimension_numbers<[1], [0], [0], [1], [0, 0, 1, 1], [], []>} : vector<8x256xf32>, vector<256x512xf32>, vector<8x512xf32> -> vector<8x512xf32>
    %315 = vector.broadcast %9 : vector<1x512xf32> to vector<8x512xf32>
    %316 = arith.addf %314, %315 : vector<8x512xf32>
    %317 = vector.extract_strided_slice %316 {offsets = [0, 0], sizes = [8, 128], strides = [1, 1]} : vector<8x512xf32> to vector<8x128xf32>
    %318 = arith.negf %317 : vector<8x128xf32>
    %319 = math.exp %318 : vector<8x128xf32>
    %cst_107 = arith.constant 1.000000e+00 : f32
    %320 = vector.broadcast %cst_107 : f32 to vector<8x128xf32>
    %321 = arith.addf %320, %319 : vector<8x128xf32>
    %322 = arith.divf %320, %321 : vector<8x128xf32>
    %323 = vector.extract_strided_slice %316 {offsets = [0, 128], sizes = [8, 128], strides = [1, 1]} : vector<8x512xf32> to vector<8x128xf32>
    %324 = arith.negf %323 : vector<8x128xf32>
    %325 = math.exp %324 : vector<8x128xf32>
    %cst_108 = arith.constant 1.000000e+00 : f32
    %326 = vector.broadcast %cst_108 : f32 to vector<8x128xf32>
    %327 = arith.addf %326, %325 : vector<8x128xf32>
    %328 = arith.divf %326, %327 : vector<8x128xf32>
    %329 = vector.extract_strided_slice %316 {offsets = [0, 256], sizes = [8, 128], strides = [1, 1]} : vector<8x512xf32> to vector<8x128xf32>
    %330 = math.tanh %329 : vector<8x128xf32>
    %331 = vector.extract_strided_slice %316 {offsets = [0, 384], sizes = [8, 128], strides = [1, 1]} : vector<8x512xf32> to vector<8x128xf32>
    %332 = arith.negf %331 : vector<8x128xf32>
    %333 = math.exp %332 : vector<8x128xf32>
    %cst_109 = arith.constant 1.000000e+00 : f32
    %334 = vector.broadcast %cst_109 : f32 to vector<8x128xf32>
    %335 = arith.addf %334, %333 : vector<8x128xf32>
    %336 = arith.divf %334, %335 : vector<8x128xf32>
    %337 = arith.mulf %328, %309 : vector<8x128xf32>
    %338 = arith.mulf %322, %330 : vector<8x128xf32>
    %339 = arith.addf %337, %338 : vector<8x128xf32>
    %340 = math.tanh %339 : vector<8x128xf32>
    %341 = arith.mulf %336, %340 : vector<8x128xf32>
    %c2_i32_110 = arith.constant 2 : i32
    %c0_i32_111 = arith.constant 0 : i32
    %342 = arith.cmpi eq, %c2_i32_110, %c0_i32_111 : i32
    %c1_i32_112 = arith.constant 1 : i32
    %343 = arith.select %342, %c1_i32_112, %c2_i32_110 : i32
    %344 = arith.remsi %c4_i32, %343 : i32
    %c0_i32_113 = arith.constant 0 : i32
    %345 = arith.cmpi ne, %344, %c0_i32_113 : i32
    %c0_i32_114 = arith.constant 0 : i32
    %346 = arith.cmpi slt, %344, %c0_i32_114 : i32
    %c0_i32_115 = arith.constant 0 : i32
    %347 = arith.cmpi slt, %343, %c0_i32_115 : i32
    %348 = arith.xori %346, %347 : i1
    %349 = arith.andi %348, %345 : i1
    %350 = arith.addi %344, %343 : i32
    %351 = arith.select %349, %350, %344 : i32
    %352 = arith.index_cast %351 : i32 to index
    %c0_116 = arith.constant 0 : index
    %c0_117 = arith.constant 0 : index
    %353 = vector.load %arg8[%352, %c0_116, %c0_117] : memref<2x8x128xf32, #tpu.memory_space<vmem>>, vector<1x8x128xf32>
    %354 = vector.shape_cast %353 : vector<1x8x128xf32> to vector<8x128xf32>
    %355 = arith.index_cast %351 : i32 to index
    %c0_118 = arith.constant 0 : index
    %c0_119 = arith.constant 0 : index
    %356 = vector.load %arg9[%355, %c0_118, %c0_119] : memref<2x8x128xf32, #tpu.memory_space<vmem>>, vector<1x8x128xf32>
    %357 = vector.shape_cast %356 : vector<1x8x128xf32> to vector<8x128xf32>
    %358 = arith.index_cast %351 : i32 to index
    %c0_120 = arith.constant 0 : index
    %c0_121 = arith.constant 0 : index
    %359 = vector.load %arg8[%358, %c0_120, %c0_121] : memref<2x8x128xf32, #tpu.memory_space<vmem>>, vector<1x8x128xf32>
    %360 = vector.shape_cast %359 : vector<1x8x128xf32> to vector<8x128xf32>
    %361 = vector.shape_cast %341 : vector<8x128xf32> to vector<1x8x128xf32>
    tpu.vector_store %arg8[%358, %c0_120, %c0_121], %361 {strides = array<i32>} : memref<2x8x128xf32, #tpu.memory_space<vmem>>, vector<1x8x128xf32>,
    %362 = arith.index_cast %351 : i32 to index
    %c0_122 = arith.constant 0 : index
    %c0_123 = arith.constant 0 : index
    %363 = vector.load %arg9[%362, %c0_122, %c0_123] : memref<2x8x128xf32, #tpu.memory_space<vmem>>, vector<1x8x128xf32>
    %364 = vector.shape_cast %363 : vector<1x8x128xf32> to vector<8x128xf32>
    %365 = vector.shape_cast %339 : vector<8x128xf32> to vector<1x8x128xf32>
    tpu.vector_store %arg9[%362, %c0_122, %c0_123], %365 {strides = array<i32>} : memref<2x8x128xf32, #tpu.memory_space<vmem>>, vector<1x8x128xf32>,
    %c2_i32_124 = arith.constant 2 : i32
    %366 = arith.muli %c2_i32_124, %c4_i32 : i32
    %367 = arith.index_cast %366 : i32 to index
    %368 = memref.load %arg5[%367] : memref<16xf32, #tpu.memory_space<smem>>
    %c2_i32_125 = arith.constant 2 : i32
    %369 = arith.muli %c2_i32_125, %c4_i32 : i32
    %c1_i32_126 = arith.constant 1 : i32
    %370 = arith.addi %369, %c1_i32_126 : i32
    %371 = arith.index_cast %370 : i32 to index
    %372 = memref.load %arg5[%371] : memref<16xf32, #tpu.memory_space<smem>>
    %373 = vector.broadcast %368 : f32 to vector<8x128xf32>
    %374 = arith.mulf %373, %341 : vector<8x128xf32>
    %375 = math.tanh %354 : vector<8x128xf32>
    %376 = vector.broadcast %372 : f32 to vector<8x128xf32>
    %377 = arith.mulf %376, %375 : vector<8x128xf32>
    %378 = arith.addf %374, %377 : vector<8x128xf32>
    %379 = vector.broadcast %368 : f32 to vector<8x128xf32>
    %380 = arith.mulf %379, %339 : vector<8x128xf32>
    %381 = math.tanh %357 : vector<8x128xf32>
    %382 = vector.broadcast %372 : f32 to vector<8x128xf32>
    %383 = arith.mulf %382, %381 : vector<8x128xf32>
    %384 = arith.addf %380, %383 : vector<8x128xf32>
    %c5_i32 = arith.constant 5 : i32
    %385 = arith.index_cast %c5_i32 : i32 to index
    %c0_127 = arith.constant 0 : index
    %c0_128 = arith.constant 0 : index
    %386 = vector.load %arg0[%385, %c0_127, %c0_128] : memref<8x8x128xf32, #tpu.memory_space<vmem>>, vector<1x8x128xf32>
    %387 = vector.shape_cast %386 : vector<1x8x128xf32> to vector<8x128xf32>
    %388 = tpu.concatenate %387, %378 in 1 : vector<8x128xf32>, vector<8x128xf32> -> vector<8x256xf32>
    %cst_129 = arith.constant dense<0.000000e+00> : vector<8x512xf32>
    %389 = tpu.matmul %388, %8, %cst_129 {dimension_numbers = #tpu.dot_dimension_numbers<[1], [0], [0], [1], [0, 0, 1, 1], [], []>} : vector<8x256xf32>, vector<256x512xf32>, vector<8x512xf32> -> vector<8x512xf32>
    %390 = vector.broadcast %9 : vector<1x512xf32> to vector<8x512xf32>
    %391 = arith.addf %389, %390 : vector<8x512xf32>
    %392 = vector.extract_strided_slice %391 {offsets = [0, 0], sizes = [8, 128], strides = [1, 1]} : vector<8x512xf32> to vector<8x128xf32>
    %393 = arith.negf %392 : vector<8x128xf32>
    %394 = math.exp %393 : vector<8x128xf32>
    %cst_130 = arith.constant 1.000000e+00 : f32
    %395 = vector.broadcast %cst_130 : f32 to vector<8x128xf32>
    %396 = arith.addf %395, %394 : vector<8x128xf32>
    %397 = arith.divf %395, %396 : vector<8x128xf32>
    %398 = vector.extract_strided_slice %391 {offsets = [0, 128], sizes = [8, 128], strides = [1, 1]} : vector<8x512xf32> to vector<8x128xf32>
    %399 = arith.negf %398 : vector<8x128xf32>
    %400 = math.exp %399 : vector<8x128xf32>
    %cst_131 = arith.constant 1.000000e+00 : f32
    %401 = vector.broadcast %cst_131 : f32 to vector<8x128xf32>
    %402 = arith.addf %401, %400 : vector<8x128xf32>
    %403 = arith.divf %401, %402 : vector<8x128xf32>
    %404 = vector.extract_strided_slice %391 {offsets = [0, 256], sizes = [8, 128], strides = [1, 1]} : vector<8x512xf32> to vector<8x128xf32>
    %405 = math.tanh %404 : vector<8x128xf32>
    %406 = vector.extract_strided_slice %391 {offsets = [0, 384], sizes = [8, 128], strides = [1, 1]} : vector<8x512xf32> to vector<8x128xf32>
    %407 = arith.negf %406 : vector<8x128xf32>
    %408 = math.exp %407 : vector<8x128xf32>
    %cst_132 = arith.constant 1.000000e+00 : f32
    %409 = vector.broadcast %cst_132 : f32 to vector<8x128xf32>
    %410 = arith.addf %409, %408 : vector<8x128xf32>
    %411 = arith.divf %409, %410 : vector<8x128xf32>
    %412 = arith.mulf %403, %384 : vector<8x128xf32>
    %413 = arith.mulf %397, %405 : vector<8x128xf32>
    %414 = arith.addf %412, %413 : vector<8x128xf32>
    %415 = math.tanh %414 : vector<8x128xf32>
    %416 = arith.mulf %411, %415 : vector<8x128xf32>
    %c2_i32_133 = arith.constant 2 : i32
    %c0_i32_134 = arith.constant 0 : i32
    %417 = arith.cmpi eq, %c2_i32_133, %c0_i32_134 : i32
    %c1_i32_135 = arith.constant 1 : i32
    %418 = arith.select %417, %c1_i32_135, %c2_i32_133 : i32
    %419 = arith.remsi %c5_i32, %418 : i32
    %c0_i32_136 = arith.constant 0 : i32
    %420 = arith.cmpi ne, %419, %c0_i32_136 : i32
    %c0_i32_137 = arith.constant 0 : i32
    %421 = arith.cmpi slt, %419, %c0_i32_137 : i32
    %c0_i32_138 = arith.constant 0 : i32
    %422 = arith.cmpi slt, %418, %c0_i32_138 : i32
    %423 = arith.xori %421, %422 : i1
    %424 = arith.andi %423, %420 : i1
    %425 = arith.addi %419, %418 : i32
    %426 = arith.select %424, %425, %419 : i32
    %427 = arith.index_cast %426 : i32 to index
    %c0_139 = arith.constant 0 : index
    %c0_140 = arith.constant 0 : index
    %428 = vector.load %arg8[%427, %c0_139, %c0_140] : memref<2x8x128xf32, #tpu.memory_space<vmem>>, vector<1x8x128xf32>
    %429 = vector.shape_cast %428 : vector<1x8x128xf32> to vector<8x128xf32>
    %430 = arith.index_cast %426 : i32 to index
    %c0_141 = arith.constant 0 : index
    %c0_142 = arith.constant 0 : index
    %431 = vector.load %arg9[%430, %c0_141, %c0_142] : memref<2x8x128xf32, #tpu.memory_space<vmem>>, vector<1x8x128xf32>
    %432 = vector.shape_cast %431 : vector<1x8x128xf32> to vector<8x128xf32>
    %433 = arith.index_cast %426 : i32 to index
    %c0_143 = arith.constant 0 : index
    %c0_144 = arith.constant 0 : index
    %434 = vector.load %arg8[%433, %c0_143, %c0_144] : memref<2x8x128xf32, #tpu.memory_space<vmem>>, vector<1x8x128xf32>
    %435 = vector.shape_cast %434 : vector<1x8x128xf32> to vector<8x128xf32>
    %436 = vector.shape_cast %416 : vector<8x128xf32> to vector<1x8x128xf32>
    tpu.vector_store %arg8[%433, %c0_143, %c0_144], %436 {strides = array<i32>} : memref<2x8x128xf32, #tpu.memory_space<vmem>>, vector<1x8x128xf32>,
    %437 = arith.index_cast %426 : i32 to index
    %c0_145 = arith.constant 0 : index
    %c0_146 = arith.constant 0 : index
    %438 = vector.load %arg9[%437, %c0_145, %c0_146] : memref<2x8x128xf32, #tpu.memory_space<vmem>>, vector<1x8x128xf32>
    %439 = vector.shape_cast %438 : vector<1x8x128xf32> to vector<8x128xf32>
    %440 = vector.shape_cast %414 : vector<8x128xf32> to vector<1x8x128xf32>
    tpu.vector_store %arg9[%437, %c0_145, %c0_146], %440 {strides = array<i32>} : memref<2x8x128xf32, #tpu.memory_space<vmem>>, vector<1x8x128xf32>,
    %c2_i32_147 = arith.constant 2 : i32
    %441 = arith.muli %c2_i32_147, %c5_i32 : i32
    %442 = arith.index_cast %441 : i32 to index
    %443 = memref.load %arg5[%442] : memref<16xf32, #tpu.memory_space<smem>>
    %c2_i32_148 = arith.constant 2 : i32
    %444 = arith.muli %c2_i32_148, %c5_i32 : i32
    %c1_i32_149 = arith.constant 1 : i32
    %445 = arith.addi %444, %c1_i32_149 : i32
    %446 = arith.index_cast %445 : i32 to index
    %447 = memref.load %arg5[%446] : memref<16xf32, #tpu.memory_space<smem>>
    %448 = vector.broadcast %443 : f32 to vector<8x128xf32>
    %449 = arith.mulf %448, %416 : vector<8x128xf32>
    %450 = math.tanh %429 : vector<8x128xf32>
    %451 = vector.broadcast %447 : f32 to vector<8x128xf32>
    %452 = arith.mulf %451, %450 : vector<8x128xf32>
    %453 = arith.addf %449, %452 : vector<8x128xf32>
    %454 = vector.broadcast %443 : f32 to vector<8x128xf32>
    %455 = arith.mulf %454, %414 : vector<8x128xf32>
    %456 = math.tanh %432 : vector<8x128xf32>
    %457 = vector.broadcast %447 : f32 to vector<8x128xf32>
    %458 = arith.mulf %457, %456 : vector<8x128xf32>
    %459 = arith.addf %455, %458 : vector<8x128xf32>
    %c6_i32 = arith.constant 6 : i32
    %460 = arith.index_cast %c6_i32 : i32 to index
    %c0_150 = arith.constant 0 : index
    %c0_151 = arith.constant 0 : index
    %461 = vector.load %arg0[%460, %c0_150, %c0_151] : memref<8x8x128xf32, #tpu.memory_space<vmem>>, vector<1x8x128xf32>
    %462 = vector.shape_cast %461 : vector<1x8x128xf32> to vector<8x128xf32>
    %463 = tpu.concatenate %462, %453 in 1 : vector<8x128xf32>, vector<8x128xf32> -> vector<8x256xf32>
    %cst_152 = arith.constant dense<0.000000e+00> : vector<8x512xf32>
    %464 = tpu.matmul %463, %8, %cst_152 {dimension_numbers = #tpu.dot_dimension_numbers<[1], [0], [0], [1], [0, 0, 1, 1], [], []>} : vector<8x256xf32>, vector<256x512xf32>, vector<8x512xf32> -> vector<8x512xf32>
    %465 = vector.broadcast %9 : vector<1x512xf32> to vector<8x512xf32>
    %466 = arith.addf %464, %465 : vector<8x512xf32>
    %467 = vector.extract_strided_slice %466 {offsets = [0, 0], sizes = [8, 128], strides = [1, 1]} : vector<8x512xf32> to vector<8x128xf32>
    %468 = arith.negf %467 : vector<8x128xf32>
    %469 = math.exp %468 : vector<8x128xf32>
    %cst_153 = arith.constant 1.000000e+00 : f32
    %470 = vector.broadcast %cst_153 : f32 to vector<8x128xf32>
    %471 = arith.addf %470, %469 : vector<8x128xf32>
    %472 = arith.divf %470, %471 : vector<8x128xf32>
    %473 = vector.extract_strided_slice %466 {offsets = [0, 128], sizes = [8, 128], strides = [1, 1]} : vector<8x512xf32> to vector<8x128xf32>
    %474 = arith.negf %473 : vector<8x128xf32>
    %475 = math.exp %474 : vector<8x128xf32>
    %cst_154 = arith.constant 1.000000e+00 : f32
    %476 = vector.broadcast %cst_154 : f32 to vector<8x128xf32>
    %477 = arith.addf %476, %475 : vector<8x128xf32>
    %478 = arith.divf %476, %477 : vector<8x128xf32>
    %479 = vector.extract_strided_slice %466 {offsets = [0, 256], sizes = [8, 128], strides = [1, 1]} : vector<8x512xf32> to vector<8x128xf32>
    %480 = math.tanh %479 : vector<8x128xf32>
    %481 = vector.extract_strided_slice %466 {offsets = [0, 384], sizes = [8, 128], strides = [1, 1]} : vector<8x512xf32> to vector<8x128xf32>
    %482 = arith.negf %481 : vector<8x128xf32>
    %483 = math.exp %482 : vector<8x128xf32>
    %cst_155 = arith.constant 1.000000e+00 : f32
    %484 = vector.broadcast %cst_155 : f32 to vector<8x128xf32>
    %485 = arith.addf %484, %483 : vector<8x128xf32>
    %486 = arith.divf %484, %485 : vector<8x128xf32>
    %487 = arith.mulf %478, %459 : vector<8x128xf32>
    %488 = arith.mulf %472, %480 : vector<8x128xf32>
    %489 = arith.addf %487, %488 : vector<8x128xf32>
    %490 = math.tanh %489 : vector<8x128xf32>
    %491 = arith.mulf %486, %490 : vector<8x128xf32>
    %c2_i32_156 = arith.constant 2 : i32
    %c0_i32_157 = arith.constant 0 : i32
    %492 = arith.cmpi eq, %c2_i32_156, %c0_i32_157 : i32
    %c1_i32_158 = arith.constant 1 : i32
    %493 = arith.select %492, %c1_i32_158, %c2_i32_156 : i32
    %494 = arith.remsi %c6_i32, %493 : i32
    %c0_i32_159 = arith.constant 0 : i32
    %495 = arith.cmpi ne, %494, %c0_i32_159 : i32
    %c0_i32_160 = arith.constant 0 : i32
    %496 = arith.cmpi slt, %494, %c0_i32_160 : i32
    %c0_i32_161 = arith.constant 0 : i32
    %497 = arith.cmpi slt, %493, %c0_i32_161 : i32
    %498 = arith.xori %496, %497 : i1
    %499 = arith.andi %498, %495 : i1
    %500 = arith.addi %494, %493 : i32
    %501 = arith.select %499, %500, %494 : i32
    %502 = arith.index_cast %501 : i32 to index
    %c0_162 = arith.constant 0 : index
    %c0_163 = arith.constant 0 : index
    %503 = vector.load %arg8[%502, %c0_162, %c0_163] : memref<2x8x128xf32, #tpu.memory_space<vmem>>, vector<1x8x128xf32>
    %504 = vector.shape_cast %503 : vector<1x8x128xf32> to vector<8x128xf32>
    %505 = arith.index_cast %501 : i32 to index
    %c0_164 = arith.constant 0 : index
    %c0_165 = arith.constant 0 : index
    %506 = vector.load %arg9[%505, %c0_164, %c0_165] : memref<2x8x128xf32, #tpu.memory_space<vmem>>, vector<1x8x128xf32>
    %507 = vector.shape_cast %506 : vector<1x8x128xf32> to vector<8x128xf32>
    %508 = arith.index_cast %501 : i32 to index
    %c0_166 = arith.constant 0 : index
    %c0_167 = arith.constant 0 : index
    %509 = vector.load %arg8[%508, %c0_166, %c0_167] : memref<2x8x128xf32, #tpu.memory_space<vmem>>, vector<1x8x128xf32>
    %510 = vector.shape_cast %509 : vector<1x8x128xf32> to vector<8x128xf32>
    %511 = vector.shape_cast %491 : vector<8x128xf32> to vector<1x8x128xf32>
    tpu.vector_store %arg8[%508, %c0_166, %c0_167], %511 {strides = array<i32>} : memref<2x8x128xf32, #tpu.memory_space<vmem>>, vector<1x8x128xf32>,
    %512 = arith.index_cast %501 : i32 to index
    %c0_168 = arith.constant 0 : index
    %c0_169 = arith.constant 0 : index
    %513 = vector.load %arg9[%512, %c0_168, %c0_169] : memref<2x8x128xf32, #tpu.memory_space<vmem>>, vector<1x8x128xf32>
    %514 = vector.shape_cast %513 : vector<1x8x128xf32> to vector<8x128xf32>
    %515 = vector.shape_cast %489 : vector<8x128xf32> to vector<1x8x128xf32>
    tpu.vector_store %arg9[%512, %c0_168, %c0_169], %515 {strides = array<i32>} : memref<2x8x128xf32, #tpu.memory_space<vmem>>, vector<1x8x128xf32>,
    %c2_i32_170 = arith.constant 2 : i32
    %516 = arith.muli %c2_i32_170, %c6_i32 : i32
    %517 = arith.index_cast %516 : i32 to index
    %518 = memref.load %arg5[%517] : memref<16xf32, #tpu.memory_space<smem>>
    %c2_i32_171 = arith.constant 2 : i32
    %519 = arith.muli %c2_i32_171, %c6_i32 : i32
    %c1_i32_172 = arith.constant 1 : i32
    %520 = arith.addi %519, %c1_i32_172 : i32
    %521 = arith.index_cast %520 : i32 to index
    %522 = memref.load %arg5[%521] : memref<16xf32, #tpu.memory_space<smem>>
    %523 = vector.broadcast %518 : f32 to vector<8x128xf32>
    %524 = arith.mulf %523, %491 : vector<8x128xf32>
    %525 = math.tanh %504 : vector<8x128xf32>
    %526 = vector.broadcast %522 : f32 to vector<8x128xf32>
    %527 = arith.mulf %526, %525 : vector<8x128xf32>
    %528 = arith.addf %524, %527 : vector<8x128xf32>
    %529 = vector.broadcast %518 : f32 to vector<8x128xf32>
    %530 = arith.mulf %529, %489 : vector<8x128xf32>
    %531 = math.tanh %507 : vector<8x128xf32>
    %532 = vector.broadcast %522 : f32 to vector<8x128xf32>
    %533 = arith.mulf %532, %531 : vector<8x128xf32>
    %534 = arith.addf %530, %533 : vector<8x128xf32>
    %c7_i32 = arith.constant 7 : i32
    %535 = arith.index_cast %c7_i32 : i32 to index
    %c0_173 = arith.constant 0 : index
    %c0_174 = arith.constant 0 : index
    %536 = vector.load %arg0[%535, %c0_173, %c0_174] : memref<8x8x128xf32, #tpu.memory_space<vmem>>, vector<1x8x128xf32>
    %537 = vector.shape_cast %536 : vector<1x8x128xf32> to vector<8x128xf32>
    %538 = tpu.concatenate %537, %528 in 1 : vector<8x128xf32>, vector<8x128xf32> -> vector<8x256xf32>
    %cst_175 = arith.constant dense<0.000000e+00> : vector<8x512xf32>
    %539 = tpu.matmul %538, %8, %cst_175 {dimension_numbers = #tpu.dot_dimension_numbers<[1], [0], [0], [1], [0, 0, 1, 1], [], []>} : vector<8x256xf32>, vector<256x512xf32>, vector<8x512xf32> -> vector<8x512xf32>
    %540 = vector.broadcast %9 : vector<1x512xf32> to vector<8x512xf32>
    %541 = arith.addf %539, %540 : vector<8x512xf32>
    %542 = vector.extract_strided_slice %541 {offsets = [0, 0], sizes = [8, 128], strides = [1, 1]} : vector<8x512xf32> to vector<8x128xf32>
    %543 = arith.negf %542 : vector<8x128xf32>
    %544 = math.exp %543 : vector<8x128xf32>
    %cst_176 = arith.constant 1.000000e+00 : f32
    %545 = vector.broadcast %cst_176 : f32 to vector<8x128xf32>
    %546 = arith.addf %545, %544 : vector<8x128xf32>
    %547 = arith.divf %545, %546 : vector<8x128xf32>
    %548 = vector.extract_strided_slice %541 {offsets = [0, 128], sizes = [8, 128], strides = [1, 1]} : vector<8x512xf32> to vector<8x128xf32>
    %549 = arith.negf %548 : vector<8x128xf32>
    %550 = math.exp %549 : vector<8x128xf32>
    %cst_177 = arith.constant 1.000000e+00 : f32
    %551 = vector.broadcast %cst_177 : f32 to vector<8x128xf32>
    %552 = arith.addf %551, %550 : vector<8x128xf32>
    %553 = arith.divf %551, %552 : vector<8x128xf32>
    %554 = vector.extract_strided_slice %541 {offsets = [0, 256], sizes = [8, 128], strides = [1, 1]} : vector<8x512xf32> to vector<8x128xf32>
    %555 = math.tanh %554 : vector<8x128xf32>
    %556 = vector.extract_strided_slice %541 {offsets = [0, 384], sizes = [8, 128], strides = [1, 1]} : vector<8x512xf32> to vector<8x128xf32>
    %557 = arith.negf %556 : vector<8x128xf32>
    %558 = math.exp %557 : vector<8x128xf32>
    %cst_178 = arith.constant 1.000000e+00 : f32
    %559 = vector.broadcast %cst_178 : f32 to vector<8x128xf32>
    %560 = arith.addf %559, %558 : vector<8x128xf32>
    %561 = arith.divf %559, %560 : vector<8x128xf32>
    %562 = arith.mulf %553, %534 : vector<8x128xf32>
    %563 = arith.mulf %547, %555 : vector<8x128xf32>
    %564 = arith.addf %562, %563 : vector<8x128xf32>
    %565 = math.tanh %564 : vector<8x128xf32>
    %566 = arith.mulf %561, %565 : vector<8x128xf32>
    %c2_i32_179 = arith.constant 2 : i32
    %c0_i32_180 = arith.constant 0 : i32
    %567 = arith.cmpi eq, %c2_i32_179, %c0_i32_180 : i32
    %c1_i32_181 = arith.constant 1 : i32
    %568 = arith.select %567, %c1_i32_181, %c2_i32_179 : i32
    %569 = arith.remsi %c7_i32, %568 : i32
    %c0_i32_182 = arith.constant 0 : i32
    %570 = arith.cmpi ne, %569, %c0_i32_182 : i32
    %c0_i32_183 = arith.constant 0 : i32
    %571 = arith.cmpi slt, %569, %c0_i32_183 : i32
    %c0_i32_184 = arith.constant 0 : i32
    %572 = arith.cmpi slt, %568, %c0_i32_184 : i32
    %573 = arith.xori %571, %572 : i1
    %574 = arith.andi %573, %570 : i1
    %575 = arith.addi %569, %568 : i32
    %576 = arith.select %574, %575, %569 : i32
    %577 = arith.index_cast %576 : i32 to index
    %c0_185 = arith.constant 0 : index
    %c0_186 = arith.constant 0 : index
    %578 = vector.load %arg8[%577, %c0_185, %c0_186] : memref<2x8x128xf32, #tpu.memory_space<vmem>>, vector<1x8x128xf32>
    %579 = vector.shape_cast %578 : vector<1x8x128xf32> to vector<8x128xf32>
    %580 = arith.index_cast %576 : i32 to index
    %c0_187 = arith.constant 0 : index
    %c0_188 = arith.constant 0 : index
    %581 = vector.load %arg9[%580, %c0_187, %c0_188] : memref<2x8x128xf32, #tpu.memory_space<vmem>>, vector<1x8x128xf32>
    %582 = vector.shape_cast %581 : vector<1x8x128xf32> to vector<8x128xf32>
    %583 = arith.index_cast %576 : i32 to index
    %c0_189 = arith.constant 0 : index
    %c0_190 = arith.constant 0 : index
    %584 = vector.load %arg8[%583, %c0_189, %c0_190] : memref<2x8x128xf32, #tpu.memory_space<vmem>>, vector<1x8x128xf32>
    %585 = vector.shape_cast %584 : vector<1x8x128xf32> to vector<8x128xf32>
    %586 = vector.shape_cast %566 : vector<8x128xf32> to vector<1x8x128xf32>
    tpu.vector_store %arg8[%583, %c0_189, %c0_190], %586 {strides = array<i32>} : memref<2x8x128xf32, #tpu.memory_space<vmem>>, vector<1x8x128xf32>,
    %587 = arith.index_cast %576 : i32 to index
    %c0_191 = arith.constant 0 : index
    %c0_192 = arith.constant 0 : index
    %588 = vector.load %arg9[%587, %c0_191, %c0_192] : memref<2x8x128xf32, #tpu.memory_space<vmem>>, vector<1x8x128xf32>
    %589 = vector.shape_cast %588 : vector<1x8x128xf32> to vector<8x128xf32>
    %590 = vector.shape_cast %564 : vector<8x128xf32> to vector<1x8x128xf32>
    tpu.vector_store %arg9[%587, %c0_191, %c0_192], %590 {strides = array<i32>} : memref<2x8x128xf32, #tpu.memory_space<vmem>>, vector<1x8x128xf32>,
    %c2_i32_193 = arith.constant 2 : i32
    %591 = arith.muli %c2_i32_193, %c7_i32 : i32
    %592 = arith.index_cast %591 : i32 to index
    %593 = memref.load %arg5[%592] : memref<16xf32, #tpu.memory_space<smem>>
    %c2_i32_194 = arith.constant 2 : i32
    %594 = arith.muli %c2_i32_194, %c7_i32 : i32
    %c1_i32_195 = arith.constant 1 : i32
    %595 = arith.addi %594, %c1_i32_195 : i32
    %596 = arith.index_cast %595 : i32 to index
    %597 = memref.load %arg5[%596] : memref<16xf32, #tpu.memory_space<smem>>
    %598 = vector.broadcast %593 : f32 to vector<8x128xf32>
    %599 = arith.mulf %598, %566 : vector<8x128xf32>
    %600 = math.tanh %579 : vector<8x128xf32>
    %601 = vector.broadcast %597 : f32 to vector<8x128xf32>
    %602 = arith.mulf %601, %600 : vector<8x128xf32>
    %603 = arith.addf %599, %602 : vector<8x128xf32>
    %604 = vector.broadcast %593 : f32 to vector<8x128xf32>
    %605 = arith.mulf %604, %564 : vector<8x128xf32>
    %606 = math.tanh %582 : vector<8x128xf32>
    %607 = vector.broadcast %597 : f32 to vector<8x128xf32>
    %608 = arith.mulf %607, %606 : vector<8x128xf32>
    %609 = arith.addf %605, %608 : vector<8x128xf32>
    %c8_i32 = arith.constant 8 : i32
    %c0_196 = arith.constant 0 : index
    %c0_197 = arith.constant 0 : index
    %610 = vector.load %arg6[%c0_196, %c0_197] : memref<8x128xf32, #tpu.memory_space<vmem>>, vector<8x128xf32>
    tpu.vector_store %arg6[%c0_196, %c0_197], %603 {strides = array<i32>} : memref<8x128xf32, #tpu.memory_space<vmem>>, vector<8x128xf32>,
    %c0_198 = arith.constant 0 : index
    %c0_199 = arith.constant 0 : index
    %611 = vector.load %arg7[%c0_198, %c0_199] : memref<8x128xf32, #tpu.memory_space<vmem>>, vector<8x128xf32>
    tpu.vector_store %arg7[%c0_198, %c0_199], %609 {strides = array<i32>} : memref<8x128xf32, #tpu.memory_space<vmem>>, vector<8x128xf32>,
    return
  }
}

</mosaic_0001>

<bundles_post_ra>
// kernel: tpu_custom_call.1
= control target key start
LH: loop header
LB: loop body
LE: loop exit
PB: predicated region body
PF: predicated region fallthrough
CT: control target
= control target key end

     0   :  { %13 = vsyncpa [#allocation5], 0  ;;  %s4355_s0 = inlined_call_operand.hbm [shape: f32[8,8,128], index: 0, kind: input, shape index: {}]   ;;  %s4356_s1 = inlined_call_operand.hbm [shape: f32[8,128], index: 1, kind: input, shape index: {}]   ;;  %s4357_s2 = inlined_call_operand.hbm [shape: f32[8,128], index: 2, kind: input, shape index: {}]   ;;  %s4358_s3 = inlined_call_operand.hbm [shape: f32[256,512], index: 3, kind: input, shape index: {}]   ;;  %s4359_s4 = inlined_call_operand.vmem [shape: f32[1,512], index: 4, kind: input, shape index: {}]   ;;  %s4360_s5 = inlined_call_operand.vmem [shape: f32[16], index: 5, kind: input, shape index: {}]   ;;  %s4361_s6 = inlined_call_operand.hbm [shape: f32[8,128], index: 6, kind: output, shape index: {0}]   ;;  %s4362_s7 = inlined_call_operand.hbm [shape: f32[8,128], index: 7, kind: output, shape index: {1}]  }
   0x1   :  { %14 = vsyncpa [#allocation9], 0 }
   0x2   :  { %15 = vsyncpa [#allocation12], 0 }
   0x3   :  { %16 = vsyncpa [#allocation7], 0 }
   0x4   :  { %17 = vsyncpa [#allocation6], 0 }
   0x5   :  { %18 = vsyncpa [#allocation16], 0  ;;  %s2348_s24 = smov [#allocation8]   ;;  %s2349_s26 = smov [#allocation4]  }
   0x6   :  { %s37_s25 = sshll.u32 %s2348_s24, 4  ;;  %s24_s27 = sshll.u32 %s2349_s26, 4  ;;  %s38_s25 = int_to_ptr.vmem [resolvable:$true] %s37_s25  ;;  %s25_s27 = int_to_ptr.vmem [resolvable:$true] %s24_s27 }
   0x7   :  { %s2212_s28 = scalar_lea.vmem %s38_s25, 128  ;;  %p2217_p1 = scmp.lt.s32.totalorder %s38_s25, %s38_s25 }
   0x8   :  { %p2213_p0 = scmp.ne.s32.totalorder %s38_s25, %s2212_s28  ;;  %p2218_p2 = scmp.lt.s32.totalorder %s2212_s28, %s2212_s28 }
   0xa   :  { %p2219_p3 = por %p2218_p2, %p2217_p1 }
   0xc   :  { %p2220_p4 = pnand %p2219_p3, %p2213_p0 }
   0xe   :  { %2223 = shalt.err (!%p2220_p4)
}
   0xf   :  { %40 = dma.hbm_to_vmem [thread:$0]  %s4356_s1, 128, %s38_s25, [#allocation9]  }
  0x10   :  { %s2232_s8 = scalar_lea.vmem %s25_s27, 1024  ;;  %p2237_p6 = scmp.lt.s32.totalorder %s25_s27, %s25_s27 }
  0x11   :  { %p2233_p5 = scmp.ne.s32.totalorder %s25_s27, %s2232_s8  ;;  %p2238_p7 = scmp.lt.s32.totalorder %s2232_s8, %s2232_s8 }
  0x13   :  { %p2239_p8 = por %p2238_p7, %p2237_p6 }
  0x15   :  { %p2240_p9 = pnand %p2239_p8, %p2233_p5 }
  0x17   :  { %2243 = shalt.err (!%p2240_p9)
}
  0x18   :  { %s2350_s9 = smov 128   ;;  %s2351_s10 = smov 8  }
  0x19   :  { %30 = dma.hbm_to_vmem [thread:$0]  %s4355_s0, 1024, %s25_s27, [#allocation5], %s2350_s9, %s2350_s9, %s2351_s10  }
  0x1a   :  { %s2352_s13 = smov [#allocation10]   ;;  %s2353_s15 = smov [#allocation11]  }
  0x1b   :  { %s47_s14 = sshll.u32 %s2352_s13, 4  ;;  %s56_s16 = sshll.u32 %s2353_s15, 4  ;;  %s48_s14 = int_to_ptr.vmem [resolvable:$true] %s47_s14  ;;  %s57_s16 = int_to_ptr.vmem [resolvable:$true] %s56_s16 }
  0x1c   :  { %s2252_s1 = scalar_lea.vmem %s48_s14, 128  ;;  %p2257_p11 = scmp.lt.s32.totalorder %s48_s14, %s48_s14 }
  0x1d   :  { %p2253_p10 = scmp.ne.s32.totalorder %s48_s14, %s2252_s1  ;;  %p2258_p12 = scmp.lt.s32.totalorder %s2252_s1, %s2252_s1 }
  0x1f   :  { %p2259_p13 = por %p2258_p12, %p2257_p11 }
  0x21   :  { %p2260_p0 = pnand %p2259_p13, %p2253_p10 }
  0x23   :  { %2263 = shalt.err (!%p2260_p0)
}
  0x24   :  { %50 = dma.hbm_to_vmem [thread:$0]  %s4357_s2, 128, %s48_s14, [#allocation9]  }
  0x25   :  { %s2272_s19 = scalar_lea.vmem %s57_s16, 16384  ;;  %p2277_p2 = scmp.lt.s32.totalorder %s57_s16, %s57_s16 }
  0x26   :  { %p2273_p1 = scmp.ne.s32.totalorder %s57_s16, %s2272_s19  ;;  %p2278_p3 = scmp.lt.s32.totalorder %s2272_s19, %s2272_s19 }
  0x28   :  { %p2279_p4 = por %p2278_p3, %p2277_p2 }
  0x2a   :  { %p2280_p5 = pnand %p2279_p4, %p2273_p1 }
  0x2c   :  { %2283 = shalt.err (!%p2280_p5)
}
  0x2d   :  { %s2354_s0 = smov 512   ;;  %s2355_s20 = smov 32  }
  0x2e   :  { %62 = dma.hbm_to_vmem [thread:$0]  %s4358_s3, 16384, %s57_s16, [#allocation12], %s2354_s0, %s2354_s0, %s2355_s20  }
  0x2f   :  { %s71_s25 = sshll.u32 %s4360_s5, 4  ;;  %s72_s25 = int_to_ptr.vmem [resolvable:$true] %s71_s25 }
  0x30   :  { %s2284_s26 = scalar_lea.vmem %s72_s25, 16  ;;  %p2289_p7 = scmp.lt.s32.totalorder %s72_s25, %s72_s25 }
  0x31   :  { %p2285_p6 = scmp.ne.s32.totalorder %s72_s25, %s2284_s26  ;;  %p2290_p8 = scmp.lt.s32.totalorder %s2284_s26, %s2284_s26 }
  0x33   :  { %p2291_p9 = por %p2290_p8, %p2289_p7 }
  0x35   :  { %p2292_p10 = pnand %p2291_p9, %p2285_p6 }
  0x37   :  { %2295 = shalt.err (!%p2292_p10)
}
  0x38   :  { %s2356_s2 = smov [#allocation13]  }
  0x39   :  { %74 = dma.vmem_to_smem %s72_s25, 16, %s2356_s2, [#allocation7]  }
  0x3a   :  { %2336 = dma.done.wait [#allocation5], 1024  }
  0x3b   :  { %2337 = vsyncadd [#allocation5], 4294966272 }
  0x3c   :  { %2338 = dma.done.wait [#allocation9], 256  }
  0x3d   :  { %2339 = vsyncadd [#allocation9], 4294967040 }
  0x3e   :  { %2340 = dma.done.wait [#allocation12], 16384  }
  0x3f   :  { %2341 = vsyncadd [#allocation12], 4294950912 }
  0x40   :  { %2342 = dma.done.wait [#allocation7], 16  }
  0x41   :  { %2343 = vsyncadd [#allocation7], 4294967280 }
  0x42   :  { %90 = sfence }
  0x43   :  { %v2414_v0 = vld [vmem:[#allocation11 + $0x1e8] sm:$0xff]  ;;  %v2416_v1 = vld [vmem:[#allocation11 + $0x1e0] sm:$0xff]  ;;  %v2435_v8 = vld [vmem:[#allocation11 + $0x1f8] sm:$0xff]  ;;  %s418_s27 = sld [smem:[#allocation13]]  ;;  %s2357_s18 = smov [#allocation15]  }
  0x44   :  { %v2418_v2 = vld [vmem:[#allocation11 + $0x1c8] sm:$0xff]  ;;  %248 = vmatprep.subr.mxu0 %v2414_v0  ;;  %v2421_v3 = vld [vmem:[#allocation11 + $0x1c0] sm:$0xff]  ;;  %319 = vmatprep.subr.mxu1 %v2435_v8  ;;  %v2441_v10 = vld [vmem:[#allocation11 + $0x1f0] sm:$0xff]  ;;  %s2953_s28 = sld [smem:[#allocation13 + $0x5]]  ;;  %s1738_s19 = sshll.u32 %s2357_s18, 4  ;;  %s1739_s19 = int_to_ptr.vmem [resolvable:$true] %s1738_s19 }
  0x45   :  { %249 = vmatpush1.msra.mxu0 %v2416_v1  ;;  %v2424_v4 = vld [vmem:[#allocation11 + $0x1a8] sm:$0xff]  ;;  %v2427_v5 = vld [vmem:[#allocation11 + $0x1a0] sm:$0xff]  ;;  %320 = vmatpush1.msra.mxu1 %v2441_v10  ;;  %v2447_v12 = vld [vmem:[#allocation11 + $0x1d8] sm:$0xff]  ;;  %s1762_s29 = sld [smem:[#allocation13 + $0x3]]  ;;  %s2296_s0 = scalar_lea.vmem %s1739_s19, 128 }
  0x46   :  { %250 = vmatprep.subr.mxu0 %v2418_v2  ;;  %v2430_v6 = vld [vmem:[#allocation11 + $0x188] sm:$0xff]  ;;  %v2433_v7 = vld [vmem:[#allocation11 + $0x180] sm:$0xff]  ;;  %v2449_v13 = vld [vmem:[#allocation11 + $0x1d0] sm:$0xff]  ;;  %321 = vmatprep.subr.mxu1 %v2447_v12  ;;  %s1761_s30 = sld [smem:[#allocation13 + $0x2]]  ;;  %p2297_p11 = scmp.ne.s32.totalorder %s1739_s19, %s2296_s0 }
  0x47   :  { %251 = vmatpush1.msra.mxu0 %v2421_v3  ;;  %v2438_v9 = vld [vmem:[#allocation11 + $0x168] sm:$0xff]  ;;  %v2444_v11 = vld [vmem:[#allocation11 + $0x160] sm:$0xff]  ;;  %v2455_v15 = vld [vmem:[#allocation11 + $0x1b8] sm:$0xff]  ;;  %322 = vmatpush1.msra.mxu1 %v2449_v13  ;;  %s3106_s8 = sld [smem:[#allocation13 + $0x7]]  ;;  %p2301_p12 = scmp.lt.s32.totalorder %s1739_s19, %s1739_s19 }
  0x48   :  { %252 = vmatprep.subr.mxu0 %v2424_v4  ;;  %v2452_v14 = vld [vmem:[#allocation11 + $0x148] sm:$0xff]  ;;  %v2458_v16 = vld [vmem:[#allocation11 + $0x140] sm:$0xff]  ;;  %v2461_v17 = vld [vmem:[#allocation11 + $0x1b0] sm:$0xff]  ;;  %323 = vmatprep.subr.mxu1 %v2455_v15  ;;  %s1766_s9 = sld [smem:[#allocation13 + $0x4]]  ;;  %p2302_p13 = scmp.lt.s32.totalorder %s2296_s0, %s2296_s0 }
  0x49   :  { %253 = vmatpush1.msra.mxu0 %v2427_v5  ;;  %v2463_v18 = vld [vmem:[#allocation11 + $0x198] sm:$0xff]  ;;  %v2466_v19 = vld [vmem:[#allocation11 + $0x128] sm:$0xff]  ;;  %v2469_v20 = vld [vmem:[#allocation11 + $0x190] sm:$0xff]  ;;  %324 = vmatpush1.msra.mxu1 %v2461_v17  ;;  %s3496_s10 = sld [smem:[#allocation13 + $0x9]] }
  0x4a   :  { %254 = vmatprep.subr.mxu0 %v2430_v6  ;;  %v2472_v21 = vld [vmem:[#allocation11 + $0x120] sm:$0xff]  ;;  %v2475_v22 = vld [vmem:[#allocation11 + $0x178] sm:$0xff]  ;;  %v2478_v23 = vld [vmem:[#allocation11 + $0x108] sm:$0xff]  ;;  %325 = vmatprep.subr.mxu1 %v2463_v18  ;;  %s1771_s11 = sld [smem:[#allocation13 + $0x6]]  ;;  %p2303_p0 = por %p2302_p13, %p2301_p12 }
  0x4b   :  { %255 = vmatpush1.msra.mxu0 %v2433_v7  ;;  %v2481_v24 = vld [vmem:[#allocation11 + $0x170] sm:$0xff]  ;;  %v2484_v25 = vld [vmem:[#allocation11 + $0x100] sm:$0xff]  ;;  %326 = vmatpush1.msra.mxu1 %v2469_v20  ;;  %v2487_v26 = vld [vmem:[#allocation11 + $0x158] sm:$0xff]  ;;  %s3655_s12 = sld [smem:[#allocation13 + $0xb]] }
  0x4c   :  { %256 = vmatprep.subr.mxu0 %v2438_v9  ;;  %v2490_v27 = vld [vmem:[#allocation11 + $0xe8] sm:$0xff]  ;;  %327 = vmatprep.subr.mxu1 %v2475_v22  ;;  %v2493_v28 = vld [vmem:[#allocation11 + $0x150] sm:$0xff]  ;;  %v2496_v29 = vld [vmem:[#allocation11 + $0xe0] sm:$0xff]  ;;  %s1776_s13 = sld [smem:[#allocation13 + $0x8]]  ;;  %p2304_p1 = pnand %p2303_p0, %p2297_p11 }
  0x4d   :  { %257 = vmatpush1.msra.mxu0 %v2444_v11  ;;  %328 = vmatpush1.msra.mxu1 %v2481_v24  ;;  %v2499_v30 = vld [vmem:[#allocation11 + $0x138] sm:$0xff]  ;;  %v2502_v31 = vld [vmem:[#allocation11 + $0xc8] sm:$0xff]  ;;  %v2505_v32 = vld [vmem:[#allocation11 + $0x130] sm:$0xff]  ;;  %s3808_s14 = sld [smem:[#allocation13 + $0xd]] }
  0x4e   :  { %258 = vmatprep.subr.mxu0 %v2452_v14  ;;  %329 = vmatprep.subr.mxu1 %v2487_v26  ;;  %v2508_v33 = vld [vmem:[#allocation11 + $0xc0] sm:$0xff]  ;;  %v2511_v34 = vld [vmem:[#allocation11 + $0x118] sm:$0xff]  ;;  %v2514_v35 = vld [vmem:[#allocation11 + $0xa8] sm:$0xff]  ;;  %s1781_s15 = sld [smem:[#allocation13 + $0xa]] }
  0x4f   :  { %259 = vmatpush1.msra.mxu0 %v2458_v16  ;;  %330 = vmatpush1.msra.mxu1 %v2493_v28  ;;  %v2517_v36 = vld [vmem:[#allocation11 + $0x110] sm:$0xff]  ;;  %v2520_v37 = vld [vmem:[#allocation11 + $0xa0] sm:$0xff]  ;;  %v2523_v38 = vld [vmem:[#allocation11 + $0xf8] sm:$0xff]  ;;  %s1786_s16 = sld [smem:[#allocation13 + $0xc]] }
  0x50   :  { %260 = vmatprep.subr.mxu0 %v2466_v19  ;;  %331 = vmatprep.subr.mxu1 %v2499_v30  ;;  %4780 = vst [vmem:[#allocation23_spill] sm:$0xff] %v2520_v37  ;;  %v2526_v39 = vld [vmem:[#allocation11 + $0x88] sm:$0xff]  ;;  %v2529_v40 = vld [vmem:[#allocation11 + $0xf0] sm:$0xff]  ;;  %v2532_v41 = vld [vmem:[#allocation11 + $0x80] sm:$0xff]  ;;  %s4341_s1 = sld [smem:[#allocation13 + $0xf]] }
  0x51   :  { %261 = vmatpush1.msra.mxu0 %v2472_v21  ;;  %332 = vmatpush1.msra.mxu1 %v2505_v32  ;;  %4781 = vst [vmem:[#allocation24_spill] sm:$0xff] %v2526_v39  ;;  %4782 = vst [vmem:[#allocation25_spill] sm:$0xff] %v2532_v41  ;;  %v2535_v42 = vld [vmem:[#allocation11 + $0xd8] sm:$0xff]  ;;  %v2538_v43 = vld [vmem:[#allocation11 + $0x68] sm:$0xff]  ;;  %s4343_s17 = sld [smem:[#allocation13 + $0xe]] }
  0x52   :  { %262 = vmatprep.subr.mxu0 %v2478_v23  ;;  %333 = vmatprep.subr.mxu1 %v2511_v34  ;;  %4783 = vst [vmem:[#allocation26_spill] sm:$0xff] %v2538_v43  ;;  %v2541_v44 = vld [vmem:[#allocation11 + $0xd0] sm:$0xff]  ;;  %v2544_v45 = vld [vmem:[#allocation11 + $0x60] sm:$0xff]  ;;  %v2547_v46 = vld [vmem:[#allocation11 + $0xb8] sm:$0xff] }
  0x53   :  { %263 = vmatpush1.msra.mxu0 %v2484_v25  ;;  %334 = vmatpush1.msra.mxu1 %v2517_v36  ;;  %4784 = vst [vmem:[#allocation27_spill] sm:$0xff] %v2544_v45  ;;  %v2550_v47 = vld [vmem:[#allocation11 + $0x48] sm:$0xff]  ;;  %v2553_v48 = vld [vmem:[#allocation11 + $0xb0] sm:$0xff]  ;;  %v2556_v49 = vld [vmem:[#allocation11 + $0x40] sm:$0xff] }
  0x54   :  { %264 = vmatprep.subr.mxu0 %v2490_v27  ;;  %335 = vmatprep.subr.mxu1 %v2523_v38  ;;  %4785 = vst [vmem:[#allocation28_spill] sm:$0xff] %v2550_v47  ;;  %4786 = vst [vmem:[#allocation29_spill] sm:$0xff] %v2553_v48  ;;  %v2559_v50 = vld [vmem:[#allocation11 + $0x98] sm:$0xff]  ;;  %v2562_v51 = vld [vmem:[#allocation11 + $0x28] sm:$0xff] }
  0x55   :  { %265 = vmatpush1.msra.mxu0 %v2496_v29  ;;  %336 = vmatpush1.msra.mxu1 %v2529_v40  ;;  %4787 = vst [vmem:[#allocation30_spill] sm:$0xff] %v2556_v49  ;;  %4788 = vst [vmem:[#allocation31_spill] sm:$0xff] %v2559_v50  ;;  %v2565_v52 = vld [vmem:[#allocation11 + $0x90] sm:$0xff]  ;;  %v2568_v53 = vld [vmem:[#allocation11 + $0x20] sm:$0xff] }
  0x56   :  { %266 = vmatprep.subr.mxu0 %v2502_v31  ;;  %337 = vmatprep.subr.mxu1 %v2535_v42  ;;  %4789 = vst [vmem:[#allocation32_spill] sm:$0xff] %v2562_v51  ;;  %4790 = vst [vmem:[#allocation33_spill] sm:$0xff] %v2565_v52  ;;  %v2571_v54 = vld [vmem:[#allocation11 + $0x78] sm:$0xff]  ;;  %v2574_v55 = vld [vmem:[#allocation11 + $0x8] sm:$0xff] }
  0x57   :  { %267 = vmatpush1.msra.mxu0 %v2508_v33  ;;  %338 = vmatpush1.msra.mxu1 %v2541_v44  ;;  %4791 = vst [vmem:[#allocation34_spill] sm:$0xff] %v2568_v53  ;;  %4792 = vst [vmem:[#allocation35_spill] sm:$0xff] %v2571_v54  ;;  %v2577_v56 = vld [vmem:[#allocation11 + $0x70] sm:$0xff]  ;;  %v2580_v57 = vld [vmem:[#allocation11] sm:$0xff] }
  0x58   :  { %268 = vmatprep.subr.mxu0 %v2514_v35  ;;  %339 = vmatprep.subr.mxu1 %v2547_v46  ;;  %4793 = vst [vmem:[#allocation36_spill] sm:$0xff] %v2574_v55  ;;  %4794 = vst [vmem:[#allocation37_spill] sm:$0xff] %v2577_v56  ;;  %v2583_v58 = vld [vmem:[#allocation11 + $0x58] sm:$0xff]  ;;  %v2586_v59 = vld [vmem:[#allocation11 + $0x3e8] sm:$0xff] }
  0x59   :  { %269 = vmatpush1.msra.mxu0 %v2520_v37  ;;  %340 = vmatpush1.msra.mxu1 %v2553_v48  ;;  %4795 = vst [vmem:[#allocation38_spill] sm:$0xff] %v2580_v57  ;;  %4796 = vst [vmem:[#allocation39_spill] sm:$0xff] %v2583_v58  ;;  %v2589_v60 = vld [vmem:[#allocation11 + $0x50] sm:$0xff]  ;;  %v2592_v61 = vld [vmem:[#allocation11 + $0x3e0] sm:$0xff] }
  0x5a   :  { %270 = vmatprep.subr.mxu0 %v2526_v39  ;;  %341 = vmatprep.subr.mxu1 %v2559_v50  ;;  %4797 = vst [vmem:[#allocation40_spill] sm:$0xff] %v2586_v59  ;;  %4798 = vst [vmem:[#allocation41_spill] sm:$0xff] %v2589_v60  ;;  %v2595_v62 = vld [vmem:[#allocation11 + $0x38] sm:$0xff]  ;;  %v2598_v63 = vld [vmem:[#allocation11 + $0x3c8] sm:$0xff] }
  0x5b   :  { %271 = vmatpush1.msra.mxu0 %v2532_v41  ;;  %342 = vmatpush1.msra.mxu1 %v2565_v52  ;;  %4799 = vst [vmem:[#allocation42_spill] sm:$0xff] %v2592_v61  ;;  %4800 = vst [vmem:[#allocation43_spill] sm:$0xff] %v2595_v62  ;;  %v2742_v52 = vld [vmem:[#allocation11 + $0x248] sm:$0xff] }
  0x5c   :  { %272 = vmatprep.subr.mxu0 %v2538_v43  ;;  %343 = vmatprep.subr.mxu1 %v2571_v54  ;;  %4801 = vst [vmem:[#allocation44_spill] sm:$0xff] %v2598_v63  ;;  %v2604_v54 = vld [vmem:[#allocation11 + $0x3c0] sm:$0xff]  ;;  %4848 = vst [vmem:[#allocation91_spill] sm:$0xff] %v2742_v52 }
  0x5d   :  { %273 = vmatpush1.msra.mxu0 %v2544_v45  ;;  %344 = vmatpush1.msra.mxu1 %v2577_v56  ;;  %4803 = vst [vmem:[#allocation46_spill] sm:$0xff] %v2604_v54  ;;  %v2610_v56 = vld [vmem:[#allocation11 + $0x3a8] sm:$0xff] }
  0x5e   :  { %274 = vmatprep.subr.mxu0 %v2550_v47  ;;  %345 = vmatprep.subr.mxu1 %v2583_v58  ;;  %4805 = vst [vmem:[#allocation48_spill] sm:$0xff] %v2610_v56  ;;  %v2616_v58 = vld [vmem:[#allocation11 + $0x3a0] sm:$0xff] }
  0x5f   :  { %275 = vmatpush1.msra.mxu0 %v2556_v49  ;;  %346 = vmatpush1.msra.mxu1 %v2589_v60  ;;  %4807 = vst [vmem:[#allocation50_spill] sm:$0xff] %v2616_v58  ;;  %v2622_v60 = vld [vmem:[#allocation11 + $0x388] sm:$0xff] }
  0x60   :  { %276 = vmatprep.subr.mxu0 %v2562_v51  ;;  %347 = vmatprep.subr.mxu1 %v2595_v62  ;;  %4809 = vst [vmem:[#allocation52_spill] sm:$0xff] %v2622_v60  ;;  %v2628_v62 = vld [vmem:[#allocation11 + $0x380] sm:$0xff] }
  0x61   :  { %277 = vmatpush1.msra.mxu0 %v2568_v53  ;;  %v2601_v53 = vld [vmem:[#allocation11 + $0x30] sm:$0xff]  ;;  %4811 = vst [vmem:[#allocation54_spill] sm:$0xff] %v2628_v62 }
  0x62   :  { %278 = vmatprep.subr.mxu0 %v2574_v55  ;;  %4802 = vst [vmem:[#allocation45_spill] sm:$0xff] %v2601_v53  ;;  %v2607_v55 = vld [vmem:[#allocation11 + $0x18] sm:$0xff]  ;;  %348 = vmatpush1.msra.mxu1 %v2601_v53  ;;  %v2634_v53 = vld [vmem:[#allocation11 + $0x368] sm:$0xff] }
  0x63   :  { %279 = vmatpush1.msra.mxu0 %v2580_v57  ;;  %4804 = vst [vmem:[#allocation47_spill] sm:$0xff] %v2607_v55  ;;  %v2613_v57 = vld [vmem:[#allocation11 + $0x10] sm:$0xff]  ;;  %349 = vmatprep.subr.mxu1 %v2607_v55  ;;  %4813 = vst [vmem:[#allocation56_spill] sm:$0xff] %v2634_v53  ;;  %v2640_v55 = vld [vmem:[#allocation11 + $0x360] sm:$0xff] }
  0x64   :  { %280 = vmatprep.subr.mxu0 %v2586_v59  ;;  %4806 = vst [vmem:[#allocation49_spill] sm:$0xff] %v2613_v57  ;;  %v2619_v59 = vld [vmem:[#allocation11 + $0x3f8] sm:$0xff]  ;;  %350 = vmatpush1.msra.mxu1 %v2613_v57  ;;  %4815 = vst [vmem:[#allocation58_spill] sm:$0xff] %v2640_v55  ;;  %v2646_v57 = vld [vmem:[#allocation11 + $0x348] sm:$0xff] }
  0x65   :  { %281 = vmatpush2.msra.mxu0 %v2592_v61  ;;  %4808 = vst [vmem:[#allocation51_spill] sm:$0xff] %v2619_v59  ;;  %v2625_v61 = vld [vmem:[#allocation11 + $0x3f0] sm:$0xff]  ;;  %351 = vmatprep.subr.mxu1 %v2619_v59  ;;  %4817 = vst [vmem:[#allocation60_spill] sm:$0xff] %v2646_v57  ;;  %v2652_v59 = vld [vmem:[#allocation11 + $0x340] sm:$0xff] }
  0x66   :  { %282 = vmatprep.subr.mxu0 %v2598_v63  ;;  %4810 = vst [vmem:[#allocation53_spill] sm:$0xff] %v2625_v61  ;;  %v2631_v63 = vld [vmem:[#allocation11 + $0x3d8] sm:$0xff]  ;;  %352 = vmatpush2.msra.mxu1 %v2625_v61  ;;  %4819 = vst [vmem:[#allocation62_spill] sm:$0xff] %v2652_v59  ;;  %v2658_v61 = vld [vmem:[#allocation11 + $0x328] sm:$0xff] }
  0x67   :  { %283 = vmatpush2.msra.mxu0 %v2604_v54  ;;  %4812 = vst [vmem:[#allocation55_spill] sm:$0xff] %v2631_v63  ;;  %v2637_v54 = vld [vmem:[#allocation11 + $0x3d0] sm:$0xff]  ;;  %353 = vmatprep.subr.mxu1 %v2631_v63  ;;  %4821 = vst [vmem:[#allocation64_spill] sm:$0xff] %v2658_v61  ;;  %v2664_v63 = vld [vmem:[#allocation11 + $0x320] sm:$0xff] }
  0x68   :  { %284 = vmatprep.subr.mxu0 %v2610_v56  ;;  %4814 = vst [vmem:[#allocation57_spill] sm:$0xff] %v2637_v54  ;;  %v2643_v56 = vld [vmem:[#allocation11 + $0x3b8] sm:$0xff]  ;;  %354 = vmatpush2.msra.mxu1 %v2637_v54  ;;  %4823 = vst [vmem:[#allocation66_spill] sm:$0xff] %v2664_v63  ;;  %v2670_v54 = vld [vmem:[#allocation11 + $0x308] sm:$0xff] }
  0x69   :  { %285 = vmatpush2.msra.mxu0 %v2616_v58  ;;  %4816 = vst [vmem:[#allocation59_spill] sm:$0xff] %v2643_v56  ;;  %v2649_v58 = vld [vmem:[#allocation11 + $0x3b0] sm:$0xff]  ;;  %355 = vmatprep.subr.mxu1 %v2643_v56  ;;  %4825 = vst [vmem:[#allocation68_spill] sm:$0xff] %v2670_v54  ;;  %v2676_v56 = vld [vmem:[#allocation11 + $0x300] sm:$0xff] }
  0x6a   :  { %286 = vmatprep.subr.mxu0 %v2622_v60  ;;  %4818 = vst [vmem:[#allocation61_spill] sm:$0xff] %v2649_v58  ;;  %v2655_v60 = vld [vmem:[#allocation11 + $0x398] sm:$0xff]  ;;  %356 = vmatpush2.msra.mxu1 %v2649_v58  ;;  %4827 = vst [vmem:[#allocation70_spill] sm:$0xff] %v2676_v56  ;;  %v2682_v58 = vld [vmem:[#allocation11 + $0x2e8] sm:$0xff] }
  0x6b   :  { %287 = vmatpush2.msra.mxu0 %v2628_v62  ;;  %4820 = vst [vmem:[#allocation63_spill] sm:$0xff] %v2655_v60  ;;  %v2661_v62 = vld [vmem:[#allocation11 + $0x390] sm:$0xff]  ;;  %357 = vmatprep.subr.mxu1 %v2655_v60  ;;  %4829 = vst [vmem:[#allocation72_spill] sm:$0xff] %v2682_v58  ;;  %v2688_v60 = vld [vmem:[#allocation11 + $0x2e0] sm:$0xff] }
  0x6c   :  { %288 = vmatprep.subr.mxu0 %v2634_v53  ;;  %4822 = vst [vmem:[#allocation65_spill] sm:$0xff] %v2661_v62  ;;  %v2667_v53 = vld [vmem:[#allocation11 + $0x378] sm:$0xff]  ;;  %358 = vmatpush2.msra.mxu1 %v2661_v62  ;;  %4831 = vst [vmem:[#allocation74_spill] sm:$0xff] %v2688_v60  ;;  %v2694_v62 = vld [vmem:[#allocation11 + $0x2c8] sm:$0xff] }
  0x6d   :  { %289 = vmatpush2.msra.mxu0 %v2640_v55  ;;  %4824 = vst [vmem:[#allocation67_spill] sm:$0xff] %v2667_v53  ;;  %v2673_v55 = vld [vmem:[#allocation11 + $0x370] sm:$0xff]  ;;  %359 = vmatprep.subr.mxu1 %v2667_v53  ;;  %4833 = vst [vmem:[#allocation76_spill] sm:$0xff] %v2694_v62  ;;  %v2700_v53 = vld [vmem:[#allocation11 + $0x2c0] sm:$0xff] }
  0x6e   :  { %290 = vmatprep.subr.mxu0 %v2646_v57  ;;  %4826 = vst [vmem:[#allocation69_spill] sm:$0xff] %v2673_v55  ;;  %v2679_v57 = vld [vmem:[#allocation11 + $0x358] sm:$0xff]  ;;  %360 = vmatpush2.msra.mxu1 %v2673_v55  ;;  %4835 = vst [vmem:[#allocation78_spill] sm:$0xff] %v2700_v53  ;;  %v2706_v55 = vld [vmem:[#allocation11 + $0x2a8] sm:$0xff] }
  0x6f   :  { %291 = vmatpush2.msra.mxu0 %v2652_v59  ;;  %4828 = vst [vmem:[#allocation71_spill] sm:$0xff] %v2679_v57  ;;  %v2685_v59 = vld [vmem:[#allocation11 + $0x350] sm:$0xff]  ;;  %361 = vmatprep.subr.mxu1 %v2679_v57  ;;  %4837 = vst [vmem:[#allocation80_spill] sm:$0xff] %v2706_v55  ;;  %v2712_v57 = vld [vmem:[#allocation11 + $0x2a0] sm:$0xff] }
  0x70   :  { %292 = vmatprep.subr.mxu0 %v2658_v61  ;;  %4830 = vst [vmem:[#allocation73_spill] sm:$0xff] %v2685_v59  ;;  %v2691_v61 = vld [vmem:[#allocation11 + $0x338] sm:$0xff]  ;;  %362 = vmatpush2.msra.mxu1 %v2685_v59  ;;  %4838 = vst [vmem:[#allocation81_spill] sm:$0xff] %v2712_v57  ;;  %v2718_v59 = vld [vmem:[#allocation11 + $0x288] sm:$0xff] }
  0x71   :  { %293 = vmatpush2.msra.mxu0 %v2664_v63  ;;  %4832 = vst [vmem:[#allocation75_spill] sm:$0xff] %v2691_v61  ;;  %v2697_v63 = vld [vmem:[#allocation11 + $0x330] sm:$0xff]  ;;  %363 = vmatprep.subr.mxu1 %v2691_v61  ;;  %4840 = vst [vmem:[#allocation83_spill] sm:$0xff] %v2718_v59  ;;  %v2724_v61 = vld [vmem:[#allocation11 + $0x280] sm:$0xff] }
  0x72   :  { %294 = vmatprep.subr.mxu0 %v2670_v54  ;;  %4834 = vst [vmem:[#allocation77_spill] sm:$0xff] %v2697_v63  ;;  %v2703_v54 = vld [vmem:[#allocation11 + $0x318] sm:$0xff]  ;;  %364 = vmatpush2.msra.mxu1 %v2697_v63  ;;  %4842 = vst [vmem:[#allocation85_spill] sm:$0xff] %v2724_v61  ;;  %v2730_v63 = vld [vmem:[#allocation11 + $0x268] sm:$0xff] }
  0x73   :  { %295 = vmatpush2.msra.mxu0 %v2676_v56  ;;  %4836 = vst [vmem:[#allocation79_spill] sm:$0xff] %v2703_v54  ;;  %v2709_v56 = vld [vmem:[#allocation8] sm:$0xff]  ;;  %365 = vmatprep.subr.mxu1 %v2703_v54  ;;  %4844 = vst [vmem:[#allocation87_spill] sm:$0xff] %v2730_v63  ;;  %v2736_v54 = vld [vmem:[#allocation11 + $0x260] sm:$0xff] }
  0x74   :  { %296 = vmatprep.subr.mxu0 %v2682_v58  ;;  %v2715_v58 = vld [vmem:[#allocation11 + $0x310] sm:$0xff]  ;;  %312 = vmatprep.mubr.f32.mxu0 %v2709_v56  ;;  %4846 = vst [vmem:[#allocation89_spill] sm:$0xff] %v2736_v54 }
  0x75   :  { %297 = vmatpush2.msra.mxu0 %v2688_v60  ;;  %4839 = vst [vmem:[#allocation82_spill] sm:$0xff] %v2715_v58  ;;  %v2721_v60 = vld [vmem:[#allocation11 + $0x2f8] sm:$0xff]  ;;  %366 = vmatpush2.msra.mxu1 %v2715_v58  ;;  %v2748_v58 = vld [vmem:[#allocation11 + $0x240] sm:$0xff] }
  0x76   :  { %298 = vmatprep.subr.mxu0 %v2694_v62  ;;  %4841 = vst [vmem:[#allocation84_spill] sm:$0xff] %v2721_v60  ;;  %v2727_v62 = vld [vmem:[#allocation11 + $0x2f0] sm:$0xff]  ;;  %367 = vmatprep.subr.mxu1 %v2721_v60  ;;  %4850 = vst [vmem:[#allocation93_spill] sm:$0xff] %v2748_v58  ;;  %v2754_v60 = vld [vmem:[#allocation11 + $0x228] sm:$0xff] }
  0x77   :  { %299 = vmatpush2.msra.mxu0 %v2700_v53  ;;  %4843 = vst [vmem:[#allocation86_spill] sm:$0xff] %v2727_v62  ;;  %v2733_v53 = vld [vmem:[#allocation11 + $0x2d8] sm:$0xff]  ;;  %368 = vmatpush2.msra.mxu1 %v2727_v62  ;;  %4852 = vst [vmem:[#allocation95_spill] sm:$0xff] %v2754_v60  ;;  %v2760_v62 = vld [vmem:[#allocation11 + $0x220] sm:$0xff] }
  0x78   :  { %300 = vmatprep.subr.mxu0 %v2706_v55  ;;  %4845 = vst [vmem:[#allocation88_spill] sm:$0xff] %v2733_v53  ;;  %v2739_v55 = vld [vmem:[#allocation11 + $0x2d0] sm:$0xff]  ;;  %369 = vmatprep.subr.mxu1 %v2733_v53  ;;  %4853 = vst [vmem:[#allocation96_spill] sm:$0xff] %v2760_v62  ;;  %v2766_v53 = vld [vmem:[#allocation11 + $0x208] sm:$0xff] }
  0x79   :  { %301 = vmatpush2.msra.mxu0 %v2712_v57  ;;  %4847 = vst [vmem:[#allocation90_spill] sm:$0xff] %v2739_v55  ;;  %v2745_v57 = vld [vmem:[#allocation11 + $0x2b8] sm:$0xff]  ;;  %370 = vmatpush2.msra.mxu1 %v2739_v55  ;;  %4855 = vst [vmem:[#allocation98_spill] sm:$0xff] %v2766_v53  ;;  %v2772_v55 = vld [vmem:[#allocation11 + $0x200] sm:$0xff] }
  0x7a   :  { %302 = vmatprep.subr.mxu0 %v2718_v59  ;;  %4849 = vst [vmem:[#allocation92_spill] sm:$0xff] %v2745_v57  ;;  %v2751_v59 = vld [vmem:[#allocation11 + $0x2b0] sm:$0xff]  ;;  %371 = vmatprep.subr.mxu1 %v2745_v57  ;;  %4857 = vst [vmem:[#allocation100_spill] sm:$0xff] %v2772_v55 }
  0x7b   :  { %303 = vmatpush2.msra.mxu0 %v2724_v61  ;;  %4851 = vst [vmem:[#allocation94_spill] sm:$0xff] %v2751_v59  ;;  %v2757_v61 = vld [vmem:[#allocation11 + $0x298] sm:$0xff]  ;;  %372 = vmatpush2.msra.mxu1 %v2751_v59  ;;  %v226_v57 = vld [vmem:[#allocation4] sm:$0xff] }
  0x7c   :  { %304 = vmatprep.subr.mxu0 %v2730_v63  ;;  %v2763_v63 = vld [vmem:[#allocation11 + $0x290] sm:$0xff]  ;;  %373 = vmatprep.subr.mxu1 %v2757_v61 }
  0x7d   :  { %305 = vmatpush2.msra.mxu0 %v2736_v54  ;;  %4854 = vst [vmem:[#allocation97_spill] sm:$0xff] %v2763_v63  ;;  %v2769_v54 = vld [vmem:[#allocation11 + $0x278] sm:$0xff]  ;;  %374 = vmatpush2.msra.mxu1 %v2763_v63  ;;  %v2783_v59 = vld [vmem:[#allocation11 + $0x250] sm:$0xff] }
  0x7e   :  { %306 = vmatprep.subr.mxu0 %v2742_v52  ;;  %4856 = vst [vmem:[#allocation99_spill] sm:$0xff] %v2769_v54  ;;  %v2775_v52 = vld [vmem:[#allocation11 + $0x270] sm:$0xff]  ;;  %375 = vmatprep.subr.mxu1 %v2769_v54  ;;  %4860 = vst [vmem:[#allocation103_spill] sm:$0xff] %v2783_v59  ;;  %v2793_v63 = vld [vmem:[#allocation11 + $0x218] sm:$0xff] }
  0x7f   :  { %307 = vmatpush2.msra.mxu0 %v2748_v58  ;;  %4858 = vst [vmem:[#allocation101_spill] sm:$0xff] %v2775_v52  ;;  %v2779_v58 = vld [vmem:[#allocation11 + $0x258] sm:$0xff]  ;;  %376 = vmatpush2.msra.mxu1 %v2775_v52  ;;  %4863 = vst [vmem:[#allocation106_spill] sm:$0xff] %v2793_v63 }
  0x80   :  { %308 = vmatprep.subr.mxu0 %v2754_v60  ;;  %4859 = vst [vmem:[#allocation102_spill] sm:$0xff] %v2779_v58  ;;  %v2787_v60 = vld [vmem:[#allocation11 + $0x238] sm:$0xff]  ;;  %377 = vmatprep.subr.mxu1 %v2779_v58 }
  0x81   :  { %309 = vmatpush2.msra.mxu0 %v2760_v62  ;;  %4861 = vst [vmem:[#allocation104_spill] sm:$0xff] %v2787_v60  ;;  %v2790_v62 = vld [vmem:[#allocation11 + $0x230] sm:$0xff]  ;;  %378 = vmatpush2.msra.mxu1 %v2783_v59 }
  0x82   :  { %310 = vmatprep.subr.mxu0 %v2766_v53  ;;  %4862 = vst [vmem:[#allocation105_spill] sm:$0xff] %v2790_v62  ;;  %383 = vmatprep.mubr.f32.mxu1 %v2709_v56  ;;  %v2797_v53 = vld [vmem:[#allocation11 + $0x210] sm:$0xff] }
  0x83   :  { %311 = vmatpush2.msra.mxu0 %v2772_v55  ;;  %379 = vmatprep.subr.mxu1 %v2787_v60  ;;  %4864 = vst [vmem:[#allocation107_spill] sm:$0xff] %v2797_v53 }
  0x84   :  { %313 = vmatmul.mubr.f32.vlgmr.msra.gmra.mxu0 %v226_v57  ;;  %432 = vmatprep.subr.mxu0 %v2414_v0 }
  0x85   :  { %380 = vmatpush2.msra.mxu1 %v2790_v62  ;;  %433 = vmatpush1.msra.mxu0 %v2416_v1 }
  0x86   :  { %381 = vmatprep.subr.mxu1 %v2793_v63  ;;  %434 = vmatprep.subr.mxu0 %v2418_v2 }
  0x87   :  { %382 = vmatpush2.msra.mxu1 %v2797_v53  ;;  %435 = vmatpush1.msra.mxu0 %v2421_v3 }
  0x88   :  { %384 = vmatmul.mubr.f32.vlgmr.msra.gmra.mxu1 %v226_v57  ;;  %436 = vmatprep.subr.mxu0 %v2424_v4  ;;  %v4865_v57 = vld [vmem:[#allocation33_spill] sm:$0xff] }
  0x89   :  { %437 = vmatpush1.msra.mxu0 %v2427_v5  ;;  %503 = vmatprep.subr.mxu1 %v2435_v8 }
  0x8a   :  { %438 = vmatprep.subr.mxu0 %v2430_v6  ;;  %504 = vmatpush1.msra.mxu1 %v2441_v10 }
  0x8b   :  { %439 = vmatpush1.msra.mxu0 %v2433_v7  ;;  %505 = vmatprep.subr.mxu1 %v2447_v12 }
  0x8c   :  { %440 = vmatprep.subr.mxu0 %v2438_v9  ;;  %506 = vmatpush1.msra.mxu1 %v2449_v13 }
  0x8d   :  { %441 = vmatpush1.msra.mxu0 %v2444_v11  ;;  %507 = vmatprep.subr.mxu1 %v2455_v15 }
  0x8e   :  { %442 = vmatprep.subr.mxu0 %v2452_v14  ;;  %508 = vmatpush1.msra.mxu1 %v2461_v17 }
  0x8f   :  { %443 = vmatpush1.msra.mxu0 %v2458_v16  ;;  %509 = vmatprep.subr.mxu1 %v2463_v18 }
  0x90   :  { %444 = vmatprep.subr.mxu0 %v2466_v19  ;;  %510 = vmatpush1.msra.mxu1 %v2469_v20 }
  0x91   :  { %445 = vmatpush1.msra.mxu0 %v2472_v21  ;;  %511 = vmatprep.subr.mxu1 %v2475_v22 }
  0x92   :  { %446 = vmatprep.subr.mxu0 %v2478_v23  ;;  %512 = vmatpush1.msra.mxu1 %v2481_v24 }
  0x93   :  { %447 = vmatpush1.msra.mxu0 %v2484_v25  ;;  %513 = vmatprep.subr.mxu1 %v2487_v26 }
  0x94   :  { %448 = vmatprep.subr.mxu0 %v2490_v27  ;;  %514 = vmatpush1.msra.mxu1 %v2493_v28 }
  0x95   :  { %449 = vmatpush1.msra.mxu0 %v2496_v29  ;;  %515 = vmatprep.subr.mxu1 %v2499_v30 }
  0x96   :  { %450 = vmatprep.subr.mxu0 %v2502_v31  ;;  %516 = vmatpush1.msra.mxu1 %v2505_v32 }
  0x97   :  { %451 = vmatpush1.msra.mxu0 %v2508_v33  ;;  %517 = vmatprep.subr.mxu1 %v2511_v34 }
  0x98   :  { %452 = vmatprep.subr.mxu0 %v2514_v35  ;;  %518 = vmatpush1.msra.mxu1 %v2517_v36 }
  0x99   :  { %453 = vmatpush1.msra.mxu0 %v2520_v37  ;;  %519 = vmatprep.subr.mxu1 %v2523_v38  ;;  %v4870_v37 = vld [vmem:[#allocation38_spill] sm:$0xff] }
  0x9a   :  { %454 = vmatprep.subr.mxu0 %v2526_v39  ;;  %520 = vmatpush1.msra.mxu1 %v2529_v40  ;;  %v4868_v39 = vld [vmem:[#allocation36_spill] sm:$0xff] }
  0x9b   :  { %455 = vmatpush1.msra.mxu0 %v2532_v41  ;;  %521 = vmatprep.subr.mxu1 %v2535_v42  ;;  %v4866_v41 = vld [vmem:[#allocation34_spill] sm:$0xff] }
  0x9c   :  { %456 = vmatprep.subr.mxu0 %v2538_v43  ;;  %522 = vmatpush1.msra.mxu1 %v2541_v44  ;;  %v4867_v43 = vld [vmem:[#allocation35_spill] sm:$0xff] }
  0x9d   :  { %457 = vmatpush1.msra.mxu0 %v2544_v45  ;;  %523 = vmatprep.subr.mxu1 %v2547_v46  ;;  %v4869_v45 = vld [vmem:[#allocation37_spill] sm:$0xff] }
  0x9e   :  { %458 = vmatprep.subr.mxu0 %v2550_v47  ;;  %524 = vmatpush1.msra.mxu1 %v2553_v48  ;;  %v4871_v47 = vld [vmem:[#allocation39_spill] sm:$0xff]  ;;  %v4872_v48 = vld [vmem:[#allocation40_spill] sm:$0xff] }
  0x9f   :  { %459 = vmatpush1.msra.mxu0 %v2556_v49  ;;  %525 = vmatprep.subr.mxu1 %v2559_v50  ;;  %v4873_v49 = vld [vmem:[#allocation41_spill] sm:$0xff]  ;;  %v4874_v50 = vld [vmem:[#allocation42_spill] sm:$0xff] }
  0xa0   :  { %460 = vmatprep.subr.mxu0 %v2562_v51  ;;  %526 = vmatpush1.msra.mxu1 %v4865_v57  ;;  %v4875_v51 = vld [vmem:[#allocation43_spill] sm:$0xff]  ;;  %v4876_v57 = vld [vmem:[#allocation44_spill] sm:$0xff] }
  0xa1   :  { %461 = vmatpush1.msra.mxu0 %v4866_v41  ;;  %527 = vmatprep.subr.mxu1 %v4867_v43  ;;  %v4877_v41 = vld [vmem:[#allocation45_spill] sm:$0xff]  ;;  %v4878_v43 = vld [vmem:[#allocation46_spill] sm:$0xff] }
  0xa2   :  { %462 = vmatprep.subr.mxu0 %v4868_v39  ;;  %528 = vmatpush1.msra.mxu1 %v4869_v45  ;;  %v4879_v39 = vld [vmem:[#allocation47_spill] sm:$0xff]  ;;  %v4880_v45 = vld [vmem:[#allocation48_spill] sm:$0xff] }
  0xa3   :  { %463 = vmatpush1.msra.mxu0 %v4870_v37  ;;  %529 = vmatprep.subr.mxu1 %v4871_v47  ;;  %v4881_v37 = vld [vmem:[#allocation49_spill] sm:$0xff]  ;;  %v4882_v47 = vld [vmem:[#allocation50_spill] sm:$0xff] }
  0xa4   :  { %464 = vmatprep.subr.mxu0 %v4872_v48  ;;  %530 = vmatpush1.msra.mxu1 %v4873_v49  ;;  %v4883_v48 = vld [vmem:[#allocation51_spill] sm:$0xff]  ;;  %v4884_v49 = vld [vmem:[#allocation52_spill] sm:$0xff] }
  0xa5   :  { %465 = vmatpush2.msra.mxu0 %v4874_v50  ;;  %531 = vmatprep.subr.mxu1 %v4875_v51  ;;  %v4885_v50 = vld [vmem:[#allocation53_spill] sm:$0xff]  ;;  %v4886_v51 = vld [vmem:[#allocation54_spill] sm:$0xff] }
  0xa6   :  { %466 = vmatprep.subr.mxu0 %v4876_v57  ;;  %532 = vmatpush1.msra.mxu1 %v4877_v41  ;;  %v4887_v57 = vld [vmem:[#allocation55_spill] sm:$0xff]  ;;  %v4888_v41 = vld [vmem:[#allocation56_spill] sm:$0xff] }
  0xa7   :  { %467 = vmatpush2.msra.mxu0 %v4878_v43  ;;  %533 = vmatprep.subr.mxu1 %v4879_v39  ;;  %v4889_v43 = vld [vmem:[#allocation57_spill] sm:$0xff]  ;;  %v4890_v39 = vld [vmem:[#allocation58_spill] sm:$0xff] }
  0xa8   :  { %468 = vmatprep.subr.mxu0 %v4880_v45  ;;  %534 = vmatpush1.msra.mxu1 %v4881_v37  ;;  %v4891_v45 = vld [vmem:[#allocation59_spill] sm:$0xff]  ;;  %v4892_v37 = vld [vmem:[#allocation60_spill] sm:$0xff] }
  0xa9   :  { %469 = vmatpush2.msra.mxu0 %v4882_v47  ;;  %535 = vmatprep.subr.mxu1 %v4883_v48  ;;  %v4893_v47 = vld [vmem:[#allocation61_spill] sm:$0xff]  ;;  %v4894_v48 = vld [vmem:[#allocation62_spill] sm:$0xff] }
  0xaa   :  { %470 = vmatprep.subr.mxu0 %v4884_v49  ;;  %536 = vmatpush2.msra.mxu1 %v4885_v50  ;;  %v4895_v49 = vld [vmem:[#allocation63_spill] sm:$0xff]  ;;  %v4896_v50 = vld [vmem:[#allocation64_spill] sm:$0xff] }
  0xab   :  { %471 = vmatpush2.msra.mxu0 %v4886_v51  ;;  %537 = vmatprep.subr.mxu1 %v4887_v57  ;;  %v4897_v51 = vld [vmem:[#allocation65_spill] sm:$0xff]  ;;  %v4898_v57 = vld [vmem:[#allocation66_spill] sm:$0xff] }
  0xac   :  { %472 = vmatprep.subr.mxu0 %v4888_v41  ;;  %538 = vmatpush2.msra.mxu1 %v4889_v43  ;;  %v4899_v41 = vld [vmem:[#allocation67_spill] sm:$0xff]  ;;  %v4900_v43 = vld [vmem:[#allocation68_spill] sm:$0xff] }
  0xad   :  { %473 = vmatpush2.msra.mxu0 %v4890_v39  ;;  %539 = vmatprep.subr.mxu1 %v4891_v45  ;;  %v4901_v39 = vld [vmem:[#allocation69_spill] sm:$0xff]  ;;  %v4902_v45 = vld [vmem:[#allocation70_spill] sm:$0xff] }
  0xae   :  { %474 = vmatprep.subr.mxu0 %v4892_v37  ;;  %540 = vmatpush2.msra.mxu1 %v4893_v47  ;;  %v4903_v37 = vld [vmem:[#allocation71_spill] sm:$0xff]  ;;  %v4904_v47 = vld [vmem:[#allocation72_spill] sm:$0xff] }
  0xaf   :  { %475 = vmatpush2.msra.mxu0 %v4894_v48  ;;  %541 = vmatprep.subr.mxu1 %v4895_v49  ;;  %v4905_v48 = vld [vmem:[#allocation73_spill] sm:$0xff]  ;;  %v4906_v49 = vld [vmem:[#allocation74_spill] sm:$0xff] }
  0xb0   :  { %476 = vmatprep.subr.mxu0 %v4896_v50  ;;  %542 = vmatpush2.msra.mxu1 %v4897_v51  ;;  %v4907_v50 = vld [vmem:[#allocation75_spill] sm:$0xff]  ;;  %v4908_v51 = vld [vmem:[#allocation76_spill] sm:$0xff] }
  0xb1   :  { %477 = vmatpush2.msra.mxu0 %v4898_v57  ;;  %543 = vmatprep.subr.mxu1 %v4899_v41  ;;  %v4909_v57 = vld [vmem:[#allocation77_spill] sm:$0xff]  ;;  %v4910_v41 = vld [vmem:[#allocation78_spill] sm:$0xff] }
  0xb2   :  { %478 = vmatprep.subr.mxu0 %v4900_v43  ;;  %544 = vmatpush2.msra.mxu1 %v4901_v39  ;;  %v4911_v43 = vld [vmem:[#allocation79_spill] sm:$0xff]  ;;  %v4912_v39 = vld [vmem:[#allocation80_spill] sm:$0xff] }
  0xb3   :  { %479 = vmatpush2.msra.mxu0 %v4902_v45  ;;  %545 = vmatprep.subr.mxu1 %v4903_v37  ;;  %v4913_v45 = vld [vmem:[#allocation82_spill] sm:$0xff]  ;;  %v4914_v37 = vld [vmem:[#allocation81_spill] sm:$0xff] }
  0xb4   :  { %480 = vmatprep.subr.mxu0 %v4904_v47  ;;  %546 = vmatpush2.msra.mxu1 %v4905_v48  ;;  %v4915_v47 = vld [vmem:[#allocation84_spill] sm:$0xff]  ;;  %v4916_v48 = vld [vmem:[#allocation83_spill] sm:$0xff] }
  0xb5   :  { %481 = vmatpush2.msra.mxu0 %v4906_v49  ;;  %547 = vmatprep.subr.mxu1 %v4907_v50  ;;  %v4917_v49 = vld [vmem:[#allocation86_spill] sm:$0xff]  ;;  %v4918_v50 = vld [vmem:[#allocation85_spill] sm:$0xff] }
  0xb6   :  { %482 = vmatprep.subr.mxu0 %v4908_v51  ;;  %548 = vmatpush2.msra.mxu1 %v4909_v57  ;;  %v4919_v51 = vld [vmem:[#allocation88_spill] sm:$0xff]  ;;  %v4920_v57 = vld [vmem:[#allocation87_spill] sm:$0xff] }
  0xb7   :  { %483 = vmatpush2.msra.mxu0 %v4910_v41  ;;  %549 = vmatprep.subr.mxu1 %v4911_v43  ;;  %v4921_v41 = vld [vmem:[#allocation90_spill] sm:$0xff]  ;;  %v4922_v43 = vld [vmem:[#allocation89_spill] sm:$0xff] }
  0xb8   :  { %484 = vmatprep.subr.mxu0 %v4912_v39  ;;  %550 = vmatpush2.msra.mxu1 %v4913_v45  ;;  %v4923_v39 = vld [vmem:[#allocation92_spill] sm:$0xff]  ;;  %v4924_v45 = vld [vmem:[#allocation91_spill] sm:$0xff] }
  0xb9   :  { %485 = vmatpush2.msra.mxu0 %v4914_v37  ;;  %551 = vmatprep.subr.mxu1 %v4915_v47  ;;  %v4925_v37 = vld [vmem:[#allocation94_spill] sm:$0xff]  ;;  %v4926_v47 = vld [vmem:[#allocation93_spill] sm:$0xff] }
  0xba   :  { %486 = vmatprep.subr.mxu0 %v4916_v48  ;;  %552 = vmatpush2.msra.mxu1 %v4917_v49  ;;  %v4927_v48 = vld [vmem:[#allocation95_spill] sm:$0xff] }
  0xbb   :  { %487 = vmatpush2.msra.mxu0 %v4918_v50  ;;  %553 = vmatprep.subr.mxu1 %v4919_v51  ;;  %v4928_v50 = vld [vmem:[#allocation97_spill] sm:$0xff]  ;;  %v4929_v51 = vld [vmem:[#allocation96_spill] sm:$0xff] }
  0xbc   :  { %488 = vmatprep.subr.mxu0 %v4920_v57  ;;  %554 = vmatpush2.msra.mxu1 %v4921_v41  ;;  %v4930_v57 = vld [vmem:[#allocation98_spill] sm:$0xff] }
  0xbd   :  { %489 = vmatpush2.msra.mxu0 %v4922_v43  ;;  %555 = vmatprep.subr.mxu1 %v4923_v39 }
  0xbe   :  { %490 = vmatprep.subr.mxu0 %v4924_v45  ;;  %556 = vmatpush2.msra.mxu1 %v4925_v37 }
  0xbf   :  { %491 = vmatpush2.msra.mxu0 %v4926_v47  ;;  %557 = vmatprep.subr.mxu1 %v2757_v61 }
  0xc0   :  { %492 = vmatprep.subr.mxu0 %v4927_v48  ;;  %558 = vmatpush2.msra.mxu1 %v4928_v50 }
  0xc1   :  { %493 = vmatpush2.msra.mxu0 %v4929_v51  ;;  %559 = vmatprep.subr.mxu1 %v2769_v54 }
  0xc2   :  { %494 = vmatprep.subr.mxu0 %v4930_v57  ;;  %560 = vmatpush2.msra.mxu1 %v2775_v52  ;;  %v228_v57 = vlaneseq }
  0xc3   :  { %495 = vmatpush2.msra.mxu0 %v2772_v55  ;;  %561 = vmatprep.subr.mxu1 %v2779_v58  ;;  %v225_v55 = vld [vmem:[%s4359_s4] sm:$0xf]  ;;  %s1757_s4 = sld [smem:[#allocation13 + $0x1]] }
  0xc4   :  { %562 = vmatpush2.msra.mxu1 %v2783_v59  ;;  %618 = vmatprep.subr.mxu0 %v2414_v0  ;;  %v229_v51 = vshrl.u32 %v228_v57, 7 }
  0xc5   :  { %563 = vmatprep.subr.mxu1 %v2787_v60 }
  0xc6   :  { %564 = vmatpush2.msra.mxu1 %v2790_v62  ;;  %v230_v48 = vsub.s32 0, %v229_v51  ;;  %v234_v59 = vsub.s32 1, %v229_v51  ;;  %v238_v52 = vsub.s32 2, %v229_v51 }
  0xc7   :  { %565 = vmatprep.subr.mxu1 %v2793_v63 }
  0xc8   :  { %566 = vmatpush2.msra.mxu1 %v2797_v53  ;;  %v2935_v47 = vrot.slane %v225_v55, %v230_v48  ;;  %v2937_v0 = vrot.slane %v225_v55, %v234_v59  ;;  %v2943_v48 = vrot.slane %v225_v55, %v238_v52 }
  0xc9   :  { %689 = vmatprep.subr.mxu1 %v2435_v8  ;;  %v242_v8 = vsub.s32 3, %v229_v51 }
  0xca   :  { %4931 = vst [vmem:[#allocation86_spill] sm:$0xff] %v2935_v47  ;;  %4932 = vst [vmem:[#allocation90_spill] sm:$0xff] %v2937_v0 }
  0xcb   :  { %v2941_v43 = vrot.slane %v225_v55, %v242_v8  ;;  %v423_v8 = vstv %s1757_s4 }
  0xcd   :  { %4933 = vst [vmem:[#allocation92_spill] sm:$0xff] %v2941_v43 }
 0x144   :  { %v314_v60 = vpop.f32.mrf.mxu0 }
 0x145   :  { %v315_v62 = vadd.f32 %v314_v60, %v2935_v47 }
 0x146   :  { %v316_v63 = vpop.f32.mrf.mxu0 }
 0x147   :  { %v1754_v58 = vmul.f32 -1.442695, %v315_v62  ;;  %v317_v53 = vadd.f32 %v316_v63, %v2937_v0  ;;  %v92_v63 = vld [vmem:[#allocation10] sm:$0xff] }
 0x148   :  { %v385_v45 = vpop.f32.mrf.mxu1 }
 0x149   :  { %1804 = vpow2.f32 %v1754_v58  ;;  %v1755_v57 = vmul.f32 -1.442695, %v317_v53  ;;  %v386_v50 = vadd.f32 %v385_v45, %v2943_v48 }
 0x14a   :  { %v387_v54 = vpop.f32.mrf.mxu1 }
 0x14b   :  { %1806 = vpow2.f32 %v1755_v57  ;;  %v388_v59 = vadd.f32 %v387_v54, %v2941_v43 }
 0x14c   :  { %1808 = vtanh.f32 %v386_v50  ;;  %v420_v50 = vstv %s418_s27 }
 0x14d   :  { %v1756_v60 = vmul.f32 -1.442695, %v388_v59 }
 0x14f   :  { %1810 = vpow2.f32 %v1756_v60 }
 0x156   :  { %v1805_v47 = vpop.eup %1804 }
 0x157   :  { %v393_v62 = vadd.f32 1.0, %v1805_v47 }
 0x158   :  { %v1807_v0 = vpop.eup %1806 }
 0x159   :  { %1812 = vrcp.f32 %v393_v62  ;;  %v399_v53 = vadd.f32 1.0, %v1807_v0  ;;  %v1809_v51 = vpop.eup %1808 }
 0x15a   :  { %1814 = vtanh.f32 %v92_v63 }
 0x15b   :  { %1816 = vrcp.f32 %v399_v53 }
 0x15c   :  { %v1811_v52 = vpop.eup %1810  ;;  %1818 = vtanh.f32 %v2709_v56 }
 0x15d   :  { %v406_v45 = vadd.f32 1.0, %v1811_v52  ;;  %v4524_v52 = vstv %s2953_s28 }
 0x15f   :  { %1820 = vrcp.f32 %v406_v45 }
 0x166   :  { %v1813_v55 = vpop.eup %1812 }
 0x167   :  { %v2947_v58 = vpop.eup %1814  ;;  %v410_v47 = vmul.f32 %v1813_v55, %v1809_v51 }
 0x168   :  { %v1817_v54 = vpop.eup %1816  ;;  %v428_v0 = vmul.f32 %v2947_v58, %v423_v8 }
 0x169   :  { %v409_v57 = vmul.f32 %v1817_v54, %v92_v63  ;;  %v2955_v53 = vpop.eup %1818 }
 0x16a   :  { %v424_v56 = vmul.f32 %v2955_v53, %v423_v8  ;;  %v4974_v8 = vld [vmem:[#allocation58_spill] sm:$0xff] }
 0x16b   :  { %v411_v59 = vadd.f32 %v410_v47, %v409_v57  ;;  %v431_v47 = vld [vmem:[#allocation4 + $0x8] sm:$0xff] }
 0x16c   :  { %v1821_v63 = vpop.eup %1820 }
 0x16d   :  { %1822 = vtanh.f32 %v411_v59  ;;  %v426_v60 = vmul.f32 %v420_v50, %v411_v59  ;;  %v4976_v59 = vld [vmem:[#allocation60_spill] sm:$0xff] }
 0x16f   :  { %v2951_v62 = vadd.f32 %v428_v0, %v426_v60  ;;  %v4977_v0 = vld [vmem:[#allocation71_spill] sm:$0xff]  ;;  %v4978_v60 = vld [vmem:[#allocation62_spill] sm:$0xff] }
 0x17a   :  { %v1823_v51 = vpop.eup %1822 }
 0x17b   :  { %v2958_v55 = vmul.f32 %v1823_v51, %v1821_v63  ;;  %v2963_v54 = vmul.f32 %v1823_v51, %v4524_v52  ;;  %v4979_v63 = vld [vmem:[#allocation73_spill] sm:$0xff]  ;;  %v4980_v51 = vld [vmem:[#allocation64_spill] sm:$0xff] }
 0x17c   :  { %v3258_v52 = vld [vmem:[#allocation11 + $0x78] sm:$0xff] }
 0x17d   :  { %v421_v45 = vmul.f32 %v420_v50, %v2958_v55  ;;  %v4975_v50 = vld [vmem:[#allocation69_spill] sm:$0xff] }
 0x17f   :  { %v425_v57 = vadd.f32 %v424_v56, %v421_v45  ;;  %v4981_v56 = vld [vmem:[#allocation75_spill] sm:$0xff]  ;;  %v4982_v45 = vld [vmem:[#allocation66_spill] sm:$0xff] }
 0x181   :  { %496 = vmatprep.mubr.f32.mxu0 %v425_v57  ;;  %567 = vmatprep.mubr.f32.mxu1 %v425_v57  ;;  %v4983_v57 = vld [vmem:[#allocation77_spill] sm:$0xff] }
 0x182   :  { %497 = vmatmul.mubr.f32.vlgmr.msra.gmra.mxu0 %v431_v47  ;;  %568 = vmatmul.mubr.f32.vlgmr.msra.gmra.mxu1 %v431_v47  ;;  %v4984_v47 = vld [vmem:[#allocation68_spill] sm:$0xff] }
 0x183   :  { %619 = vmatpush1.msra.mxu0 %v2416_v1  ;;  %690 = vmatpush1.msra.mxu1 %v2441_v10  ;;  %v4934_v1 = vld [vmem:[#allocation23_spill] sm:$0xff] }
 0x184   :  { %620 = vmatprep.subr.mxu0 %v2418_v2  ;;  %691 = vmatprep.subr.mxu1 %v2447_v12  ;;  %v4935_v2 = vld [vmem:[#allocation29_spill] sm:$0xff]  ;;  %v4942_v10 = vld [vmem:[#allocation27_spill] sm:$0xff]  ;;  %v4944_v12 = vld [vmem:[#allocation28_spill] sm:$0xff] }
 0x185   :  { %621 = vmatpush1.msra.mxu0 %v2421_v3  ;;  %692 = vmatpush1.msra.mxu1 %v2449_v13  ;;  %v4936_v3 = vld [vmem:[#allocation24_spill] sm:$0xff]  ;;  %v4945_v13 = vld [vmem:[#allocation39_spill] sm:$0xff] }
 0x186   :  { %622 = vmatprep.subr.mxu0 %v2424_v4  ;;  %693 = vmatprep.subr.mxu1 %v2455_v15  ;;  %v4937_v4 = vld [vmem:[#allocation31_spill] sm:$0xff]  ;;  %v4947_v15 = vld [vmem:[#allocation41_spill] sm:$0xff] }
 0x187   :  { %623 = vmatpush1.msra.mxu0 %v2427_v5  ;;  %694 = vmatpush1.msra.mxu1 %v2461_v17  ;;  %v4938_v5 = vld [vmem:[#allocation25_spill] sm:$0xff]  ;;  %v4949_v17 = vld [vmem:[#allocation43_spill] sm:$0xff] }
 0x188   :  { %624 = vmatprep.subr.mxu0 %v2430_v6  ;;  %695 = vmatprep.subr.mxu1 %v2463_v18  ;;  %v4939_v6 = vld [vmem:[#allocation33_spill] sm:$0xff]  ;;  %v4950_v18 = vld [vmem:[#allocation34_spill] sm:$0xff] }
 0x189   :  { %625 = vmatpush1.msra.mxu0 %v2433_v7  ;;  %696 = vmatpush1.msra.mxu1 %v2469_v20  ;;  %v4940_v7 = vld [vmem:[#allocation26_spill] sm:$0xff]  ;;  %v4952_v20 = vld [vmem:[#allocation36_spill] sm:$0xff] }
 0x18a   :  { %626 = vmatprep.subr.mxu0 %v2438_v9  ;;  %697 = vmatprep.subr.mxu1 %v2475_v22  ;;  %v4941_v9 = vld [vmem:[#allocation35_spill] sm:$0xff]  ;;  %v4954_v22 = vld [vmem:[#allocation38_spill] sm:$0xff] }
 0x18b   :  { %627 = vmatpush1.msra.mxu0 %v2444_v11  ;;  %698 = vmatpush1.msra.mxu1 %v2481_v24  ;;  %v4943_v11 = vld [vmem:[#allocation37_spill] sm:$0xff]  ;;  %v4956_v24 = vld [vmem:[#allocation40_spill] sm:$0xff]  ;;  %5025 = vst [vmem:[#allocation35_spill] sm:$0xff] %v3258_v52 }
 0x18c   :  { %628 = vmatprep.subr.mxu0 %v2452_v14  ;;  %699 = vmatprep.subr.mxu1 %v2487_v26  ;;  %v4946_v14 = vld [vmem:[#allocation30_spill] sm:$0xff] }
 0x18d   :  { %629 = vmatpush1.msra.mxu0 %v2458_v16  ;;  %700 = vmatpush1.msra.mxu1 %v2493_v28  ;;  %v4948_v16 = vld [vmem:[#allocation32_spill] sm:$0xff]  ;;  %v4958_v26 = vld [vmem:[#allocation42_spill] sm:$0xff] }
 0x18e   :  { %630 = vmatprep.subr.mxu0 %v2466_v19  ;;  %701 = vmatprep.subr.mxu1 %v2499_v30  ;;  %v4951_v19 = vld [vmem:[#allocation45_spill] sm:$0xff]  ;;  %v4960_v28 = vld [vmem:[#allocation44_spill] sm:$0xff]  ;;  %v4962_v30 = vld [vmem:[#allocation46_spill] sm:$0xff] }
 0x18f   :  { %631 = vmatpush1.msra.mxu0 %v2472_v21  ;;  %702 = vmatpush1.msra.mxu1 %v2505_v32  ;;  %v4953_v21 = vld [vmem:[#allocation47_spill] sm:$0xff]  ;;  %v4964_v32 = vld [vmem:[#allocation48_spill] sm:$0xff] }
 0x190   :  { %632 = vmatprep.subr.mxu0 %v2478_v23  ;;  %703 = vmatprep.subr.mxu1 %v2511_v34  ;;  %v4955_v23 = vld [vmem:[#allocation49_spill] sm:$0xff]  ;;  %v4966_v34 = vld [vmem:[#allocation50_spill] sm:$0xff] }
 0x191   :  { %633 = vmatpush1.msra.mxu0 %v2484_v25  ;;  %704 = vmatpush1.msra.mxu1 %v2517_v36  ;;  %v4957_v25 = vld [vmem:[#allocation51_spill] sm:$0xff]  ;;  %v4968_v36 = vld [vmem:[#allocation52_spill] sm:$0xff] }
 0x192   :  { %634 = vmatprep.subr.mxu0 %v2490_v27  ;;  %705 = vmatprep.subr.mxu1 %v2523_v38  ;;  %v4959_v27 = vld [vmem:[#allocation53_spill] sm:$0xff]  ;;  %v4969_v38 = vld [vmem:[#allocation63_spill] sm:$0xff] }
 0x193   :  { %635 = vmatpush1.msra.mxu0 %v2496_v29  ;;  %706 = vmatpush1.msra.mxu1 %v2529_v40  ;;  %v4961_v29 = vld [vmem:[#allocation55_spill] sm:$0xff]  ;;  %v4970_v40 = vld [vmem:[#allocation54_spill] sm:$0xff] }
 0x194   :  { %636 = vmatprep.subr.mxu0 %v2502_v31  ;;  %707 = vmatprep.subr.mxu1 %v2535_v42  ;;  %v4963_v31 = vld [vmem:[#allocation57_spill] sm:$0xff] }
 0x195   :  { %637 = vmatpush1.msra.mxu0 %v2508_v33  ;;  %708 = vmatpush1.msra.mxu1 %v2541_v44  ;;  %v4965_v33 = vld [vmem:[#allocation59_spill] sm:$0xff]  ;;  %v4971_v42 = vld [vmem:[#allocation65_spill] sm:$0xff]  ;;  %v4972_v44 = vld [vmem:[#allocation56_spill] sm:$0xff] }
 0x196   :  { %638 = vmatprep.subr.mxu0 %v2514_v35  ;;  %709 = vmatprep.subr.mxu1 %v2547_v46  ;;  %v4967_v35 = vld [vmem:[#allocation61_spill] sm:$0xff]  ;;  %v4973_v46 = vld [vmem:[#allocation67_spill] sm:$0xff] }
 0x197   :  { %639 = vmatpush1.msra.mxu0 %v4934_v1  ;;  %710 = vmatpush1.msra.mxu1 %v4935_v2  ;;  %v4985_v1 = vld [vmem:[#allocation79_spill] sm:$0xff]  ;;  %v4986_v2 = vld [vmem:[#allocation70_spill] sm:$0xff] }
 0x198   :  { %640 = vmatprep.subr.mxu0 %v4936_v3  ;;  %711 = vmatprep.subr.mxu1 %v4937_v4  ;;  %v4987_v3 = vld [vmem:[#allocation82_spill] sm:$0xff]  ;;  %v4988_v4 = vld [vmem:[#allocation72_spill] sm:$0xff] }
 0x199   :  { %641 = vmatpush1.msra.mxu0 %v4938_v5  ;;  %712 = vmatpush1.msra.mxu1 %v4939_v6  ;;  %v4989_v5 = vld [vmem:[#allocation84_spill] sm:$0xff]  ;;  %v4990_v6 = vld [vmem:[#allocation74_spill] sm:$0xff] }
 0x19a   :  { %642 = vmatprep.subr.mxu0 %v4940_v7  ;;  %713 = vmatprep.subr.mxu1 %v4941_v9  ;;  %v4991_v7 = vld [vmem:[#allocation76_spill] sm:$0xff] }
 0x19b   :  { %643 = vmatpush1.msra.mxu0 %v4942_v10  ;;  %714 = vmatpush1.msra.mxu1 %v4943_v11  ;;  %v4992_v9 = vld [vmem:[#allocation88_spill] sm:$0xff]  ;;  %v4993_v10 = vld [vmem:[#allocation78_spill] sm:$0xff] }
 0x19c   :  { %644 = vmatprep.subr.mxu0 %v4944_v12  ;;  %715 = vmatprep.subr.mxu1 %v4945_v13  ;;  %v4994_v11 = vld [vmem:[#allocation80_spill] sm:$0xff]  ;;  %v4995_v12 = vld [vmem:[#allocation81_spill] sm:$0xff]  ;;  %v4996_v13 = vld [vmem:[#allocation83_spill] sm:$0xff] }
 0x19d   :  { %645 = vmatpush1.msra.mxu0 %v4946_v14  ;;  %716 = vmatpush1.msra.mxu1 %v4947_v15  ;;  %v4998_v14 = vld [vmem:[#allocation97_spill] sm:$0xff]  ;;  %v4999_v15 = vld [vmem:[#allocation87_spill] sm:$0xff] }
 0x19e   :  { %646 = vmatprep.subr.mxu0 %v4948_v16  ;;  %717 = vmatprep.subr.mxu1 %v4949_v17  ;;  %v5000_v16 = vld [vmem:[#allocation99_spill] sm:$0xff]  ;;  %v5002_v17 = vld [vmem:[#allocation101_spill] sm:$0xff] }
 0x19f   :  { %647 = vmatpush1.msra.mxu0 %v4950_v18  ;;  %718 = vmatpush1.msra.mxu1 %v4951_v19  ;;  %v5004_v18 = vld [vmem:[#allocation102_spill] sm:$0xff]  ;;  %v5006_v19 = vld [vmem:[#allocation103_spill] sm:$0xff] }
 0x1a0   :  { %648 = vmatprep.subr.mxu0 %v4952_v20  ;;  %719 = vmatprep.subr.mxu1 %v4953_v21  ;;  %v5008_v20 = vld [vmem:[#allocation104_spill] sm:$0xff] }
 0x1a1   :  { %649 = vmatpush1.msra.mxu0 %v4954_v22  ;;  %720 = vmatpush1.msra.mxu1 %v4955_v23  ;;  %v5009_v21 = vld [vmem:[#allocation96_spill] sm:$0xff]  ;;  %v5010_v22 = vld [vmem:[#allocation105_spill] sm:$0xff]  ;;  %v5011_v23 = vld [vmem:[#allocation98_spill] sm:$0xff] }
 0x1a2   :  { %650 = vmatprep.subr.mxu0 %v4956_v24  ;;  %721 = vmatprep.subr.mxu1 %v4957_v25  ;;  %v5012_v24 = vld [vmem:[#allocation106_spill] sm:$0xff]  ;;  %v5013_v25 = vld [vmem:[#allocation100_spill] sm:$0xff] }
 0x1a3   :  { %651 = vmatpush2.msra.mxu0 %v4958_v26  ;;  %722 = vmatpush2.msra.mxu1 %v4959_v27  ;;  %v5014_v26 = vld [vmem:[#allocation107_spill] sm:$0xff]  ;;  %v3092_v27 = vld [vmem:[#allocation11 + $0x1e8] sm:$0xff] }
 0x1a4   :  { %652 = vmatprep.subr.mxu0 %v4960_v28  ;;  %723 = vmatprep.subr.mxu1 %v4961_v29  ;;  %5015 = vst [vmem:[#allocation94_spill] sm:$0xff] %v3092_v27  ;;  %v3095_v28 = vld [vmem:[#allocation11 + $0x1f8] sm:$0xff] }
 0x1a5   :  { %653 = vmatpush2.msra.mxu0 %v4962_v30  ;;  %724 = vmatpush2.msra.mxu1 %v4963_v31  ;;  %5016 = vst [vmem:[#allocation23_spill] sm:$0xff] %v3095_v28  ;;  %v5017_v30 = vld [vmem:[#allocation86_spill] sm:$0xff] }
 0x1a6   :  { %654 = vmatprep.subr.mxu0 %v4964_v32  ;;  %725 = vmatprep.subr.mxu1 %v4965_v33 }
 0x1a7   :  { %655 = vmatpush2.msra.mxu0 %v4966_v34  ;;  %726 = vmatpush2.msra.mxu1 %v4967_v35  ;;  %v5018_v34 = vld [vmem:[#allocation90_spill] sm:$0xff] }
 0x1a8   :  { %656 = vmatprep.subr.mxu0 %v4968_v36  ;;  %727 = vmatprep.subr.mxu1 %v4969_v38 }
 0x1a9   :  { %657 = vmatpush2.msra.mxu0 %v4970_v40  ;;  %728 = vmatpush2.msra.mxu1 %v4971_v42 }
 0x1aa   :  { %658 = vmatprep.subr.mxu0 %v4972_v44  ;;  %729 = vmatprep.subr.mxu1 %v4973_v46 }
 0x1ab   :  { %659 = vmatpush2.msra.mxu0 %v4974_v8  ;;  %730 = vmatpush2.msra.mxu1 %v4975_v50 }
 0x1ac   :  { %660 = vmatprep.subr.mxu0 %v4976_v59  ;;  %731 = vmatprep.subr.mxu1 %v4977_v0 }
 0x1ad   :  { %661 = vmatpush2.msra.mxu0 %v4978_v60  ;;  %732 = vmatpush2.msra.mxu1 %v4979_v63 }
 0x1ae   :  { %662 = vmatprep.subr.mxu0 %v4980_v51  ;;  %733 = vmatprep.subr.mxu1 %v4981_v56 }
 0x1af   :  { %663 = vmatpush2.msra.mxu0 %v4982_v45  ;;  %734 = vmatpush2.msra.mxu1 %v4983_v57  ;;  %v609_v57 = vstv %s1762_s29 }
 0x1b0   :  { %664 = vmatprep.subr.mxu0 %v4984_v47  ;;  %735 = vmatprep.subr.mxu1 %v4985_v1 }
 0x1b1   :  { %665 = vmatpush2.msra.mxu0 %v4986_v2  ;;  %736 = vmatpush2.msra.mxu1 %v4987_v3  ;;  %v606_v2 = vstv %s1761_s30 }
 0x1b2   :  { %666 = vmatprep.subr.mxu0 %v4988_v4  ;;  %737 = vmatprep.subr.mxu1 %v4989_v5  ;;  %v614_v4 = vmul.f32 %v2947_v58, %v609_v57 }
 0x1b3   :  { %667 = vmatpush2.msra.mxu0 %v4990_v6  ;;  %738 = vmatpush2.msra.mxu1 %v4917_v49  ;;  %v4997_v49 = vld [vmem:[#allocation85_spill] sm:$0xff] }
 0x1b4   :  { %668 = vmatprep.subr.mxu0 %v4991_v7  ;;  %739 = vmatprep.subr.mxu1 %v4992_v9  ;;  %v4523_v7 = vstv %s3106_s8 }
 0x1b5   :  { %669 = vmatpush2.msra.mxu0 %v4993_v10  ;;  %740 = vmatpush2.msra.mxu1 %v4921_v41  ;;  %v5001_v41 = vld [vmem:[#allocation89_spill] sm:$0xff] }
 0x1b6   :  { %670 = vmatprep.subr.mxu0 %v4994_v11  ;;  %741 = vmatprep.subr.mxu1 %v4923_v39  ;;  %v5003_v39 = vld [vmem:[#allocation91_spill] sm:$0xff] }
 0x1b7   :  { %671 = vmatpush2.msra.mxu0 %v4995_v12  ;;  %742 = vmatpush2.msra.mxu1 %v4925_v37  ;;  %v5005_v37 = vld [vmem:[#allocation93_spill] sm:$0xff] }
 0x1b8   :  { %672 = vmatprep.subr.mxu0 %v4996_v13  ;;  %743 = vmatprep.subr.mxu1 %v2757_v61  ;;  %v5007_v61 = vld [vmem:[#allocation95_spill] sm:$0xff] }
 0x1b9   :  { %673 = vmatpush2.msra.mxu0 %v4997_v49  ;;  %744 = vmatpush2.msra.mxu1 %v4998_v14  ;;  %v617_v49 = vld [vmem:[#allocation4 + $0x10] sm:$0xff] }
 0x1ba   :  { %674 = vmatprep.subr.mxu0 %v4999_v15  ;;  %745 = vmatprep.subr.mxu1 %v5000_v16  ;;  %v3117_v14 = vld [vmem:[#allocation11 + $0x1e0] sm:$0xff]  ;;  %v3120_v15 = vld [vmem:[#allocation11 + $0x1f0] sm:$0xff]  ;;  %v3126_v16 = vld [vmem:[#allocation11 + $0x1d8] sm:$0xff] }
 0x1bb   :  { %675 = vmatpush2.msra.mxu0 %v5001_v41  ;;  %746 = vmatpush2.msra.mxu1 %v5002_v17  ;;  %v3129_v41 = vld [vmem:[#allocation11 + $0x1c0] sm:$0xff]  ;;  %v3132_v17 = vld [vmem:[#allocation11 + $0x1d0] sm:$0xff] }
 0x1bc   :  { %676 = vmatprep.subr.mxu0 %v5003_v39  ;;  %747 = vmatprep.subr.mxu1 %v5004_v18  ;;  %v3135_v39 = vld [vmem:[#allocation11 + $0x1a8] sm:$0xff]  ;;  %v3138_v18 = vld [vmem:[#allocation11 + $0x1b8] sm:$0xff] }
 0x1bd   :  { %677 = vmatpush2.msra.mxu0 %v5005_v37  ;;  %748 = vmatpush2.msra.mxu1 %v5006_v19  ;;  %v3141_v37 = vld [vmem:[#allocation11 + $0x1a0] sm:$0xff] }
 0x1be   :  { %678 = vmatprep.subr.mxu0 %v5007_v61  ;;  %749 = vmatprep.subr.mxu1 %v5008_v20  ;;  %v3144_v61 = vld [vmem:[#allocation11 + $0x1b0] sm:$0xff] }
 0x1bf   :  { %679 = vmatpush2.msra.mxu0 %v5009_v21  ;;  %750 = vmatpush2.msra.mxu1 %v5010_v22  ;;  %v3147_v21 = vld [vmem:[#allocation11 + $0x188] sm:$0xff] }
 0x1c0   :  { %680 = vmatprep.subr.mxu0 %v5011_v23  ;;  %751 = vmatprep.subr.mxu1 %v5012_v24  ;;  %v3150_v23 = vld [vmem:[#allocation11 + $0x198] sm:$0xff] }
 0x1c1   :  { %681 = vmatpush2.msra.mxu0 %v5013_v25  ;;  %752 = vmatpush2.msra.mxu1 %v5014_v26  ;;  %v3153_v25 = vld [vmem:[#allocation11 + $0x180] sm:$0xff] }
 0x1c2   :  { %802 = vmatprep.subr.mxu0 %v3092_v27  ;;  %873 = vmatprep.subr.mxu1 %v3095_v28 }
 0x242   :  { %v498_v29 = vpop.f32.mrf.mxu0  ;;  %v569_v38 = vpop.f32.mrf.mxu1 }
 0x243   :  { %v499_v31 = vadd.f32 %v498_v29, %v5017_v30  ;;  %v570_v44 = vadd.f32 %v569_v38, %v2943_v48  ;;  %v3156_v29 = vld [vmem:[#allocation11 + $0x190] sm:$0xff]  ;;  %v3174_v38 = vld [vmem:[#allocation11 + $0x158] sm:$0xff] }
 0x244   :  { %v500_v32 = vpop.f32.mrf.mxu0  ;;  %v571_v40 = vpop.f32.mrf.mxu1 }
 0x245   :  { %v1758_v33 = vmul.f32 -1.442695, %v499_v31  ;;  %v501_v35 = vadd.f32 %v500_v32, %v5018_v34  ;;  %v572_v42 = vadd.f32 %v571_v40, %v2941_v43  ;;  %v3159_v31 = vld [vmem:[#allocation11 + $0x168] sm:$0xff]  ;;  %v3162_v32 = vld [vmem:[#allocation11 + $0x178] sm:$0xff]  ;;  %v3177_v40 = vld [vmem:[#allocation11 + $0x140] sm:$0xff] }
 0x247   :  { %1824 = vpow2.f32 %v1758_v33  ;;  %v1759_v36 = vmul.f32 -1.442695, %v501_v35  ;;  %v1760_v46 = vmul.f32 -1.442695, %v572_v42  ;;  %v3165_v33 = vld [vmem:[#allocation11 + $0x160] sm:$0xff]  ;;  %v3168_v35 = vld [vmem:[#allocation11 + $0x170] sm:$0xff] }
 0x248   :  { %v3180_v42 = vld [vmem:[#allocation11 + $0x150] sm:$0xff] }
 0x249   :  { %1826 = vpow2.f32 %v1759_v36  ;;  %v3171_v36 = vld [vmem:[#allocation11 + $0x148] sm:$0xff] }
 0x24a   :  { %1828 = vtanh.f32 %v570_v44  ;;  %v3183_v44 = vld [vmem:[#allocation11 + $0x128] sm:$0xff] }
 0x24b   :  { %1830 = vpow2.f32 %v1760_v46  ;;  %v3186_v46 = vld [vmem:[#allocation11 + $0x138] sm:$0xff] }
 0x254   :  { %v1825_v8 = vpop.eup %1824 }
 0x255   :  { %v577_v50 = vadd.f32 1.0, %v1825_v8  ;;  %v3189_v8 = vld [vmem:[#allocation11 + $0x120] sm:$0xff] }
 0x256   :  { %v1827_v59 = vpop.eup %1826 }
 0x257   :  { %1832 = vrcp.f32 %v577_v50  ;;  %v583_v0 = vadd.f32 1.0, %v1827_v59  ;;  %v1829_v60 = vpop.eup %1828  ;;  %v3192_v50 = vld [vmem:[#allocation11 + $0x130] sm:$0xff]  ;;  %v3195_v59 = vld [vmem:[#allocation11 + $0x108] sm:$0xff] }
 0x258   :  { %v1831_v63 = vpop.eup %1830 }
 0x259   :  { %1834 = vrcp.f32 %v583_v0  ;;  %v590_v45 = vadd.f32 1.0, %v1831_v63  ;;  %v3198_v0 = vld [vmem:[#allocation11 + $0x118] sm:$0xff]  ;;  %v3204_v63 = vld [vmem:[#allocation11 + $0x110] sm:$0xff] }
 0x25b   :  { %1836 = vrcp.f32 %v590_v45  ;;  %v3213_v45 = vld [vmem:[#allocation11 + $0xe0] sm:$0xff] }
 0x264   :  { %v1833_v51 = vpop.eup %1832 }
 0x265   :  { %v594_v1 = vmul.f32 %v1833_v51, %v1829_v60  ;;  %v3201_v60 = vld [vmem:[#allocation11 + $0x100] sm:$0xff]  ;;  %v3207_v51 = vld [vmem:[#allocation11 + $0xe8] sm:$0xff] }
 0x266   :  { %v1835_v56 = vpop.eup %1834 }
 0x267   :  { %v593_v47 = vmul.f32 %v1835_v56, %v2951_v62  ;;  %v610_v62 = vmul.f32 %v2955_v53, %v609_v57  ;;  %v3123_v53 = vld [vmem:[#allocation11 + $0x1c8] sm:$0xff]  ;;  %v3210_v56 = vld [vmem:[#allocation11 + $0xf8] sm:$0xff]  ;;  %v3216_v57 = vld [vmem:[#allocation11 + $0xf0] sm:$0xff] }
 0x268   :  { %v1837_v9 = vpop.eup %1836 }
 0x269   :  { %v595_v3 = vadd.f32 %v594_v1, %v593_v47  ;;  %v3219_v47 = vld [vmem:[#allocation11 + $0xc8] sm:$0xff]  ;;  %v3222_v1 = vld [vmem:[#allocation11 + $0xd8] sm:$0xff] }
 0x26b   :  { %1838 = vtanh.f32 %v595_v3  ;;  %v612_v5 = vmul.f32 %v606_v2, %v595_v3  ;;  %v3228_v3 = vld [vmem:[#allocation11 + $0xd0] sm:$0xff] }
 0x26d   :  { %v3104_v6 = vadd.f32 %v614_v4, %v612_v5  ;;  %v3231_v4 = vld [vmem:[#allocation11 + $0xa8] sm:$0xff]  ;;  %v3234_v5 = vld [vmem:[#allocation11 + $0xb8] sm:$0xff] }
 0x278   :  { %v1839_v10 = vpop.eup %1838 }
 0x279   :  { %v3109_v11 = vmul.f32 %v1839_v10, %v1837_v9  ;;  %v3114_v12 = vmul.f32 %v1839_v10, %v4523_v7  ;;  %v3237_v9 = vld [vmem:[#allocation11 + $0xa0] sm:$0xff]  ;;  %v3240_v10 = vld [vmem:[#allocation11 + $0xb0] sm:$0xff]  ;;  %v3255_v7 = vld [vmem:[#allocation11 + $0x68] sm:$0xff] }
 0x27a   :  { %5024 = vst [vmem:[#allocation26_spill] sm:$0xff] %v3255_v7 }
 0x27b   :  { %5019 = vst [vmem:[#allocation29_spill] sm:$0xff] %v3109_v11  ;;  %5020 = vst [vmem:[#allocation24_spill] sm:$0xff] %v3114_v12  ;;  %v607_v58 = vmul.f32 %v606_v2, %v3109_v11  ;;  %v3225_v2 = vld [vmem:[#allocation11 + $0xc0] sm:$0xff]  ;;  %v3264_v11 = vld [vmem:[#allocation11 + $0x70] sm:$0xff] }
 0x27c   :  { %v3261_v12 = vld [vmem:[#allocation11 + $0x60] sm:$0xff]  ;;  %5027 = vst [vmem:[#allocation37_spill] sm:$0xff] %v3264_v11 }
 0x27d   :  { %v611_v13 = vadd.f32 %v610_v62, %v607_v58  ;;  %v3243_v62 = vld [vmem:[#allocation11 + $0x88] sm:$0xff]  ;;  %v3246_v58 = vld [vmem:[#allocation11 + $0x98] sm:$0xff]  ;;  %5026 = vst [vmem:[#allocation27_spill] sm:$0xff] %v3261_v12 }
 0x27e   :  { %5021 = vst [vmem:[#allocation31_spill] sm:$0xff] %v3246_v58 }
 0x27f   :  { %682 = vmatprep.mubr.f32.mxu0 %v611_v13  ;;  %753 = vmatprep.mubr.f32.mxu1 %v611_v13  ;;  %v3249_v13 = vld [vmem:[#allocation11 + $0x80] sm:$0xff] }
 0x280   :  { %683 = vmatmul.mubr.f32.vlgmr.msra.gmra.mxu0 %v617_v49  ;;  %754 = vmatmul.mubr.f32.vlgmr.msra.gmra.mxu1 %v617_v49  ;;  %5022 = vst [vmem:[#allocation25_spill] sm:$0xff] %v3249_v13  ;;  %v3252_v49 = vld [vmem:[#allocation11 + $0x90] sm:$0xff] }
 0x281   :  { %803 = vmatpush1.msra.mxu0 %v3117_v14  ;;  %874 = vmatpush1.msra.mxu1 %v3120_v15  ;;  %5023 = vst [vmem:[#allocation33_spill] sm:$0xff] %v3252_v49 }
 0x282   :  { %804 = vmatprep.subr.mxu0 %v3123_v53  ;;  %875 = vmatprep.subr.mxu1 %v3126_v16 }
 0x283   :  { %805 = vmatpush1.msra.mxu0 %v3129_v41  ;;  %876 = vmatpush1.msra.mxu1 %v3132_v17 }
 0x284   :  { %806 = vmatprep.subr.mxu0 %v3135_v39  ;;  %877 = vmatprep.subr.mxu1 %v3138_v18 }
 0x285   :  { %807 = vmatpush1.msra.mxu0 %v3141_v37  ;;  %878 = vmatpush1.msra.mxu1 %v3144_v61 }
 0x286   :  { %808 = vmatprep.subr.mxu0 %v3147_v21  ;;  %879 = vmatprep.subr.mxu1 %v3150_v23 }
 0x287   :  { %809 = vmatpush1.msra.mxu0 %v3153_v25  ;;  %880 = vmatpush1.msra.mxu1 %v3156_v29 }
 0x288   :  { %810 = vmatprep.subr.mxu0 %v3159_v31  ;;  %881 = vmatprep.subr.mxu1 %v3162_v32 }
 0x289   :  { %811 = vmatpush1.msra.mxu0 %v3165_v33  ;;  %882 = vmatpush1.msra.mxu1 %v3168_v35 }
 0x28a   :  { %812 = vmatprep.subr.mxu0 %v3171_v36  ;;  %883 = vmatprep.subr.mxu1 %v3174_v38 }
 0x28b   :  { %813 = vmatpush1.msra.mxu0 %v3177_v40  ;;  %884 = vmatpush1.msra.mxu1 %v3180_v42 }
 0x28c   :  { %814 = vmatprep.subr.mxu0 %v3183_v44  ;;  %885 = vmatprep.subr.mxu1 %v3186_v46 }
 0x28d   :  { %815 = vmatpush1.msra.mxu0 %v3189_v8  ;;  %886 = vmatpush1.msra.mxu1 %v3192_v50 }
 0x28e   :  { %816 = vmatprep.subr.mxu0 %v3195_v59  ;;  %887 = vmatprep.subr.mxu1 %v3198_v0 }
 0x28f   :  { %817 = vmatpush1.msra.mxu0 %v3201_v60  ;;  %888 = vmatpush1.msra.mxu1 %v3204_v63 }
 0x290   :  { %818 = vmatprep.subr.mxu0 %v3207_v51  ;;  %889 = vmatprep.subr.mxu1 %v3210_v56 }
 0x291   :  { %819 = vmatpush1.msra.mxu0 %v3213_v45  ;;  %890 = vmatpush1.msra.mxu1 %v3216_v57 }
 0x292   :  { %820 = vmatprep.subr.mxu0 %v3219_v47  ;;  %891 = vmatprep.subr.mxu1 %v3222_v1 }
 0x293   :  { %821 = vmatpush1.msra.mxu0 %v3225_v2  ;;  %892 = vmatpush1.msra.mxu1 %v3228_v3 }
 0x294   :  { %822 = vmatprep.subr.mxu0 %v3231_v4  ;;  %893 = vmatprep.subr.mxu1 %v3234_v5 }
 0x295   :  { %823 = vmatpush1.msra.mxu0 %v3237_v9  ;;  %894 = vmatpush1.msra.mxu1 %v3240_v10 }
 0x296   :  { %824 = vmatprep.subr.mxu0 %v3243_v62  ;;  %895 = vmatprep.subr.mxu1 %v3246_v58 }
 0x297   :  { %825 = vmatpush1.msra.mxu0 %v3249_v13  ;;  %896 = vmatpush1.msra.mxu1 %v3252_v49  ;;  %v3267_v13 = vld [vmem:[#allocation11 + $0x48] sm:$0xff]  ;;  %v3270_v49 = vld [vmem:[#allocation11 + $0x58] sm:$0xff] }
 0x298   :  { %826 = vmatprep.subr.mxu0 %v3255_v7  ;;  %897 = vmatprep.subr.mxu1 %v3258_v52  ;;  %5028 = vst [vmem:[#allocation28_spill] sm:$0xff] %v3267_v13  ;;  %5029 = vst [vmem:[#allocation39_spill] sm:$0xff] %v3270_v49  ;;  %v3273_v7 = vld [vmem:[#allocation11 + $0x40] sm:$0xff]  ;;  %v3276_v52 = vld [vmem:[#allocation11 + $0x50] sm:$0xff] }
 0x299   :  { %827 = vmatpush1.msra.mxu0 %v3261_v12  ;;  %898 = vmatpush1.msra.mxu1 %v3264_v11  ;;  %5030 = vst [vmem:[#allocation30_spill] sm:$0xff] %v3273_v7  ;;  %5031 = vst [vmem:[#allocation41_spill] sm:$0xff] %v3276_v52  ;;  %v3279_v12 = vld [vmem:[#allocation11 + $0x28] sm:$0xff]  ;;  %v3282_v11 = vld [vmem:[#allocation11 + $0x38] sm:$0xff] }
 0x29a   :  { %828 = vmatprep.subr.mxu0 %v3267_v13  ;;  %899 = vmatprep.subr.mxu1 %v3270_v49  ;;  %5032 = vst [vmem:[#allocation32_spill] sm:$0xff] %v3279_v12  ;;  %5033 = vst [vmem:[#allocation43_spill] sm:$0xff] %v3282_v11  ;;  %v3285_v13 = vld [vmem:[#allocation11 + $0x20] sm:$0xff]  ;;  %v3288_v49 = vld [vmem:[#allocation11 + $0x30] sm:$0xff] }
 0x29b   :  { %829 = vmatpush1.msra.mxu0 %v3273_v7  ;;  %900 = vmatpush1.msra.mxu1 %v3276_v52  ;;  %5034 = vst [vmem:[#allocation34_spill] sm:$0xff] %v3285_v13  ;;  %5035 = vst [vmem:[#allocation45_spill] sm:$0xff] %v3288_v49  ;;  %v3291_v7 = vld [vmem:[#allocation11 + $0x8] sm:$0xff]  ;;  %v3294_v52 = vld [vmem:[#allocation11 + $0x18] sm:$0xff] }
 0x29c   :  { %830 = vmatprep.subr.mxu0 %v3279_v12  ;;  %901 = vmatprep.subr.mxu1 %v3282_v11  ;;  %5036 = vst [vmem:[#allocation36_spill] sm:$0xff] %v3291_v7  ;;  %5037 = vst [vmem:[#allocation47_spill] sm:$0xff] %v3294_v52  ;;  %v3297_v12 = vld [vmem:[#allocation11] sm:$0xff]  ;;  %v3300_v11 = vld [vmem:[#allocation11 + $0x10] sm:$0xff] }
 0x29d   :  { %831 = vmatpush1.msra.mxu0 %v3285_v13  ;;  %902 = vmatpush1.msra.mxu1 %v3288_v49  ;;  %5038 = vst [vmem:[#allocation38_spill] sm:$0xff] %v3297_v12  ;;  %5039 = vst [vmem:[#allocation49_spill] sm:$0xff] %v3300_v11  ;;  %v3303_v13 = vld [vmem:[#allocation11 + $0x3e8] sm:$0xff]  ;;  %v3306_v49 = vld [vmem:[#allocation11 + $0x3f8] sm:$0xff] }
 0x29e   :  { %832 = vmatprep.subr.mxu0 %v3291_v7  ;;  %903 = vmatprep.subr.mxu1 %v3294_v52  ;;  %5040 = vst [vmem:[#allocation40_spill] sm:$0xff] %v3303_v13  ;;  %5041 = vst [vmem:[#allocation51_spill] sm:$0xff] %v3306_v49  ;;  %v3309_v7 = vld [vmem:[#allocation11 + $0x3e0] sm:$0xff]  ;;  %v3312_v52 = vld [vmem:[#allocation11 + $0x3f0] sm:$0xff] }
 0x29f   :  { %833 = vmatpush1.msra.mxu0 %v3297_v12  ;;  %904 = vmatpush1.msra.mxu1 %v3300_v11  ;;  %5042 = vst [vmem:[#allocation42_spill] sm:$0xff] %v3309_v7  ;;  %5043 = vst [vmem:[#allocation53_spill] sm:$0xff] %v3312_v52  ;;  %v3315_v12 = vld [vmem:[#allocation11 + $0x3c8] sm:$0xff]  ;;  %v3318_v11 = vld [vmem:[#allocation11 + $0x3d8] sm:$0xff] }
 0x2a0   :  { %834 = vmatprep.subr.mxu0 %v3303_v13  ;;  %905 = vmatprep.subr.mxu1 %v3306_v49  ;;  %5044 = vst [vmem:[#allocation44_spill] sm:$0xff] %v3315_v12  ;;  %5045 = vst [vmem:[#allocation55_spill] sm:$0xff] %v3318_v11  ;;  %v3321_v13 = vld [vmem:[#allocation11 + $0x3c0] sm:$0xff]  ;;  %v3324_v49 = vld [vmem:[#allocation11 + $0x3d0] sm:$0xff] }
 0x2a1   :  { %835 = vmatpush2.msra.mxu0 %v3309_v7  ;;  %906 = vmatpush2.msra.mxu1 %v3312_v52  ;;  %5046 = vst [vmem:[#allocation46_spill] sm:$0xff] %v3321_v13  ;;  %5047 = vst [vmem:[#allocation57_spill] sm:$0xff] %v3324_v49  ;;  %v3327_v7 = vld [vmem:[#allocation11 + $0x3a8] sm:$0xff]  ;;  %v3330_v52 = vld [vmem:[#allocation11 + $0x3b8] sm:$0xff] }
 0x2a2   :  { %836 = vmatprep.subr.mxu0 %v3315_v12  ;;  %907 = vmatprep.subr.mxu1 %v3318_v11  ;;  %5048 = vst [vmem:[#allocation48_spill] sm:$0xff] %v3327_v7  ;;  %5049 = vst [vmem:[#allocation59_spill] sm:$0xff] %v3330_v52  ;;  %v3333_v12 = vld [vmem:[#allocation11 + $0x3a0] sm:$0xff]  ;;  %v3336_v11 = vld [vmem:[#allocation11 + $0x3b0] sm:$0xff] }
 0x2a3   :  { %837 = vmatpush2.msra.mxu0 %v3321_v13  ;;  %908 = vmatpush2.msra.mxu1 %v3324_v49  ;;  %5050 = vst [vmem:[#allocation50_spill] sm:$0xff] %v3333_v12  ;;  %5051 = vst [vmem:[#allocation61_spill] sm:$0xff] %v3336_v11  ;;  %v3339_v13 = vld [vmem:[#allocation11 + $0x388] sm:$0xff]  ;;  %v3342_v49 = vld [vmem:[#allocation11 + $0x398] sm:$0xff] }
 0x2a4   :  { %838 = vmatprep.subr.mxu0 %v3327_v7  ;;  %909 = vmatprep.subr.mxu1 %v3330_v52  ;;  %5052 = vst [vmem:[#allocation52_spill] sm:$0xff] %v3339_v13  ;;  %5053 = vst [vmem:[#allocation63_spill] sm:$0xff] %v3342_v49  ;;  %v3345_v7 = vld [vmem:[#allocation11 + $0x380] sm:$0xff]  ;;  %v3348_v52 = vld [vmem:[#allocation11 + $0x390] sm:$0xff] }
 0x2a5   :  { %839 = vmatpush2.msra.mxu0 %v3333_v12  ;;  %910 = vmatpush2.msra.mxu1 %v3336_v11  ;;  %5054 = vst [vmem:[#allocation54_spill] sm:$0xff] %v3345_v7  ;;  %5055 = vst [vmem:[#allocation65_spill] sm:$0xff] %v3348_v52  ;;  %v3351_v12 = vld [vmem:[#allocation11 + $0x368] sm:$0xff]  ;;  %v3354_v11 = vld [vmem:[#allocation11 + $0x378] sm:$0xff] }
 0x2a6   :  { %840 = vmatprep.subr.mxu0 %v3339_v13  ;;  %911 = vmatprep.subr.mxu1 %v3342_v49  ;;  %5056 = vst [vmem:[#allocation56_spill] sm:$0xff] %v3351_v12  ;;  %5057 = vst [vmem:[#allocation67_spill] sm:$0xff] %v3354_v11  ;;  %v3357_v13 = vld [vmem:[#allocation11 + $0x360] sm:$0xff]  ;;  %v3360_v49 = vld [vmem:[#allocation11 + $0x370] sm:$0xff] }
 0x2a7   :  { %841 = vmatpush2.msra.mxu0 %v3345_v7  ;;  %912 = vmatpush2.msra.mxu1 %v3348_v52  ;;  %5058 = vst [vmem:[#allocation58_spill] sm:$0xff] %v3357_v13  ;;  %5059 = vst [vmem:[#allocation69_spill] sm:$0xff] %v3360_v49  ;;  %v3363_v7 = vld [vmem:[#allocation11 + $0x348] sm:$0xff]  ;;  %v3366_v52 = vld [vmem:[#allocation11 + $0x358] sm:$0xff] }
 0x2a8   :  { %842 = vmatprep.subr.mxu0 %v3351_v12  ;;  %913 = vmatprep.subr.mxu1 %v3354_v11  ;;  %5060 = vst [vmem:[#allocation60_spill] sm:$0xff] %v3363_v7  ;;  %5061 = vst [vmem:[#allocation71_spill] sm:$0xff] %v3366_v52  ;;  %v3369_v12 = vld [vmem:[#allocation11 + $0x340] sm:$0xff]  ;;  %v3372_v11 = vld [vmem:[#allocation11 + $0x350] sm:$0xff] }
 0x2a9   :  { %843 = vmatpush2.msra.mxu0 %v3357_v13  ;;  %914 = vmatpush2.msra.mxu1 %v3360_v49  ;;  %5062 = vst [vmem:[#allocation62_spill] sm:$0xff] %v3369_v12  ;;  %5063 = vst [vmem:[#allocation73_spill] sm:$0xff] %v3372_v11  ;;  %v3375_v13 = vld [vmem:[#allocation11 + $0x328] sm:$0xff]  ;;  %v3378_v49 = vld [vmem:[#allocation11 + $0x338] sm:$0xff] }
 0x2aa   :  { %844 = vmatprep.subr.mxu0 %v3363_v7  ;;  %915 = vmatprep.subr.mxu1 %v3366_v52  ;;  %5064 = vst [vmem:[#allocation64_spill] sm:$0xff] %v3375_v13  ;;  %5065 = vst [vmem:[#allocation75_spill] sm:$0xff] %v3378_v49  ;;  %v3381_v7 = vld [vmem:[#allocation11 + $0x320] sm:$0xff]  ;;  %v3384_v52 = vld [vmem:[#allocation11 + $0x330] sm:$0xff] }
 0x2ab   :  { %845 = vmatpush2.msra.mxu0 %v3369_v12  ;;  %916 = vmatpush2.msra.mxu1 %v3372_v11  ;;  %5066 = vst [vmem:[#allocation66_spill] sm:$0xff] %v3381_v7  ;;  %5067 = vst [vmem:[#allocation77_spill] sm:$0xff] %v3384_v52  ;;  %v3387_v12 = vld [vmem:[#allocation11 + $0x308] sm:$0xff]  ;;  %v3390_v11 = vld [vmem:[#allocation11 + $0x318] sm:$0xff] }
 0x2ac   :  { %846 = vmatprep.subr.mxu0 %v3375_v13  ;;  %917 = vmatprep.subr.mxu1 %v3378_v49  ;;  %5068 = vst [vmem:[#allocation68_spill] sm:$0xff] %v3387_v12  ;;  %5069 = vst [vmem:[#allocation79_spill] sm:$0xff] %v3390_v11  ;;  %v3393_v13 = vld [vmem:[#allocation11 + $0x300] sm:$0xff]  ;;  %v3396_v49 = vld [vmem:[#allocation11 + $0x310] sm:$0xff] }
 0x2ad   :  { %847 = vmatpush2.msra.mxu0 %v3381_v7  ;;  %918 = vmatpush2.msra.mxu1 %v3384_v52  ;;  %5070 = vst [vmem:[#allocation70_spill] sm:$0xff] %v3393_v13  ;;  %5071 = vst [vmem:[#allocation82_spill] sm:$0xff] %v3396_v49  ;;  %v3399_v7 = vld [vmem:[#allocation11 + $0x2e8] sm:$0xff]  ;;  %v3402_v52 = vld [vmem:[#allocation11 + $0x2f8] sm:$0xff] }
 0x2ae   :  { %848 = vmatprep.subr.mxu0 %v3387_v12  ;;  %919 = vmatprep.subr.mxu1 %v3390_v11  ;;  %5072 = vst [vmem:[#allocation72_spill] sm:$0xff] %v3399_v7  ;;  %5073 = vst [vmem:[#allocation84_spill] sm:$0xff] %v3402_v52  ;;  %v3405_v12 = vld [vmem:[#allocation11 + $0x2e0] sm:$0xff]  ;;  %v3408_v11 = vld [vmem:[#allocation11 + $0x2f0] sm:$0xff] }
 0x2af   :  { %849 = vmatpush2.msra.mxu0 %v3393_v13  ;;  %920 = vmatpush2.msra.mxu1 %v3396_v49  ;;  %5074 = vst [vmem:[#allocation74_spill] sm:$0xff] %v3405_v12  ;;  %5075 = vst [vmem:[#allocation76_spill] sm:$0xff] %v3408_v11  ;;  %v3411_v13 = vld [vmem:[#allocation11 + $0x2c8] sm:$0xff]  ;;  %v3414_v49 = vld [vmem:[#allocation11 + $0x2d8] sm:$0xff] }
 0x2b0   :  { %850 = vmatprep.subr.mxu0 %v3399_v7  ;;  %921 = vmatprep.subr.mxu1 %v3402_v52  ;;  %5076 = vst [vmem:[#allocation88_spill] sm:$0xff] %v3411_v13  ;;  %5077 = vst [vmem:[#allocation78_spill] sm:$0xff] %v3414_v49  ;;  %v3417_v7 = vld [vmem:[#allocation11 + $0x2c0] sm:$0xff]  ;;  %v3420_v52 = vld [vmem:[#allocation11 + $0x2d0] sm:$0xff] }
 0x2b1   :  { %851 = vmatpush2.msra.mxu0 %v3405_v12  ;;  %922 = vmatpush2.msra.mxu1 %v3408_v11  ;;  %5078 = vst [vmem:[#allocation80_spill] sm:$0xff] %v3417_v7  ;;  %5079 = vst [vmem:[#allocation81_spill] sm:$0xff] %v3420_v52  ;;  %v3423_v12 = vld [vmem:[#allocation11 + $0x2a8] sm:$0xff]  ;;  %v3426_v11 = vld [vmem:[#allocation11 + $0x2b8] sm:$0xff] }
 0x2b2   :  { %852 = vmatprep.subr.mxu0 %v3411_v13  ;;  %923 = vmatprep.subr.mxu1 %v3414_v49  ;;  %5080 = vst [vmem:[#allocation83_spill] sm:$0xff] %v3423_v12  ;;  %5081 = vst [vmem:[#allocation85_spill] sm:$0xff] %v3426_v11  ;;  %v3429_v13 = vld [vmem:[#allocation11 + $0x2a0] sm:$0xff]  ;;  %v3432_v49 = vld [vmem:[#allocation11 + $0x2b0] sm:$0xff] }
 0x2b3   :  { %853 = vmatpush2.msra.mxu0 %v3417_v7  ;;  %924 = vmatpush2.msra.mxu1 %v3420_v52  ;;  %5082 = vst [vmem:[#allocation97_spill] sm:$0xff] %v3429_v13  ;;  %5083 = vst [vmem:[#allocation87_spill] sm:$0xff] %v3432_v49  ;;  %v3435_v7 = vld [vmem:[#allocation11 + $0x288] sm:$0xff]  ;;  %v3438_v52 = vld [vmem:[#allocation11 + $0x298] sm:$0xff] }
 0x2b4   :  { %854 = vmatprep.subr.mxu0 %v3423_v12  ;;  %925 = vmatprep.subr.mxu1 %v3426_v11  ;;  %5084 = vst [vmem:[#allocation99_spill] sm:$0xff] %v3435_v7  ;;  %5085 = vst [vmem:[#allocation89_spill] sm:$0xff] %v3438_v52  ;;  %v3441_v12 = vld [vmem:[#allocation11 + $0x280] sm:$0xff]  ;;  %v3444_v11 = vld [vmem:[#allocation11 + $0x290] sm:$0xff] }
 0x2b5   :  { %855 = vmatpush2.msra.mxu0 %v3429_v13  ;;  %926 = vmatpush2.msra.mxu1 %v3432_v49  ;;  %5086 = vst [vmem:[#allocation101_spill] sm:$0xff] %v3441_v12  ;;  %5087 = vst [vmem:[#allocation91_spill] sm:$0xff] %v3444_v11  ;;  %v3447_v13 = vld [vmem:[#allocation11 + $0x268] sm:$0xff]  ;;  %v3450_v49 = vld [vmem:[#allocation11 + $0x278] sm:$0xff] }
 0x2b6   :  { %856 = vmatprep.subr.mxu0 %v3435_v7  ;;  %927 = vmatprep.subr.mxu1 %v3438_v52  ;;  %5088 = vst [vmem:[#allocation102_spill] sm:$0xff] %v3447_v13  ;;  %5089 = vst [vmem:[#allocation93_spill] sm:$0xff] %v3450_v49  ;;  %v3453_v7 = vld [vmem:[#allocation11 + $0x260] sm:$0xff]  ;;  %v3456_v52 = vld [vmem:[#allocation11 + $0x270] sm:$0xff] }
 0x2b7   :  { %857 = vmatpush2.msra.mxu0 %v3441_v12  ;;  %928 = vmatpush2.msra.mxu1 %v3444_v11  ;;  %5090 = vst [vmem:[#allocation103_spill] sm:$0xff] %v3453_v7  ;;  %5091 = vst [vmem:[#allocation95_spill] sm:$0xff] %v3456_v52  ;;  %v3459_v12 = vld [vmem:[#allocation11 + $0x248] sm:$0xff]  ;;  %v3462_v11 = vld [vmem:[#allocation11 + $0x258] sm:$0xff] }
 0x2b8   :  { %858 = vmatprep.subr.mxu0 %v3447_v13  ;;  %929 = vmatprep.subr.mxu1 %v3450_v49  ;;  %5092 = vst [vmem:[#allocation104_spill] sm:$0xff] %v3459_v12  ;;  %5093 = vst [vmem:[#allocation96_spill] sm:$0xff] %v3462_v11  ;;  %v3465_v13 = vld [vmem:[#allocation11 + $0x240] sm:$0xff]  ;;  %v3469_v49 = vld [vmem:[#allocation11 + $0x228] sm:$0xff] }
 0x2b9   :  { %859 = vmatpush2.msra.mxu0 %v3453_v7  ;;  %930 = vmatpush2.msra.mxu1 %v3456_v52  ;;  %5094 = vst [vmem:[#allocation105_spill] sm:$0xff] %v3465_v13  ;;  %5095 = vst [vmem:[#allocation98_spill] sm:$0xff] %v3469_v49  ;;  %v3473_v52 = vld [vmem:[#allocation11 + $0x220] sm:$0xff] }
 0x2ba   :  { %860 = vmatprep.subr.mxu0 %v3459_v12  ;;  %931 = vmatprep.subr.mxu1 %v3462_v11  ;;  %5096 = vst [vmem:[#allocation106_spill] sm:$0xff] %v3473_v52  ;;  %v3477_v12 = vld [vmem:[#allocation11 + $0x208] sm:$0xff] }
 0x2bb   :  { %861 = vmatpush2.msra.mxu0 %v3465_v13  ;;  %932 = vmatpush2.msra.mxu1 %v5006_v19  ;;  %5097 = vst [vmem:[#allocation100_spill] sm:$0xff] %v3477_v12  ;;  %v3481_v13 = vld [vmem:[#allocation11 + $0x200] sm:$0xff] }
 0x2bc   :  { %862 = vmatprep.subr.mxu0 %v3469_v49  ;;  %933 = vmatprep.subr.mxu1 %v5008_v20  ;;  %5098 = vst [vmem:[#allocation107_spill] sm:$0xff] %v3481_v13 }
 0x2bd   :  { %863 = vmatpush2.msra.mxu0 %v3473_v52  ;;  %934 = vmatpush2.msra.mxu1 %v5010_v22 }
 0x2be   :  { %864 = vmatprep.subr.mxu0 %v3477_v12  ;;  %935 = vmatprep.subr.mxu1 %v5012_v24 }
 0x2bf   :  { %865 = vmatpush2.msra.mxu0 %v3481_v13  ;;  %936 = vmatpush2.msra.mxu1 %v5014_v26 }
 0x2c0   :  { %986 = vmatprep.subr.mxu0 %v3092_v27  ;;  %1057 = vmatprep.subr.mxu1 %v3095_v28 }
 0x340   :  { %v684_v19 = vpop.f32.mrf.mxu0  ;;  %v755_v24 = vpop.f32.mrf.mxu1 }
 0x341   :  { %v685_v20 = vadd.f32 %v684_v19, %v5017_v30  ;;  %v756_v26 = vadd.f32 %v755_v24, %v2943_v48  ;;  %v790_v24 = vstv %s1766_s9 }
 0x342   :  { %v686_v22 = vpop.f32.mrf.mxu0  ;;  %v757_v11 = vpop.f32.mrf.mxu1 }
 0x343   :  { %v1763_v52 = vmul.f32 -1.442695, %v685_v20  ;;  %v687_v49 = vadd.f32 %v686_v22, %v5018_v34  ;;  %v758_v13 = vadd.f32 %v757_v11, %v2941_v43 }
 0x345   :  { %1840 = vpow2.f32 %v1763_v52  ;;  %v1764_v12 = vmul.f32 -1.442695, %v687_v49  ;;  %v1765_v7 = vmul.f32 -1.442695, %v758_v13  ;;  %v4685_v13 = vstv %s3496_s10 }
 0x347   :  { %1842 = vpow2.f32 %v1764_v12 }
 0x348   :  { %1844 = vtanh.f32 %v756_v26 }
 0x349   :  { %1846 = vpow2.f32 %v1765_v7 }
 0x352   :  { %v1841_v27 = vpop.eup %1840 }
 0x353   :  { %v763_v58 = vadd.f32 1.0, %v1841_v27 }
 0x354   :  { %v1843_v28 = vpop.eup %1842 }
 0x355   :  { %1848 = vrcp.f32 %v763_v58  ;;  %v769_v19 = vadd.f32 1.0, %v1843_v28  ;;  %v1845_v20 = vpop.eup %1844 }
 0x356   :  { %v1847_v52 = vpop.eup %1846 }
 0x357   :  { %1850 = vrcp.f32 %v769_v19  ;;  %v776_v12 = vadd.f32 1.0, %v1847_v52 }
 0x358   :  { %1852 = vtanh.f32 %v2958_v55 }
 0x359   :  { %1854 = vrcp.f32 %v776_v12  ;;  %v5103_v12 = vld [vmem:[#allocation25_spill] sm:$0xff] }
 0x362   :  { %v1849_v49 = vpop.eup %1848 }
 0x363   :  { %v780_v11 = vmul.f32 %v1849_v49, %v1845_v20 }
 0x364   :  { %v1851_v22 = vpop.eup %1850 }
 0x365   :  { %v779_v34 = vmul.f32 %v1851_v22, %v3104_v6  ;;  %v1853_v58 = vpop.eup %1852  ;;  %v5102_v22 = vld [vmem:[#allocation31_spill] sm:$0xff] }
 0x366   :  { %v1855_v26 = vpop.eup %1854 }
 0x367   :  { %v781_v27 = vadd.f32 %v780_v11, %v779_v34  ;;  %v5101_v34 = vstv %s2953_s28  ;;  %v5104_v11 = vld [vmem:[#allocation33_spill] sm:$0xff] }
 0x368   :  { %v794_v52 = vmul.f32 %v1853_v58, %v5101_v34  ;;  %v5108_v58 = vld [vmem:[#allocation37_spill] sm:$0xff] }
 0x369   :  { %1856 = vtanh.f32 %v781_v27  ;;  %v796_v7 = vmul.f32 %v790_v24, %v781_v27  ;;  %v5106_v27 = vld [vmem:[#allocation35_spill] sm:$0xff]  ;;  %v5112_v34 = vld [vmem:[#allocation41_spill] sm:$0xff] }
 0x36b   :  { %v3494_v28 = vadd.f32 %v2963_v54, %v796_v7  ;;  %v801_v54 = vld [vmem:[#allocation4 + $0x18] sm:$0xff]  ;;  %v5107_v7 = vld [vmem:[#allocation27_spill] sm:$0xff] }
 0x376   :  { %v1857_v6 = vpop.eup %1856 }
 0x377   :  { %v3499_v19 = vmul.f32 %v1857_v6, %v1855_v26  ;;  %v3503_v20 = vmul.f32 %v1857_v6, %v4685_v13  ;;  %v5109_v26 = vld [vmem:[#allocation28_spill] sm:$0xff]  ;;  %v5110_v6 = vld [vmem:[#allocation39_spill] sm:$0xff]  ;;  %v5116_v13 = vld [vmem:[#allocation45_spill] sm:$0xff] }
 0x379   :  { %5099 = vst [vmem:[#allocation86_spill] sm:$0xff] %v3499_v19  ;;  %5100 = vst [vmem:[#allocation108_spill] sm:$0xff] %v3503_v20  ;;  %v791_v55 = vmul.f32 %v790_v24, %v3499_v19  ;;  %v5105_v24 = vld [vmem:[#allocation26_spill] sm:$0xff]  ;;  %v5117_v20 = vld [vmem:[#allocation36_spill] sm:$0xff] }
 0x37a   :  { %v5118_v19 = vld [vmem:[#allocation47_spill] sm:$0xff] }
 0x37b   :  { %v795_v49 = vadd.f32 %v794_v52, %v791_v55  ;;  %v5111_v55 = vld [vmem:[#allocation30_spill] sm:$0xff]  ;;  %v5113_v52 = vld [vmem:[#allocation32_spill] sm:$0xff] }
 0x37d   :  { %866 = vmatprep.mubr.f32.mxu0 %v795_v49  ;;  %937 = vmatprep.mubr.f32.mxu1 %v795_v49  ;;  %v5114_v49 = vld [vmem:[#allocation43_spill] sm:$0xff] }
 0x37e   :  { %867 = vmatmul.mubr.f32.vlgmr.msra.gmra.mxu0 %v801_v54  ;;  %938 = vmatmul.mubr.f32.vlgmr.msra.gmra.mxu1 %v801_v54  ;;  %v5115_v54 = vld [vmem:[#allocation34_spill] sm:$0xff] }
 0x37f   :  { %987 = vmatpush1.msra.mxu0 %v3117_v14  ;;  %1058 = vmatpush1.msra.mxu1 %v3120_v15 }
 0x380   :  { %988 = vmatprep.subr.mxu0 %v3123_v53  ;;  %1059 = vmatprep.subr.mxu1 %v3126_v16 }
 0x381   :  { %989 = vmatpush1.msra.mxu0 %v3129_v41  ;;  %1060 = vmatpush1.msra.mxu1 %v3132_v17 }
 0x382   :  { %990 = vmatprep.subr.mxu0 %v3135_v39  ;;  %1061 = vmatprep.subr.mxu1 %v3138_v18 }
 0x383   :  { %991 = vmatpush1.msra.mxu0 %v3141_v37  ;;  %1062 = vmatpush1.msra.mxu1 %v3144_v61 }
 0x384   :  { %992 = vmatprep.subr.mxu0 %v3147_v21  ;;  %1063 = vmatprep.subr.mxu1 %v3150_v23 }
 0x385   :  { %993 = vmatpush1.msra.mxu0 %v3153_v25  ;;  %1064 = vmatpush1.msra.mxu1 %v3156_v29 }
 0x386   :  { %994 = vmatprep.subr.mxu0 %v3159_v31  ;;  %1065 = vmatprep.subr.mxu1 %v3162_v32 }
 0x387   :  { %995 = vmatpush1.msra.mxu0 %v3165_v33  ;;  %1066 = vmatpush1.msra.mxu1 %v3168_v35 }
 0x388   :  { %996 = vmatprep.subr.mxu0 %v3171_v36  ;;  %1067 = vmatprep.subr.mxu1 %v3174_v38 }
 0x389   :  { %997 = vmatpush1.msra.mxu0 %v3177_v40  ;;  %1068 = vmatpush1.msra.mxu1 %v3180_v42 }
 0x38a   :  { %998 = vmatprep.subr.mxu0 %v3183_v44  ;;  %1069 = vmatprep.subr.mxu1 %v3186_v46 }
 0x38b   :  { %999 = vmatpush1.msra.mxu0 %v3189_v8  ;;  %1070 = vmatpush1.msra.mxu1 %v3192_v50 }
 0x38c   :  { %1000 = vmatprep.subr.mxu0 %v3195_v59  ;;  %1071 = vmatprep.subr.mxu1 %v3198_v0 }
 0x38d   :  { %1001 = vmatpush1.msra.mxu0 %v3201_v60  ;;  %1072 = vmatpush1.msra.mxu1 %v3204_v63 }
 0x38e   :  { %1002 = vmatprep.subr.mxu0 %v3207_v51  ;;  %1073 = vmatprep.subr.mxu1 %v3210_v56 }
 0x38f   :  { %1003 = vmatpush1.msra.mxu0 %v3213_v45  ;;  %1074 = vmatpush1.msra.mxu1 %v3216_v57 }
 0x390   :  { %1004 = vmatprep.subr.mxu0 %v3219_v47  ;;  %1075 = vmatprep.subr.mxu1 %v3222_v1 }
 0x391   :  { %1005 = vmatpush1.msra.mxu0 %v3225_v2  ;;  %1076 = vmatpush1.msra.mxu1 %v3228_v3 }
 0x392   :  { %1006 = vmatprep.subr.mxu0 %v3231_v4  ;;  %1077 = vmatprep.subr.mxu1 %v3234_v5 }
 0x393   :  { %1007 = vmatpush1.msra.mxu0 %v3237_v9  ;;  %1078 = vmatpush1.msra.mxu1 %v3240_v10 }
 0x394   :  { %1008 = vmatprep.subr.mxu0 %v3243_v62  ;;  %1079 = vmatprep.subr.mxu1 %v5102_v22 }
 0x395   :  { %1009 = vmatpush1.msra.mxu0 %v5103_v12  ;;  %1080 = vmatpush1.msra.mxu1 %v5104_v11 }
 0x396   :  { %1010 = vmatprep.subr.mxu0 %v5105_v24  ;;  %1081 = vmatprep.subr.mxu1 %v5106_v27 }
 0x397   :  { %1011 = vmatpush1.msra.mxu0 %v5107_v7  ;;  %1082 = vmatpush1.msra.mxu1 %v5108_v58  ;;  %v5119_v58 = vld [vmem:[#allocation38_spill] sm:$0xff] }
 0x398   :  { %1012 = vmatprep.subr.mxu0 %v5109_v26  ;;  %1083 = vmatprep.subr.mxu1 %v5110_v6  ;;  %v5120_v26 = vld [vmem:[#allocation49_spill] sm:$0xff]  ;;  %v5121_v6 = vld [vmem:[#allocation40_spill] sm:$0xff] }
 0x399   :  { %1013 = vmatpush1.msra.mxu0 %v5111_v55  ;;  %1084 = vmatpush1.msra.mxu1 %v5112_v34  ;;  %v5122_v55 = vld [vmem:[#allocation51_spill] sm:$0xff]  ;;  %v5123_v34 = vld [vmem:[#allocation42_spill] sm:$0xff] }
 0x39a   :  { %1014 = vmatprep.subr.mxu0 %v5113_v52  ;;  %1085 = vmatprep.subr.mxu1 %v5114_v49  ;;  %v5124_v52 = vld [vmem:[#allocation53_spill] sm:$0xff]  ;;  %v5125_v49 = vld [vmem:[#allocation44_spill] sm:$0xff] }
 0x39b   :  { %1015 = vmatpush1.msra.mxu0 %v5115_v54  ;;  %1086 = vmatpush1.msra.mxu1 %v5116_v13  ;;  %v5126_v54 = vld [vmem:[#allocation55_spill] sm:$0xff]  ;;  %v5127_v13 = vld [vmem:[#allocation46_spill] sm:$0xff] }
 0x39c   :  { %1016 = vmatprep.subr.mxu0 %v5117_v20  ;;  %1087 = vmatprep.subr.mxu1 %v5118_v19  ;;  %v5128_v20 = vld [vmem:[#allocation57_spill] sm:$0xff]  ;;  %v5129_v19 = vld [vmem:[#allocation48_spill] sm:$0xff] }
 0x39d   :  { %1017 = vmatpush1.msra.mxu0 %v5119_v58  ;;  %1088 = vmatpush1.msra.mxu1 %v5120_v26  ;;  %v5130_v58 = vld [vmem:[#allocation59_spill] sm:$0xff]  ;;  %v5131_v26 = vld [vmem:[#allocation50_spill] sm:$0xff] }
 0x39e   :  { %1018 = vmatprep.subr.mxu0 %v5121_v6  ;;  %1089 = vmatprep.subr.mxu1 %v5122_v55  ;;  %v5132_v6 = vld [vmem:[#allocation61_spill] sm:$0xff]  ;;  %v5133_v55 = vld [vmem:[#allocation52_spill] sm:$0xff] }
 0x39f   :  { %1019 = vmatpush2.msra.mxu0 %v5123_v34  ;;  %1090 = vmatpush2.msra.mxu1 %v5124_v52  ;;  %v5134_v34 = vld [vmem:[#allocation63_spill] sm:$0xff]  ;;  %v5135_v52 = vld [vmem:[#allocation54_spill] sm:$0xff] }
 0x3a0   :  { %1020 = vmatprep.subr.mxu0 %v5125_v49  ;;  %1091 = vmatprep.subr.mxu1 %v5126_v54  ;;  %v5136_v49 = vld [vmem:[#allocation65_spill] sm:$0xff]  ;;  %v5137_v54 = vld [vmem:[#allocation56_spill] sm:$0xff] }
 0x3a1   :  { %1021 = vmatpush2.msra.mxu0 %v5127_v13  ;;  %1092 = vmatpush2.msra.mxu1 %v5128_v20  ;;  %v5138_v13 = vld [vmem:[#allocation67_spill] sm:$0xff]  ;;  %v5139_v20 = vld [vmem:[#allocation58_spill] sm:$0xff] }
 0x3a2   :  { %1022 = vmatprep.subr.mxu0 %v5129_v19  ;;  %1093 = vmatprep.subr.mxu1 %v5130_v58  ;;  %v5140_v19 = vld [vmem:[#allocation69_spill] sm:$0xff]  ;;  %v5141_v58 = vld [vmem:[#allocation60_spill] sm:$0xff] }
 0x3a3   :  { %1023 = vmatpush2.msra.mxu0 %v5131_v26  ;;  %1094 = vmatpush2.msra.mxu1 %v5132_v6  ;;  %v5142_v26 = vld [vmem:[#allocation71_spill] sm:$0xff]  ;;  %v5143_v6 = vld [vmem:[#allocation62_spill] sm:$0xff] }
 0x3a4   :  { %1024 = vmatprep.subr.mxu0 %v5133_v55  ;;  %1095 = vmatprep.subr.mxu1 %v5134_v34  ;;  %v5144_v55 = vld [vmem:[#allocation73_spill] sm:$0xff]  ;;  %v5145_v34 = vld [vmem:[#allocation64_spill] sm:$0xff] }
 0x3a5   :  { %1025 = vmatpush2.msra.mxu0 %v5135_v52  ;;  %1096 = vmatpush2.msra.mxu1 %v5136_v49  ;;  %v5146_v52 = vld [vmem:[#allocation75_spill] sm:$0xff]  ;;  %v5147_v49 = vld [vmem:[#allocation66_spill] sm:$0xff] }
 0x3a6   :  { %1026 = vmatprep.subr.mxu0 %v5137_v54  ;;  %1097 = vmatprep.subr.mxu1 %v5138_v13  ;;  %v5148_v54 = vld [vmem:[#allocation77_spill] sm:$0xff]  ;;  %v5149_v13 = vld [vmem:[#allocation68_spill] sm:$0xff] }
 0x3a7   :  { %1027 = vmatpush2.msra.mxu0 %v5139_v20  ;;  %1098 = vmatpush2.msra.mxu1 %v5140_v19  ;;  %v5150_v20 = vld [vmem:[#allocation79_spill] sm:$0xff]  ;;  %v5151_v19 = vld [vmem:[#allocation70_spill] sm:$0xff] }
 0x3a8   :  { %1028 = vmatprep.subr.mxu0 %v5141_v58  ;;  %1099 = vmatprep.subr.mxu1 %v5142_v26  ;;  %v5152_v58 = vld [vmem:[#allocation82_spill] sm:$0xff]  ;;  %v5153_v26 = vld [vmem:[#allocation72_spill] sm:$0xff] }
 0x3a9   :  { %1029 = vmatpush2.msra.mxu0 %v5143_v6  ;;  %1100 = vmatpush2.msra.mxu1 %v5144_v55  ;;  %v5154_v6 = vld [vmem:[#allocation84_spill] sm:$0xff]  ;;  %v5155_v55 = vld [vmem:[#allocation74_spill] sm:$0xff] }
 0x3aa   :  { %1030 = vmatprep.subr.mxu0 %v5145_v34  ;;  %1101 = vmatprep.subr.mxu1 %v5146_v52  ;;  %v5156_v34 = vld [vmem:[#allocation76_spill] sm:$0xff] }
 0x3ab   :  { %1031 = vmatpush2.msra.mxu0 %v5147_v49  ;;  %1102 = vmatpush2.msra.mxu1 %v5148_v54  ;;  %v5157_v52 = vld [vmem:[#allocation88_spill] sm:$0xff]  ;;  %v5158_v49 = vld [vmem:[#allocation78_spill] sm:$0xff] }
 0x3ac   :  { %1032 = vmatprep.subr.mxu0 %v5149_v13  ;;  %1103 = vmatprep.subr.mxu1 %v5150_v20  ;;  %v5159_v54 = vld [vmem:[#allocation80_spill] sm:$0xff]  ;;  %v5160_v13 = vld [vmem:[#allocation81_spill] sm:$0xff]  ;;  %v5161_v20 = vld [vmem:[#allocation83_spill] sm:$0xff] }
 0x3ad   :  { %1033 = vmatpush2.msra.mxu0 %v5151_v19  ;;  %1104 = vmatpush2.msra.mxu1 %v5152_v58  ;;  %v5162_v19 = vld [vmem:[#allocation85_spill] sm:$0xff] }
 0x3ae   :  { %1034 = vmatprep.subr.mxu0 %v5153_v26  ;;  %1105 = vmatprep.subr.mxu1 %v5154_v6  ;;  %v5163_v58 = vld [vmem:[#allocation97_spill] sm:$0xff]  ;;  %v5164_v26 = vld [vmem:[#allocation87_spill] sm:$0xff] }
 0x3af   :  { %1035 = vmatpush2.msra.mxu0 %v5155_v55  ;;  %1106 = vmatpush2.msra.mxu1 %v5156_v34  ;;  %v5165_v6 = vld [vmem:[#allocation99_spill] sm:$0xff]  ;;  %v5166_v55 = vld [vmem:[#allocation89_spill] sm:$0xff] }
 0x3b0   :  { %1036 = vmatprep.subr.mxu0 %v5157_v52  ;;  %1107 = vmatprep.subr.mxu1 %v5158_v49  ;;  %v5167_v34 = vld [vmem:[#allocation101_spill] sm:$0xff]  ;;  %v5168_v52 = vld [vmem:[#allocation91_spill] sm:$0xff]  ;;  %v5169_v49 = vld [vmem:[#allocation102_spill] sm:$0xff] }
 0x3b1   :  { %1037 = vmatpush2.msra.mxu0 %v5159_v54  ;;  %1108 = vmatpush2.msra.mxu1 %v5160_v13  ;;  %v5170_v54 = vld [vmem:[#allocation93_spill] sm:$0xff]  ;;  %v5171_v13 = vld [vmem:[#allocation103_spill] sm:$0xff] }
 0x3b2   :  { %1038 = vmatprep.subr.mxu0 %v5161_v20  ;;  %1109 = vmatprep.subr.mxu1 %v5162_v19  ;;  %v5172_v20 = vld [vmem:[#allocation95_spill] sm:$0xff]  ;;  %v5173_v19 = vld [vmem:[#allocation104_spill] sm:$0xff] }
 0x3b3   :  { %1039 = vmatpush2.msra.mxu0 %v5163_v58  ;;  %1110 = vmatpush2.msra.mxu1 %v5164_v26  ;;  %v5174_v58 = vld [vmem:[#allocation96_spill] sm:$0xff]  ;;  %v5175_v26 = vld [vmem:[#allocation105_spill] sm:$0xff] }
 0x3b4   :  { %1040 = vmatprep.subr.mxu0 %v5165_v6  ;;  %1111 = vmatprep.subr.mxu1 %v5166_v55  ;;  %v3625_v6 = vld [vmem:[#allocation11 + $0x250] sm:$0xff] }
 0x3b5   :  { %1041 = vmatpush2.msra.mxu0 %v5167_v34  ;;  %1112 = vmatpush2.msra.mxu1 %v5168_v52  ;;  %5176 = vst [vmem:[#allocation31_spill] sm:$0xff] %v3625_v6  ;;  %v5177_v34 = vld [vmem:[#allocation98_spill] sm:$0xff]  ;;  %v3629_v52 = vld [vmem:[#allocation11 + $0x238] sm:$0xff] }
 0x3b6   :  { %1042 = vmatprep.subr.mxu0 %v5169_v49  ;;  %1113 = vmatprep.subr.mxu1 %v5170_v54  ;;  %5178 = vst [vmem:[#allocation25_spill] sm:$0xff] %v3629_v52  ;;  %v5179_v54 = vld [vmem:[#allocation106_spill] sm:$0xff] }
 0x3b7   :  { %1043 = vmatpush2.msra.mxu0 %v5171_v13  ;;  %1114 = vmatpush2.msra.mxu1 %v5172_v20  ;;  %v3633_v13 = vld [vmem:[#allocation11 + $0x230] sm:$0xff] }
 0x3b8   :  { %1044 = vmatprep.subr.mxu0 %v5173_v19  ;;  %1115 = vmatprep.subr.mxu1 %v5174_v58  ;;  %5180 = vst [vmem:[#allocation109_spill] sm:$0xff] %v3633_v13  ;;  %v5181_v19 = vld [vmem:[#allocation100_spill] sm:$0xff] }
 0x3b9   :  { %1045 = vmatpush2.msra.mxu0 %v5175_v26  ;;  %1116 = vmatpush2.msra.mxu1 %v3625_v6  ;;  %v3637_v58 = vld [vmem:[#allocation11 + $0x218] sm:$0xff]  ;;  %v5183_v26 = vld [vmem:[#allocation107_spill] sm:$0xff] }
 0x3ba   :  { %1046 = vmatprep.subr.mxu0 %v5177_v34  ;;  %1117 = vmatprep.subr.mxu1 %v3629_v52  ;;  %5182 = vst [vmem:[#allocation110_spill] sm:$0xff] %v3637_v58  ;;  %v3641_v6 = vld [vmem:[#allocation11 + $0x210] sm:$0xff]  ;;  %v5185_v34 = vld [vmem:[#allocation94_spill] sm:$0xff] }
 0x3bb   :  { %1047 = vmatpush2.msra.mxu0 %v5179_v54  ;;  %1118 = vmatpush2.msra.mxu1 %v3633_v13  ;;  %5184 = vst [vmem:[#allocation111_spill] sm:$0xff] %v3641_v6  ;;  %v5186_v52 = vld [vmem:[#allocation23_spill] sm:$0xff] }
 0x3bc   :  { %1048 = vmatprep.subr.mxu0 %v5181_v19  ;;  %1119 = vmatprep.subr.mxu1 %v3637_v58  ;;  %v5187_v19 = vld [vmem:[#allocation90_spill] sm:$0xff] }
 0x3bd   :  { %1049 = vmatpush2.msra.mxu0 %v5183_v26  ;;  %1120 = vmatpush2.msra.mxu1 %v3641_v6 }
 0x3be   :  { %1170 = vmatprep.subr.mxu0 %v5185_v34  ;;  %1241 = vmatprep.subr.mxu1 %v5186_v52 }
 0x43e   :  { %v868_v54 = vpop.f32.mrf.mxu0  ;;  %v939_v58 = vpop.f32.mrf.mxu1 }
 0x43f   :  { %v869_v20 = vadd.f32 %v868_v54, %v5017_v30  ;;  %v940_v6 = vadd.f32 %v939_v58, %v2943_v48  ;;  %v974_v58 = vstv %s1771_s11 }
 0x440   :  { %v870_v13 = vpop.f32.mrf.mxu0  ;;  %v941_v26 = vpop.f32.mrf.mxu1 }
 0x441   :  { %v1768_v49 = vmul.f32 -1.442695, %v869_v20  ;;  %v871_v55 = vadd.f32 %v870_v13, %v5187_v19  ;;  %v942_v27 = vadd.f32 %v941_v26, %v2941_v43 }
 0x443   :  { %1858 = vpow2.f32 %v1768_v49  ;;  %v1769_v7 = vmul.f32 -1.442695, %v871_v55  ;;  %v1770_v24 = vmul.f32 -1.442695, %v942_v27  ;;  %v5188_v27 = vld [vmem:[#allocation29_spill] sm:$0xff] }
 0x445   :  { %1860 = vpow2.f32 %v1769_v7 }
 0x446   :  { %1862 = vtanh.f32 %v940_v6 }
 0x447   :  { %1864 = vpow2.f32 %v1770_v24 }
 0x450   :  { %v1859_v34 = vpop.eup %1858 }
 0x451   :  { %v947_v11 = vadd.f32 1.0, %v1859_v34 }
 0x452   :  { %v1861_v52 = vpop.eup %1860 }
 0x453   :  { %1866 = vrcp.f32 %v947_v11  ;;  %v953_v54 = vadd.f32 1.0, %v1861_v52  ;;  %v1863_v13 = vpop.eup %1862  ;;  %v5189_v11 = vld [vmem:[#allocation24_spill] sm:$0xff] }
 0x454   :  { %v1865_v20 = vpop.eup %1864 }
 0x455   :  { %1868 = vrcp.f32 %v953_v54  ;;  %v960_v7 = vadd.f32 1.0, %v1865_v20  ;;  %v4698_v54 = vstv %s3655_s12 }
 0x456   :  { %1870 = vtanh.f32 %v5188_v27  ;;  %v985_v27 = vld [vmem:[#allocation4 + $0x20] sm:$0xff] }
 0x457   :  { %1872 = vrcp.f32 %v960_v7 }
 0x460   :  { %v1867_v55 = vpop.eup %1866 }
 0x461   :  { %v964_v26 = vmul.f32 %v1867_v55, %v1863_v13 }
 0x462   :  { %v1869_v49 = vpop.eup %1868 }
 0x463   :  { %v963_v19 = vmul.f32 %v1869_v49, %v3494_v28  ;;  %v1871_v52 = vpop.eup %1870  ;;  %v5190_v49 = vstv %s3106_s8 }
 0x464   :  { %v1873_v20 = vpop.eup %1872  ;;  %v978_v7 = vmul.f32 %v1871_v52, %v5190_v49  ;;  %v5240_v52 = vld [vmem:[#allocation72_spill] sm:$0xff] }
 0x465   :  { %v965_v34 = vadd.f32 %v964_v26, %v963_v19  ;;  %v5244_v49 = vld [vmem:[#allocation88_spill] sm:$0xff] }
 0x467   :  { %1874 = vtanh.f32 %v965_v34  ;;  %v980_v24 = vmul.f32 %v974_v58, %v965_v34  ;;  %v5237_v34 = vld [vmem:[#allocation79_spill] sm:$0xff] }
 0x469   :  { %v3653_v6 = vadd.f32 %v5189_v11, %v980_v24  ;;  %v5238_v24 = vld [vmem:[#allocation70_spill] sm:$0xff] }
 0x46a   :  { %v5239_v11 = vld [vmem:[#allocation82_spill] sm:$0xff] }
 0x474   :  { %v1875_v28 = vpop.eup %1874 }
 0x475   :  { %v3658_v13 = vmul.f32 %v1875_v28, %v1873_v20  ;;  %v3662_v55 = vmul.f32 %v1875_v28, %v4698_v54  ;;  %v5241_v20 = vld [vmem:[#allocation84_spill] sm:$0xff]  ;;  %v5242_v28 = vld [vmem:[#allocation74_spill] sm:$0xff] }
 0x476   :  { %v3961_v54 = vld [vmem:[#allocation11 + $0x78] sm:$0xff] }
 0x477   :  { %v975_v19 = vmul.f32 %v974_v58, %v3658_v13  ;;  %v5236_v58 = vld [vmem:[#allocation68_spill] sm:$0xff] }
 0x479   :  { %v979_v26 = vadd.f32 %v978_v7, %v975_v19  ;;  %v5243_v19 = vld [vmem:[#allocation76_spill] sm:$0xff]  ;;  %v5245_v7 = vld [vmem:[#allocation78_spill] sm:$0xff] }
 0x47b   :  { %1050 = vmatprep.mubr.f32.mxu0 %v979_v26  ;;  %1121 = vmatprep.mubr.f32.mxu1 %v979_v26  ;;  %v5246_v26 = vld [vmem:[#allocation80_spill] sm:$0xff] }
 0x47c   :  { %1051 = vmatmul.mubr.f32.vlgmr.msra.gmra.mxu0 %v985_v27  ;;  %1122 = vmatmul.mubr.f32.vlgmr.msra.gmra.mxu1 %v985_v27  ;;  %v5247_v27 = vld [vmem:[#allocation81_spill] sm:$0xff] }
 0x47d   :  { %1171 = vmatpush1.msra.mxu0 %v3117_v14  ;;  %1242 = vmatpush1.msra.mxu1 %v3120_v15  ;;  %v5191_v14 = vld [vmem:[#allocation33_spill] sm:$0xff]  ;;  %v5192_v15 = vld [vmem:[#allocation26_spill] sm:$0xff] }
 0x47e   :  { %1172 = vmatprep.subr.mxu0 %v3123_v53  ;;  %1243 = vmatprep.subr.mxu1 %v3126_v16  ;;  %v5193_v53 = vld [vmem:[#allocation35_spill] sm:$0xff] }
 0x47f   :  { %1173 = vmatpush1.msra.mxu0 %v3129_v41  ;;  %1244 = vmatpush1.msra.mxu1 %v3132_v17  ;;  %v5194_v16 = vld [vmem:[#allocation27_spill] sm:$0xff]  ;;  %v5195_v41 = vld [vmem:[#allocation37_spill] sm:$0xff]  ;;  %v5196_v17 = vld [vmem:[#allocation28_spill] sm:$0xff]  ;;  %5282 = vst [vmem:[#allocation35_spill] sm:$0xff] %v3961_v54 }
 0x480   :  { %1174 = vmatprep.subr.mxu0 %v3135_v39  ;;  %1245 = vmatprep.subr.mxu1 %v3138_v18  ;;  %v5197_v39 = vld [vmem:[#allocation39_spill] sm:$0xff]  ;;  %v5198_v18 = vld [vmem:[#allocation30_spill] sm:$0xff] }
 0x481   :  { %1175 = vmatpush1.msra.mxu0 %v3141_v37  ;;  %1246 = vmatpush1.msra.mxu1 %v3144_v61  ;;  %v5199_v37 = vld [vmem:[#allocation41_spill] sm:$0xff]  ;;  %v5200_v61 = vld [vmem:[#allocation32_spill] sm:$0xff] }
 0x482   :  { %1176 = vmatprep.subr.mxu0 %v3147_v21  ;;  %1247 = vmatprep.subr.mxu1 %v3150_v23  ;;  %v5201_v21 = vld [vmem:[#allocation43_spill] sm:$0xff]  ;;  %v5202_v23 = vld [vmem:[#allocation34_spill] sm:$0xff] }
 0x483   :  { %1177 = vmatpush1.msra.mxu0 %v3153_v25  ;;  %1248 = vmatpush1.msra.mxu1 %v3156_v29  ;;  %v5203_v25 = vld [vmem:[#allocation45_spill] sm:$0xff]  ;;  %v5204_v29 = vld [vmem:[#allocation36_spill] sm:$0xff] }
 0x484   :  { %1178 = vmatprep.subr.mxu0 %v3159_v31  ;;  %1249 = vmatprep.subr.mxu1 %v3162_v32  ;;  %v5205_v31 = vld [vmem:[#allocation47_spill] sm:$0xff]  ;;  %v5206_v32 = vld [vmem:[#allocation38_spill] sm:$0xff] }
 0x485   :  { %1179 = vmatpush1.msra.mxu0 %v3165_v33  ;;  %1250 = vmatpush1.msra.mxu1 %v3168_v35  ;;  %v5207_v33 = vld [vmem:[#allocation49_spill] sm:$0xff]  ;;  %v5208_v35 = vld [vmem:[#allocation40_spill] sm:$0xff] }
 0x486   :  { %1180 = vmatprep.subr.mxu0 %v3171_v36  ;;  %1251 = vmatprep.subr.mxu1 %v3174_v38  ;;  %v5209_v36 = vld [vmem:[#allocation51_spill] sm:$0xff]  ;;  %v5210_v38 = vld [vmem:[#allocation42_spill] sm:$0xff] }
 0x487   :  { %1181 = vmatpush1.msra.mxu0 %v3177_v40  ;;  %1252 = vmatpush1.msra.mxu1 %v3180_v42  ;;  %v5211_v40 = vld [vmem:[#allocation53_spill] sm:$0xff]  ;;  %v5212_v42 = vld [vmem:[#allocation44_spill] sm:$0xff] }
 0x488   :  { %1182 = vmatprep.subr.mxu0 %v3183_v44  ;;  %1253 = vmatprep.subr.mxu1 %v3186_v46  ;;  %v5213_v44 = vld [vmem:[#allocation55_spill] sm:$0xff]  ;;  %v5214_v46 = vld [vmem:[#allocation46_spill] sm:$0xff] }
 0x489   :  { %1183 = vmatpush1.msra.mxu0 %v3189_v8  ;;  %1254 = vmatpush1.msra.mxu1 %v3192_v50  ;;  %v5215_v8 = vld [vmem:[#allocation57_spill] sm:$0xff]  ;;  %v5216_v50 = vld [vmem:[#allocation48_spill] sm:$0xff] }
 0x48a   :  { %1184 = vmatprep.subr.mxu0 %v3195_v59  ;;  %1255 = vmatprep.subr.mxu1 %v3198_v0  ;;  %v5217_v59 = vld [vmem:[#allocation59_spill] sm:$0xff]  ;;  %v5218_v0 = vld [vmem:[#allocation50_spill] sm:$0xff] }
 0x48b   :  { %1185 = vmatpush1.msra.mxu0 %v3201_v60  ;;  %1256 = vmatpush1.msra.mxu1 %v3204_v63  ;;  %v5219_v60 = vld [vmem:[#allocation61_spill] sm:$0xff]  ;;  %v5220_v63 = vld [vmem:[#allocation52_spill] sm:$0xff] }
 0x48c   :  { %1186 = vmatprep.subr.mxu0 %v3207_v51  ;;  %1257 = vmatprep.subr.mxu1 %v3210_v56  ;;  %v5221_v51 = vld [vmem:[#allocation63_spill] sm:$0xff]  ;;  %v5222_v56 = vld [vmem:[#allocation54_spill] sm:$0xff] }
 0x48d   :  { %1187 = vmatpush1.msra.mxu0 %v3213_v45  ;;  %1258 = vmatpush1.msra.mxu1 %v3216_v57  ;;  %v5223_v45 = vld [vmem:[#allocation65_spill] sm:$0xff]  ;;  %v5224_v57 = vld [vmem:[#allocation56_spill] sm:$0xff] }
 0x48e   :  { %1188 = vmatprep.subr.mxu0 %v3219_v47  ;;  %1259 = vmatprep.subr.mxu1 %v3222_v1  ;;  %v5225_v47 = vld [vmem:[#allocation67_spill] sm:$0xff]  ;;  %v5226_v1 = vld [vmem:[#allocation58_spill] sm:$0xff] }
 0x48f   :  { %1189 = vmatpush1.msra.mxu0 %v3225_v2  ;;  %1260 = vmatpush1.msra.mxu1 %v3228_v3  ;;  %v5227_v2 = vld [vmem:[#allocation69_spill] sm:$0xff]  ;;  %v5228_v3 = vld [vmem:[#allocation60_spill] sm:$0xff] }
 0x490   :  { %1190 = vmatprep.subr.mxu0 %v3231_v4  ;;  %1261 = vmatprep.subr.mxu1 %v3234_v5  ;;  %v5229_v4 = vld [vmem:[#allocation71_spill] sm:$0xff]  ;;  %v5230_v5 = vld [vmem:[#allocation62_spill] sm:$0xff] }
 0x491   :  { %1191 = vmatpush1.msra.mxu0 %v3237_v9  ;;  %1262 = vmatpush1.msra.mxu1 %v3240_v10  ;;  %v5231_v9 = vld [vmem:[#allocation73_spill] sm:$0xff]  ;;  %v5232_v10 = vld [vmem:[#allocation64_spill] sm:$0xff] }
 0x492   :  { %1192 = vmatprep.subr.mxu0 %v3243_v62  ;;  %1263 = vmatprep.subr.mxu1 %v5102_v22  ;;  %v5233_v62 = vld [vmem:[#allocation75_spill] sm:$0xff]  ;;  %v5234_v22 = vld [vmem:[#allocation66_spill] sm:$0xff] }
 0x493   :  { %1193 = vmatpush1.msra.mxu0 %v5103_v12  ;;  %1264 = vmatpush1.msra.mxu1 %v5191_v14  ;;  %v5235_v12 = vld [vmem:[#allocation77_spill] sm:$0xff]  ;;  %v5248_v14 = vld [vmem:[#allocation83_spill] sm:$0xff] }
 0x494   :  { %1194 = vmatprep.subr.mxu0 %v5192_v15  ;;  %1265 = vmatprep.subr.mxu1 %v5193_v53  ;;  %v5249_v15 = vld [vmem:[#allocation85_spill] sm:$0xff] }
 0x495   :  { %1195 = vmatpush1.msra.mxu0 %v5194_v16  ;;  %1266 = vmatpush1.msra.mxu1 %v5195_v41  ;;  %v5250_v53 = vld [vmem:[#allocation97_spill] sm:$0xff]  ;;  %v5251_v16 = vld [vmem:[#allocation87_spill] sm:$0xff] }
 0x496   :  { %1196 = vmatprep.subr.mxu0 %v5196_v17  ;;  %1267 = vmatprep.subr.mxu1 %v5197_v39  ;;  %v5252_v41 = vld [vmem:[#allocation99_spill] sm:$0xff]  ;;  %v5253_v17 = vld [vmem:[#allocation89_spill] sm:$0xff] }
 0x497   :  { %1197 = vmatpush1.msra.mxu0 %v5198_v18  ;;  %1268 = vmatpush1.msra.mxu1 %v5199_v37  ;;  %v5254_v39 = vld [vmem:[#allocation101_spill] sm:$0xff]  ;;  %v5255_v18 = vld [vmem:[#allocation91_spill] sm:$0xff]  ;;  %v5256_v37 = vld [vmem:[#allocation102_spill] sm:$0xff] }
 0x498   :  { %1198 = vmatprep.subr.mxu0 %v5200_v61  ;;  %1269 = vmatprep.subr.mxu1 %v5201_v21  ;;  %v5257_v61 = vld [vmem:[#allocation93_spill] sm:$0xff]  ;;  %v5258_v21 = vld [vmem:[#allocation103_spill] sm:$0xff] }
 0x499   :  { %1199 = vmatpush1.msra.mxu0 %v5202_v23  ;;  %1270 = vmatpush1.msra.mxu1 %v5203_v25  ;;  %v5259_v23 = vld [vmem:[#allocation95_spill] sm:$0xff]  ;;  %v5260_v25 = vld [vmem:[#allocation104_spill] sm:$0xff] }
 0x49a   :  { %1200 = vmatprep.subr.mxu0 %v5204_v29  ;;  %1271 = vmatprep.subr.mxu1 %v5205_v31  ;;  %v5261_v29 = vld [vmem:[#allocation96_spill] sm:$0xff]  ;;  %v5262_v31 = vld [vmem:[#allocation105_spill] sm:$0xff] }
 0x49b   :  { %1201 = vmatpush1.msra.mxu0 %v5206_v32  ;;  %1272 = vmatpush1.msra.mxu1 %v5207_v33  ;;  %v5263_v32 = vld [vmem:[#allocation31_spill] sm:$0xff]  ;;  %v5264_v33 = vld [vmem:[#allocation98_spill] sm:$0xff] }
 0x49c   :  { %1202 = vmatprep.subr.mxu0 %v5208_v35  ;;  %1273 = vmatprep.subr.mxu1 %v5209_v36  ;;  %v5265_v35 = vld [vmem:[#allocation25_spill] sm:$0xff]  ;;  %v5266_v36 = vld [vmem:[#allocation106_spill] sm:$0xff] }
 0x49d   :  { %1203 = vmatpush2.msra.mxu0 %v5210_v38  ;;  %1274 = vmatpush2.msra.mxu1 %v5211_v40  ;;  %v5267_v38 = vld [vmem:[#allocation109_spill] sm:$0xff]  ;;  %v5268_v40 = vld [vmem:[#allocation100_spill] sm:$0xff] }
 0x49e   :  { %1204 = vmatprep.subr.mxu0 %v5212_v42  ;;  %1275 = vmatprep.subr.mxu1 %v5213_v44  ;;  %v5269_v42 = vld [vmem:[#allocation110_spill] sm:$0xff]  ;;  %v5270_v44 = vld [vmem:[#allocation107_spill] sm:$0xff] }
 0x49f   :  { %1205 = vmatpush2.msra.mxu0 %v5214_v46  ;;  %1276 = vmatpush2.msra.mxu1 %v5215_v8  ;;  %v5271_v46 = vld [vmem:[#allocation111_spill] sm:$0xff]  ;;  %v3793_v8 = vld [vmem:[#allocation11 + $0x1e8] sm:$0xff] }
 0x4a0   :  { %1206 = vmatprep.subr.mxu0 %v5216_v50  ;;  %1277 = vmatprep.subr.mxu1 %v5217_v59  ;;  %v3796_v50 = vld [vmem:[#allocation11 + $0x1f8] sm:$0xff] }
 0x4a1   :  { %1207 = vmatpush2.msra.mxu0 %v5218_v0  ;;  %1278 = vmatpush2.msra.mxu1 %v5219_v60 }
 0x4a2   :  { %1208 = vmatprep.subr.mxu0 %v5220_v63  ;;  %1279 = vmatprep.subr.mxu1 %v5221_v51  ;;  %v5272_v51 = vld [vmem:[#allocation90_spill] sm:$0xff] }
 0x4a3   :  { %1209 = vmatpush2.msra.mxu0 %v5222_v56  ;;  %1280 = vmatpush2.msra.mxu1 %v5223_v45 }
 0x4a4   :  { %1210 = vmatprep.subr.mxu0 %v5224_v57  ;;  %1281 = vmatprep.subr.mxu1 %v5225_v47 }
 0x4a5   :  { %1211 = vmatpush2.msra.mxu0 %v5226_v1  ;;  %1282 = vmatpush2.msra.mxu1 %v5227_v2 }
 0x4a6   :  { %1212 = vmatprep.subr.mxu0 %v5228_v3  ;;  %1283 = vmatprep.subr.mxu1 %v5229_v4 }
 0x4a7   :  { %1213 = vmatpush2.msra.mxu0 %v5230_v5  ;;  %1284 = vmatpush2.msra.mxu1 %v5231_v9 }
 0x4a8   :  { %1214 = vmatprep.subr.mxu0 %v5232_v10  ;;  %1285 = vmatprep.subr.mxu1 %v5233_v62 }
 0x4a9   :  { %1215 = vmatpush2.msra.mxu0 %v5234_v22  ;;  %1286 = vmatpush2.msra.mxu1 %v5235_v12 }
 0x4aa   :  { %1216 = vmatprep.subr.mxu0 %v5236_v58  ;;  %1287 = vmatprep.subr.mxu1 %v5237_v34 }
 0x4ab   :  { %1217 = vmatpush2.msra.mxu0 %v5238_v24  ;;  %1288 = vmatpush2.msra.mxu1 %v5239_v11 }
 0x4ac   :  { %1218 = vmatprep.subr.mxu0 %v5240_v52  ;;  %1289 = vmatprep.subr.mxu1 %v5241_v20  ;;  %v1158_v52 = vstv %s1776_s13  ;;  %v5273_v20 = vld [vmem:[#allocation86_spill] sm:$0xff] }
 0x4ad   :  { %1219 = vmatpush2.msra.mxu0 %v5242_v28  ;;  %1290 = vmatpush2.msra.mxu1 %v5243_v19 }
 0x4ae   :  { %1220 = vmatprep.subr.mxu0 %v5244_v49  ;;  %1291 = vmatprep.subr.mxu1 %v5245_v7  ;;  %v5274_v49 = vld [vmem:[#allocation108_spill] sm:$0xff] }
 0x4af   :  { %1221 = vmatpush2.msra.mxu0 %v5246_v26  ;;  %1292 = vmatpush2.msra.mxu1 %v5247_v27  ;;  %v4697_v27 = vstv %s3808_s14 }
 0x4b0   :  { %1222 = vmatprep.subr.mxu0 %v5248_v14  ;;  %1293 = vmatprep.subr.mxu1 %v5249_v15 }
 0x4b1   :  { %1223 = vmatpush2.msra.mxu0 %v5250_v53  ;;  %1294 = vmatpush2.msra.mxu1 %v5251_v16 }
 0x4b2   :  { %1224 = vmatprep.subr.mxu0 %v5252_v41  ;;  %1295 = vmatprep.subr.mxu1 %v5253_v17  ;;  %v5277_v41 = vstv %s3496_s10 }
 0x4b3   :  { %1225 = vmatpush2.msra.mxu0 %v5254_v39  ;;  %1296 = vmatpush2.msra.mxu1 %v5255_v18  ;;  %v1169_v18 = vld [vmem:[#allocation4 + $0x28] sm:$0xff] }
 0x4b4   :  { %1226 = vmatprep.subr.mxu0 %v5256_v37  ;;  %1297 = vmatprep.subr.mxu1 %v5257_v61  ;;  %v3820_v37 = vld [vmem:[#allocation11 + $0x1e0] sm:$0xff]  ;;  %v3823_v61 = vld [vmem:[#allocation11 + $0x1f0] sm:$0xff] }
 0x4b5   :  { %1227 = vmatpush2.msra.mxu0 %v5258_v21  ;;  %1298 = vmatpush2.msra.mxu1 %v5259_v23  ;;  %v3826_v21 = vld [vmem:[#allocation11 + $0x1c8] sm:$0xff]  ;;  %v3829_v23 = vld [vmem:[#allocation11 + $0x1d8] sm:$0xff] }
 0x4b6   :  { %1228 = vmatprep.subr.mxu0 %v5260_v25  ;;  %1299 = vmatprep.subr.mxu1 %v5261_v29  ;;  %v3832_v25 = vld [vmem:[#allocation11 + $0x1c0] sm:$0xff]  ;;  %v3835_v29 = vld [vmem:[#allocation11 + $0x1d0] sm:$0xff] }
 0x4b7   :  { %1229 = vmatpush2.msra.mxu0 %v5262_v31  ;;  %1300 = vmatpush2.msra.mxu1 %v5263_v32  ;;  %v3838_v31 = vld [vmem:[#allocation11 + $0x1a8] sm:$0xff] }
 0x4b8   :  { %1230 = vmatprep.subr.mxu0 %v5264_v33  ;;  %1301 = vmatprep.subr.mxu1 %v5265_v35  ;;  %v3841_v33 = vld [vmem:[#allocation11 + $0x1b8] sm:$0xff] }
 0x4b9   :  { %1231 = vmatpush2.msra.mxu0 %v5266_v36  ;;  %1302 = vmatpush2.msra.mxu1 %v5267_v38  ;;  %v3844_v36 = vld [vmem:[#allocation11 + $0x1a0] sm:$0xff] }
 0x4ba   :  { %1232 = vmatprep.subr.mxu0 %v5268_v40  ;;  %1303 = vmatprep.subr.mxu1 %v5269_v42  ;;  %v3847_v40 = vld [vmem:[#allocation11 + $0x1b0] sm:$0xff] }
 0x4bb   :  { %1233 = vmatpush2.msra.mxu0 %v5270_v44  ;;  %1304 = vmatpush2.msra.mxu1 %v5271_v46  ;;  %v3850_v44 = vld [vmem:[#allocation11 + $0x188] sm:$0xff] }
 0x4bc   :  { %1354 = vmatprep.subr.mxu0 %v3793_v8  ;;  %1425 = vmatprep.subr.mxu1 %v3796_v50 }
 0x53c   :  { %v1052_v59 = vpop.f32.mrf.mxu0  ;;  %v1123_v57 = vpop.f32.mrf.mxu1 }
 0x53d   :  { %v1053_v0 = vadd.f32 %v1052_v59, %v5017_v30  ;;  %v1124_v2 = vadd.f32 %v1123_v57, %v2943_v48  ;;  %v3853_v59 = vld [vmem:[#allocation11 + $0x198] sm:$0xff]  ;;  %v3871_v57 = vld [vmem:[#allocation11 + $0x170] sm:$0xff] }
 0x53e   :  { %v1054_v60 = vpop.f32.mrf.mxu0  ;;  %v1125_v47 = vpop.f32.mrf.mxu1 }
 0x53f   :  { %v1773_v63 = vmul.f32 -1.442695, %v1053_v0  ;;  %v1055_v56 = vadd.f32 %v1054_v60, %v5272_v51  ;;  %v1126_v1 = vadd.f32 %v1125_v47, %v2941_v43  ;;  %v3856_v0 = vld [vmem:[#allocation11 + $0x180] sm:$0xff]  ;;  %v3859_v60 = vld [vmem:[#allocation11 + $0x190] sm:$0xff]  ;;  %v3874_v47 = vld [vmem:[#allocation11 + $0x148] sm:$0xff] }
 0x541   :  { %1876 = vpow2.f32 %v1773_v63  ;;  %v1774_v45 = vmul.f32 -1.442695, %v1055_v56  ;;  %v1775_v3 = vmul.f32 -1.442695, %v1126_v1  ;;  %v3862_v63 = vld [vmem:[#allocation11 + $0x168] sm:$0xff]  ;;  %v3865_v56 = vld [vmem:[#allocation11 + $0x178] sm:$0xff] }
 0x542   :  { %v3877_v1 = vld [vmem:[#allocation11 + $0x158] sm:$0xff] }
 0x543   :  { %1878 = vpow2.f32 %v1774_v45  ;;  %v3868_v45 = vld [vmem:[#allocation11 + $0x160] sm:$0xff] }
 0x544   :  { %1880 = vtanh.f32 %v1124_v2  ;;  %v3880_v2 = vld [vmem:[#allocation11 + $0x140] sm:$0xff] }
 0x545   :  { %1882 = vpow2.f32 %v1775_v3  ;;  %v3883_v3 = vld [vmem:[#allocation11 + $0x150] sm:$0xff] }
 0x54e   :  { %v1877_v4 = vpop.eup %1876 }
 0x54f   :  { %v1131_v5 = vadd.f32 1.0, %v1877_v4  ;;  %v3886_v4 = vld [vmem:[#allocation11 + $0x128] sm:$0xff] }
 0x550   :  { %v1879_v9 = vpop.eup %1878 }
 0x551   :  { %1884 = vrcp.f32 %v1131_v5  ;;  %v1137_v10 = vadd.f32 1.0, %v1879_v9  ;;  %v1881_v62 = vpop.eup %1880  ;;  %v3889_v5 = vld [vmem:[#allocation11 + $0x138] sm:$0xff]  ;;  %v3892_v9 = vld [vmem:[#allocation11 + $0x120] sm:$0xff] }
 0x552   :  { %v1883_v22 = vpop.eup %1882 }
 0x553   :  { %1886 = vrcp.f32 %v1137_v10  ;;  %v1144_v34 = vadd.f32 1.0, %v1883_v22  ;;  %v3895_v10 = vld [vmem:[#allocation11 + $0x130] sm:$0xff]  ;;  %v3901_v22 = vld [vmem:[#allocation11 + $0x118] sm:$0xff] }
 0x554   :  { %1888 = vtanh.f32 %v5273_v20  ;;  %v3922_v20 = vld [vmem:[#allocation11 + $0xc8] sm:$0xff] }
 0x555   :  { %1890 = vrcp.f32 %v1144_v34  ;;  %v3910_v34 = vld [vmem:[#allocation11 + $0xe8] sm:$0xff] }
 0x55e   :  { %v1885_v12 = vpop.eup %1884 }
 0x55f   :  { %v1148_v11 = vmul.f32 %v1885_v12, %v1881_v62  ;;  %v3898_v62 = vld [vmem:[#allocation11 + $0x108] sm:$0xff]  ;;  %v3904_v12 = vld [vmem:[#allocation11 + $0x100] sm:$0xff] }
 0x560   :  { %v1887_v58 = vpop.eup %1886 }
 0x561   :  { %v1147_v24 = vmul.f32 %v1887_v58, %v3653_v6  ;;  %v1889_v26 = vpop.eup %1888  ;;  %v3907_v58 = vld [vmem:[#allocation11 + $0x110] sm:$0xff] }
 0x562   :  { %v1891_v14 = vpop.eup %1890  ;;  %v1162_v17 = vmul.f32 %v1889_v26, %v5277_v41  ;;  %v3934_v26 = vld [vmem:[#allocation11 + $0xa8] sm:$0xff] }
 0x563   :  { %v1149_v28 = vadd.f32 %v1148_v11, %v1147_v24  ;;  %v3913_v24 = vld [vmem:[#allocation11 + $0xf8] sm:$0xff]  ;;  %v3916_v11 = vld [vmem:[#allocation11 + $0xe0] sm:$0xff]  ;;  %v3946_v41 = vld [vmem:[#allocation11 + $0x88] sm:$0xff] }
 0x565   :  { %1892 = vtanh.f32 %v1149_v28  ;;  %v1164_v19 = vmul.f32 %v1158_v52, %v1149_v28  ;;  %v3925_v28 = vld [vmem:[#allocation11 + $0xd8] sm:$0xff] }
 0x567   :  { %v3806_v7 = vadd.f32 %v5274_v49, %v1164_v19  ;;  %v3928_v19 = vld [vmem:[#allocation11 + $0xc0] sm:$0xff]  ;;  %v3931_v49 = vld [vmem:[#allocation11 + $0xd0] sm:$0xff] }
 0x572   :  { %v1893_v6 = vpop.eup %1892 }
 0x573   :  { %v3811_v15 = vmul.f32 %v1893_v6, %v1891_v14  ;;  %v3815_v53 = vmul.f32 %v1893_v6, %v4697_v27  ;;  %v3937_v14 = vld [vmem:[#allocation11 + $0xb8] sm:$0xff]  ;;  %v3940_v6 = vld [vmem:[#allocation11 + $0xa0] sm:$0xff]  ;;  %v3958_v27 = vld [vmem:[#allocation11 + $0x68] sm:$0xff] }
 0x574   :  { %5281 = vst [vmem:[#allocation26_spill] sm:$0xff] %v3958_v27 }
 0x575   :  { %5275 = vst [vmem:[#allocation94_spill] sm:$0xff] %v3811_v15  ;;  %5276 = vst [vmem:[#allocation23_spill] sm:$0xff] %v3815_v53  ;;  %v1159_v16 = vmul.f32 %v1158_v52, %v3811_v15  ;;  %v3919_v52 = vld [vmem:[#allocation11 + $0xf0] sm:$0xff]  ;;  %v3964_v53 = vld [vmem:[#allocation11 + $0x60] sm:$0xff] }
 0x576   :  { %5283 = vst [vmem:[#allocation27_spill] sm:$0xff] %v3964_v53  ;;  %v3967_v15 = vld [vmem:[#allocation11 + $0x70] sm:$0xff] }
 0x577   :  { %v1163_v39 = vadd.f32 %v1162_v17, %v1159_v16  ;;  %v3943_v16 = vld [vmem:[#allocation11 + $0xb0] sm:$0xff]  ;;  %v3949_v17 = vld [vmem:[#allocation11 + $0x98] sm:$0xff]  ;;  %5284 = vst [vmem:[#allocation37_spill] sm:$0xff] %v3967_v15 }
 0x578   :  { %5278 = vst [vmem:[#allocation29_spill] sm:$0xff] %v3949_v17 }
 0x579   :  { %1234 = vmatprep.mubr.f32.mxu0 %v1163_v39  ;;  %1305 = vmatprep.mubr.f32.mxu1 %v1163_v39  ;;  %v3952_v39 = vld [vmem:[#allocation11 + $0x80] sm:$0xff] }
 0x57a   :  { %1235 = vmatmul.mubr.f32.vlgmr.msra.gmra.mxu0 %v1169_v18  ;;  %1306 = vmatmul.mubr.f32.vlgmr.msra.gmra.mxu1 %v1169_v18  ;;  %5279 = vst [vmem:[#allocation24_spill] sm:$0xff] %v3952_v39  ;;  %v3955_v18 = vld [vmem:[#allocation11 + $0x90] sm:$0xff] }
 0x57b   :  { %1355 = vmatpush1.msra.mxu0 %v3820_v37  ;;  %1426 = vmatpush1.msra.mxu1 %v3823_v61  ;;  %5280 = vst [vmem:[#allocation33_spill] sm:$0xff] %v3955_v18 }
 0x57c   :  { %1356 = vmatprep.subr.mxu0 %v3826_v21  ;;  %1427 = vmatprep.subr.mxu1 %v3829_v23 }
 0x57d   :  { %1357 = vmatpush1.msra.mxu0 %v3832_v25  ;;  %1428 = vmatpush1.msra.mxu1 %v3835_v29 }
 0x57e   :  { %1358 = vmatprep.subr.mxu0 %v3838_v31  ;;  %1429 = vmatprep.subr.mxu1 %v3841_v33 }
 0x57f   :  { %1359 = vmatpush1.msra.mxu0 %v3844_v36  ;;  %1430 = vmatpush1.msra.mxu1 %v3847_v40 }
 0x580   :  { %1360 = vmatprep.subr.mxu0 %v3850_v44  ;;  %1431 = vmatprep.subr.mxu1 %v3853_v59 }
 0x581   :  { %1361 = vmatpush1.msra.mxu0 %v3856_v0  ;;  %1432 = vmatpush1.msra.mxu1 %v3859_v60 }
 0x582   :  { %1362 = vmatprep.subr.mxu0 %v3862_v63  ;;  %1433 = vmatprep.subr.mxu1 %v3865_v56 }
 0x583   :  { %1363 = vmatpush1.msra.mxu0 %v3868_v45  ;;  %1434 = vmatpush1.msra.mxu1 %v3871_v57 }
 0x584   :  { %1364 = vmatprep.subr.mxu0 %v3874_v47  ;;  %1435 = vmatprep.subr.mxu1 %v3877_v1 }
 0x585   :  { %1365 = vmatpush1.msra.mxu0 %v3880_v2  ;;  %1436 = vmatpush1.msra.mxu1 %v3883_v3 }
 0x586   :  { %1366 = vmatprep.subr.mxu0 %v3886_v4  ;;  %1437 = vmatprep.subr.mxu1 %v3889_v5 }
 0x587   :  { %1367 = vmatpush1.msra.mxu0 %v3892_v9  ;;  %1438 = vmatpush1.msra.mxu1 %v3895_v10 }
 0x588   :  { %1368 = vmatprep.subr.mxu0 %v3898_v62  ;;  %1439 = vmatprep.subr.mxu1 %v3901_v22 }
 0x589   :  { %1369 = vmatpush1.msra.mxu0 %v3904_v12  ;;  %1440 = vmatpush1.msra.mxu1 %v3907_v58 }
 0x58a   :  { %1370 = vmatprep.subr.mxu0 %v3910_v34  ;;  %1441 = vmatprep.subr.mxu1 %v3913_v24 }
 0x58b   :  { %1371 = vmatpush1.msra.mxu0 %v3916_v11  ;;  %1442 = vmatpush1.msra.mxu1 %v3919_v52 }
 0x58c   :  { %1372 = vmatprep.subr.mxu0 %v3922_v20  ;;  %1443 = vmatprep.subr.mxu1 %v3925_v28 }
 0x58d   :  { %1373 = vmatpush1.msra.mxu0 %v3928_v19  ;;  %1444 = vmatpush1.msra.mxu1 %v3931_v49 }
 0x58e   :  { %1374 = vmatprep.subr.mxu0 %v3934_v26  ;;  %1445 = vmatprep.subr.mxu1 %v3937_v14 }
 0x58f   :  { %1375 = vmatpush1.msra.mxu0 %v3940_v6  ;;  %1446 = vmatpush1.msra.mxu1 %v3943_v16 }
 0x590   :  { %1376 = vmatprep.subr.mxu0 %v3946_v41  ;;  %1447 = vmatprep.subr.mxu1 %v3949_v17 }
 0x591   :  { %1377 = vmatpush1.msra.mxu0 %v3952_v39  ;;  %1448 = vmatpush1.msra.mxu1 %v3955_v18  ;;  %v3970_v39 = vld [vmem:[#allocation11 + $0x48] sm:$0xff]  ;;  %v3973_v18 = vld [vmem:[#allocation11 + $0x58] sm:$0xff] }
 0x592   :  { %1378 = vmatprep.subr.mxu0 %v3958_v27  ;;  %1449 = vmatprep.subr.mxu1 %v3961_v54  ;;  %5285 = vst [vmem:[#allocation28_spill] sm:$0xff] %v3970_v39  ;;  %5286 = vst [vmem:[#allocation39_spill] sm:$0xff] %v3973_v18  ;;  %v3976_v27 = vld [vmem:[#allocation11 + $0x40] sm:$0xff]  ;;  %v3979_v54 = vld [vmem:[#allocation11 + $0x50] sm:$0xff] }
 0x593   :  { %1379 = vmatpush1.msra.mxu0 %v3964_v53  ;;  %1450 = vmatpush1.msra.mxu1 %v3967_v15  ;;  %5287 = vst [vmem:[#allocation30_spill] sm:$0xff] %v3976_v27  ;;  %5288 = vst [vmem:[#allocation41_spill] sm:$0xff] %v3979_v54  ;;  %v3982_v53 = vld [vmem:[#allocation11 + $0x28] sm:$0xff]  ;;  %v3985_v15 = vld [vmem:[#allocation11 + $0x38] sm:$0xff] }
 0x594   :  { %1380 = vmatprep.subr.mxu0 %v3970_v39  ;;  %1451 = vmatprep.subr.mxu1 %v3973_v18  ;;  %5289 = vst [vmem:[#allocation32_spill] sm:$0xff] %v3982_v53  ;;  %5290 = vst [vmem:[#allocation43_spill] sm:$0xff] %v3985_v15  ;;  %v3988_v39 = vld [vmem:[#allocation11 + $0x20] sm:$0xff]  ;;  %v3991_v18 = vld [vmem:[#allocation11 + $0x30] sm:$0xff] }
 0x595   :  { %1381 = vmatpush1.msra.mxu0 %v3976_v27  ;;  %1452 = vmatpush1.msra.mxu1 %v3979_v54  ;;  %5291 = vst [vmem:[#allocation34_spill] sm:$0xff] %v3988_v39  ;;  %5292 = vst [vmem:[#allocation45_spill] sm:$0xff] %v3991_v18  ;;  %v3994_v27 = vld [vmem:[#allocation11 + $0x8] sm:$0xff]  ;;  %v3997_v54 = vld [vmem:[#allocation11 + $0x18] sm:$0xff] }
 0x596   :  { %1382 = vmatprep.subr.mxu0 %v3982_v53  ;;  %1453 = vmatprep.subr.mxu1 %v3985_v15  ;;  %5293 = vst [vmem:[#allocation36_spill] sm:$0xff] %v3994_v27  ;;  %5294 = vst [vmem:[#allocation47_spill] sm:$0xff] %v3997_v54  ;;  %v4000_v53 = vld [vmem:[#allocation11] sm:$0xff]  ;;  %v4003_v15 = vld [vmem:[#allocation11 + $0x10] sm:$0xff] }
 0x597   :  { %1383 = vmatpush1.msra.mxu0 %v3988_v39  ;;  %1454 = vmatpush1.msra.mxu1 %v3991_v18  ;;  %5295 = vst [vmem:[#allocation38_spill] sm:$0xff] %v4000_v53  ;;  %5296 = vst [vmem:[#allocation49_spill] sm:$0xff] %v4003_v15  ;;  %v4006_v39 = vld [vmem:[#allocation11 + $0x3e8] sm:$0xff]  ;;  %v4009_v18 = vld [vmem:[#allocation11 + $0x3f8] sm:$0xff] }
 0x598   :  { %1384 = vmatprep.subr.mxu0 %v3994_v27  ;;  %1455 = vmatprep.subr.mxu1 %v3997_v54  ;;  %5297 = vst [vmem:[#allocation40_spill] sm:$0xff] %v4006_v39  ;;  %5298 = vst [vmem:[#allocation51_spill] sm:$0xff] %v4009_v18  ;;  %v4012_v27 = vld [vmem:[#allocation11 + $0x3e0] sm:$0xff]  ;;  %v4015_v54 = vld [vmem:[#allocation11 + $0x3f0] sm:$0xff] }
 0x599   :  { %1385 = vmatpush1.msra.mxu0 %v4000_v53  ;;  %1456 = vmatpush1.msra.mxu1 %v4003_v15  ;;  %5299 = vst [vmem:[#allocation42_spill] sm:$0xff] %v4012_v27  ;;  %5300 = vst [vmem:[#allocation53_spill] sm:$0xff] %v4015_v54  ;;  %v4018_v53 = vld [vmem:[#allocation11 + $0x3c8] sm:$0xff]  ;;  %v4021_v15 = vld [vmem:[#allocation11 + $0x3d8] sm:$0xff] }
 0x59a   :  { %1386 = vmatprep.subr.mxu0 %v4006_v39  ;;  %1457 = vmatprep.subr.mxu1 %v4009_v18  ;;  %5301 = vst [vmem:[#allocation44_spill] sm:$0xff] %v4018_v53  ;;  %5302 = vst [vmem:[#allocation55_spill] sm:$0xff] %v4021_v15  ;;  %v4024_v39 = vld [vmem:[#allocation11 + $0x3c0] sm:$0xff]  ;;  %v4027_v18 = vld [vmem:[#allocation11 + $0x3d0] sm:$0xff] }
 0x59b   :  { %1387 = vmatpush2.msra.mxu0 %v4012_v27  ;;  %1458 = vmatpush2.msra.mxu1 %v4015_v54  ;;  %5303 = vst [vmem:[#allocation46_spill] sm:$0xff] %v4024_v39  ;;  %5304 = vst [vmem:[#allocation57_spill] sm:$0xff] %v4027_v18  ;;  %v4030_v27 = vld [vmem:[#allocation11 + $0x3a8] sm:$0xff]  ;;  %v4033_v54 = vld [vmem:[#allocation11 + $0x3b8] sm:$0xff] }
 0x59c   :  { %1388 = vmatprep.subr.mxu0 %v4018_v53  ;;  %1459 = vmatprep.subr.mxu1 %v4021_v15  ;;  %5305 = vst [vmem:[#allocation48_spill] sm:$0xff] %v4030_v27  ;;  %5306 = vst [vmem:[#allocation59_spill] sm:$0xff] %v4033_v54  ;;  %v4036_v53 = vld [vmem:[#allocation11 + $0x3a0] sm:$0xff]  ;;  %v4039_v15 = vld [vmem:[#allocation11 + $0x3b0] sm:$0xff] }
 0x59d   :  { %1389 = vmatpush2.msra.mxu0 %v4024_v39  ;;  %1460 = vmatpush2.msra.mxu1 %v4027_v18  ;;  %5307 = vst [vmem:[#allocation50_spill] sm:$0xff] %v4036_v53  ;;  %5308 = vst [vmem:[#allocation61_spill] sm:$0xff] %v4039_v15  ;;  %v4042_v39 = vld [vmem:[#allocation11 + $0x388] sm:$0xff]  ;;  %v4045_v18 = vld [vmem:[#allocation11 + $0x398] sm:$0xff] }
 0x59e   :  { %1390 = vmatprep.subr.mxu0 %v4030_v27  ;;  %1461 = vmatprep.subr.mxu1 %v4033_v54  ;;  %5309 = vst [vmem:[#allocation52_spill] sm:$0xff] %v4042_v39  ;;  %5310 = vst [vmem:[#allocation63_spill] sm:$0xff] %v4045_v18  ;;  %v4048_v27 = vld [vmem:[#allocation11 + $0x380] sm:$0xff]  ;;  %v4051_v54 = vld [vmem:[#allocation11 + $0x390] sm:$0xff] }
 0x59f   :  { %1391 = vmatpush2.msra.mxu0 %v4036_v53  ;;  %1462 = vmatpush2.msra.mxu1 %v4039_v15  ;;  %5311 = vst [vmem:[#allocation54_spill] sm:$0xff] %v4048_v27  ;;  %5312 = vst [vmem:[#allocation65_spill] sm:$0xff] %v4051_v54  ;;  %v4054_v53 = vld [vmem:[#allocation11 + $0x368] sm:$0xff]  ;;  %v4057_v15 = vld [vmem:[#allocation11 + $0x378] sm:$0xff] }
 0x5a0   :  { %1392 = vmatprep.subr.mxu0 %v4042_v39  ;;  %1463 = vmatprep.subr.mxu1 %v4045_v18  ;;  %5313 = vst [vmem:[#allocation56_spill] sm:$0xff] %v4054_v53  ;;  %5314 = vst [vmem:[#allocation67_spill] sm:$0xff] %v4057_v15  ;;  %v4060_v39 = vld [vmem:[#allocation11 + $0x360] sm:$0xff]  ;;  %v4063_v18 = vld [vmem:[#allocation11 + $0x370] sm:$0xff] }
 0x5a1   :  { %1393 = vmatpush2.msra.mxu0 %v4048_v27  ;;  %1464 = vmatpush2.msra.mxu1 %v4051_v54  ;;  %5315 = vst [vmem:[#allocation58_spill] sm:$0xff] %v4060_v39  ;;  %5316 = vst [vmem:[#allocation69_spill] sm:$0xff] %v4063_v18  ;;  %v4066_v27 = vld [vmem:[#allocation11 + $0x348] sm:$0xff]  ;;  %v4069_v54 = vld [vmem:[#allocation11 + $0x358] sm:$0xff] }
 0x5a2   :  { %1394 = vmatprep.subr.mxu0 %v4054_v53  ;;  %1465 = vmatprep.subr.mxu1 %v4057_v15  ;;  %5317 = vst [vmem:[#allocation60_spill] sm:$0xff] %v4066_v27  ;;  %5318 = vst [vmem:[#allocation71_spill] sm:$0xff] %v4069_v54  ;;  %v4072_v53 = vld [vmem:[#allocation11 + $0x340] sm:$0xff]  ;;  %v4075_v15 = vld [vmem:[#allocation11 + $0x350] sm:$0xff] }
 0x5a3   :  { %1395 = vmatpush2.msra.mxu0 %v4060_v39  ;;  %1466 = vmatpush2.msra.mxu1 %v4063_v18  ;;  %5319 = vst [vmem:[#allocation62_spill] sm:$0xff] %v4072_v53  ;;  %5320 = vst [vmem:[#allocation73_spill] sm:$0xff] %v4075_v15  ;;  %v4078_v39 = vld [vmem:[#allocation11 + $0x328] sm:$0xff]  ;;  %v4081_v18 = vld [vmem:[#allocation11 + $0x338] sm:$0xff] }
 0x5a4   :  { %1396 = vmatprep.subr.mxu0 %v4066_v27  ;;  %1467 = vmatprep.subr.mxu1 %v4069_v54  ;;  %5321 = vst [vmem:[#allocation64_spill] sm:$0xff] %v4078_v39  ;;  %5322 = vst [vmem:[#allocation75_spill] sm:$0xff] %v4081_v18  ;;  %v4084_v27 = vld [vmem:[#allocation11 + $0x320] sm:$0xff]  ;;  %v4087_v54 = vld [vmem:[#allocation11 + $0x330] sm:$0xff] }
 0x5a5   :  { %1397 = vmatpush2.msra.mxu0 %v4072_v53  ;;  %1468 = vmatpush2.msra.mxu1 %v4075_v15  ;;  %5323 = vst [vmem:[#allocation66_spill] sm:$0xff] %v4084_v27  ;;  %5324 = vst [vmem:[#allocation77_spill] sm:$0xff] %v4087_v54  ;;  %v4090_v53 = vld [vmem:[#allocation11 + $0x308] sm:$0xff]  ;;  %v4093_v15 = vld [vmem:[#allocation11 + $0x318] sm:$0xff] }
 0x5a6   :  { %1398 = vmatprep.subr.mxu0 %v4078_v39  ;;  %1469 = vmatprep.subr.mxu1 %v4081_v18  ;;  %5325 = vst [vmem:[#allocation68_spill] sm:$0xff] %v4090_v53  ;;  %5326 = vst [vmem:[#allocation79_spill] sm:$0xff] %v4093_v15  ;;  %v4096_v39 = vld [vmem:[#allocation11 + $0x300] sm:$0xff]  ;;  %v4099_v18 = vld [vmem:[#allocation11 + $0x310] sm:$0xff] }
 0x5a7   :  { %1399 = vmatpush2.msra.mxu0 %v4084_v27  ;;  %1470 = vmatpush2.msra.mxu1 %v4087_v54  ;;  %5327 = vst [vmem:[#allocation70_spill] sm:$0xff] %v4096_v39  ;;  %5328 = vst [vmem:[#allocation82_spill] sm:$0xff] %v4099_v18  ;;  %v4102_v27 = vld [vmem:[#allocation11 + $0x2e8] sm:$0xff]  ;;  %v4105_v54 = vld [vmem:[#allocation11 + $0x2f8] sm:$0xff] }
 0x5a8   :  { %1400 = vmatprep.subr.mxu0 %v4090_v53  ;;  %1471 = vmatprep.subr.mxu1 %v4093_v15  ;;  %5329 = vst [vmem:[#allocation72_spill] sm:$0xff] %v4102_v27  ;;  %5330 = vst [vmem:[#allocation84_spill] sm:$0xff] %v4105_v54  ;;  %v4108_v53 = vld [vmem:[#allocation11 + $0x2e0] sm:$0xff]  ;;  %v4111_v15 = vld [vmem:[#allocation11 + $0x2f0] sm:$0xff] }
 0x5a9   :  { %1401 = vmatpush2.msra.mxu0 %v4096_v39  ;;  %1472 = vmatpush2.msra.mxu1 %v4099_v18  ;;  %5331 = vst [vmem:[#allocation74_spill] sm:$0xff] %v4108_v53  ;;  %5332 = vst [vmem:[#allocation76_spill] sm:$0xff] %v4111_v15  ;;  %v4114_v39 = vld [vmem:[#allocation11 + $0x2c8] sm:$0xff]  ;;  %v4117_v18 = vld [vmem:[#allocation11 + $0x2d8] sm:$0xff] }
 0x5aa   :  { %1402 = vmatprep.subr.mxu0 %v4102_v27  ;;  %1473 = vmatprep.subr.mxu1 %v4105_v54  ;;  %5333 = vst [vmem:[#allocation88_spill] sm:$0xff] %v4114_v39  ;;  %5334 = vst [vmem:[#allocation78_spill] sm:$0xff] %v4117_v18  ;;  %v4120_v27 = vld [vmem:[#allocation11 + $0x2c0] sm:$0xff]  ;;  %v4123_v54 = vld [vmem:[#allocation11 + $0x2d0] sm:$0xff] }
 0x5ab   :  { %1403 = vmatpush2.msra.mxu0 %v4108_v53  ;;  %1474 = vmatpush2.msra.mxu1 %v4111_v15  ;;  %5335 = vst [vmem:[#allocation80_spill] sm:$0xff] %v4120_v27  ;;  %5336 = vst [vmem:[#allocation81_spill] sm:$0xff] %v4123_v54  ;;  %v4126_v53 = vld [vmem:[#allocation11 + $0x2a8] sm:$0xff]  ;;  %v4129_v15 = vld [vmem:[#allocation11 + $0x2b8] sm:$0xff] }
 0x5ac   :  { %1404 = vmatprep.subr.mxu0 %v4114_v39  ;;  %1475 = vmatprep.subr.mxu1 %v4117_v18  ;;  %5337 = vst [vmem:[#allocation83_spill] sm:$0xff] %v4126_v53  ;;  %5338 = vst [vmem:[#allocation85_spill] sm:$0xff] %v4129_v15  ;;  %v4132_v39 = vld [vmem:[#allocation11 + $0x2a0] sm:$0xff]  ;;  %v4135_v18 = vld [vmem:[#allocation11 + $0x2b0] sm:$0xff] }
 0x5ad   :  { %1405 = vmatpush2.msra.mxu0 %v4120_v27  ;;  %1476 = vmatpush2.msra.mxu1 %v4123_v54  ;;  %5339 = vst [vmem:[#allocation97_spill] sm:$0xff] %v4132_v39  ;;  %5340 = vst [vmem:[#allocation87_spill] sm:$0xff] %v4135_v18  ;;  %v4138_v27 = vld [vmem:[#allocation11 + $0x288] sm:$0xff]  ;;  %v4141_v54 = vld [vmem:[#allocation11 + $0x298] sm:$0xff] }
 0x5ae   :  { %1406 = vmatprep.subr.mxu0 %v4126_v53  ;;  %1477 = vmatprep.subr.mxu1 %v4129_v15  ;;  %5341 = vst [vmem:[#allocation99_spill] sm:$0xff] %v4138_v27  ;;  %5342 = vst [vmem:[#allocation89_spill] sm:$0xff] %v4141_v54  ;;  %v4144_v53 = vld [vmem:[#allocation11 + $0x280] sm:$0xff]  ;;  %v4147_v15 = vld [vmem:[#allocation11 + $0x290] sm:$0xff] }
 0x5af   :  { %1407 = vmatpush2.msra.mxu0 %v4132_v39  ;;  %1478 = vmatpush2.msra.mxu1 %v4135_v18  ;;  %5343 = vst [vmem:[#allocation101_spill] sm:$0xff] %v4144_v53  ;;  %5344 = vst [vmem:[#allocation91_spill] sm:$0xff] %v4147_v15  ;;  %v4150_v39 = vld [vmem:[#allocation11 + $0x268] sm:$0xff]  ;;  %v4153_v18 = vld [vmem:[#allocation11 + $0x278] sm:$0xff] }
 0x5b0   :  { %1408 = vmatprep.subr.mxu0 %v4138_v27  ;;  %1479 = vmatprep.subr.mxu1 %v4141_v54  ;;  %5345 = vst [vmem:[#allocation102_spill] sm:$0xff] %v4150_v39  ;;  %5346 = vst [vmem:[#allocation93_spill] sm:$0xff] %v4153_v18  ;;  %v4156_v27 = vld [vmem:[#allocation11 + $0x260] sm:$0xff]  ;;  %v4159_v54 = vld [vmem:[#allocation11 + $0x270] sm:$0xff] }
 0x5b1   :  { %1409 = vmatpush2.msra.mxu0 %v4144_v53  ;;  %1480 = vmatpush2.msra.mxu1 %v4147_v15  ;;  %5347 = vst [vmem:[#allocation103_spill] sm:$0xff] %v4156_v27  ;;  %5348 = vst [vmem:[#allocation95_spill] sm:$0xff] %v4159_v54  ;;  %v4162_v53 = vld [vmem:[#allocation11 + $0x248] sm:$0xff]  ;;  %v4165_v15 = vld [vmem:[#allocation11 + $0x258] sm:$0xff] }
 0x5b2   :  { %1410 = vmatprep.subr.mxu0 %v4150_v39  ;;  %1481 = vmatprep.subr.mxu1 %v4153_v18  ;;  %5349 = vst [vmem:[#allocation104_spill] sm:$0xff] %v4162_v53  ;;  %5350 = vst [vmem:[#allocation96_spill] sm:$0xff] %v4165_v15  ;;  %v4168_v39 = vld [vmem:[#allocation11 + $0x240] sm:$0xff]  ;;  %v4172_v18 = vld [vmem:[#allocation11 + $0x228] sm:$0xff] }
 0x5b3   :  { %1411 = vmatpush2.msra.mxu0 %v4156_v27  ;;  %1482 = vmatpush2.msra.mxu1 %v4159_v54  ;;  %5351 = vst [vmem:[#allocation105_spill] sm:$0xff] %v4168_v39  ;;  %5352 = vst [vmem:[#allocation31_spill] sm:$0xff] %v4172_v18  ;;  %v4176_v54 = vld [vmem:[#allocation11 + $0x220] sm:$0xff] }
 0x5b4   :  { %1412 = vmatprep.subr.mxu0 %v4162_v53  ;;  %1483 = vmatprep.subr.mxu1 %v4165_v15  ;;  %5353 = vst [vmem:[#allocation98_spill] sm:$0xff] %v4176_v54  ;;  %v4180_v53 = vld [vmem:[#allocation11 + $0x208] sm:$0xff] }
 0x5b5   :  { %1413 = vmatpush2.msra.mxu0 %v4168_v39  ;;  %1484 = vmatpush2.msra.mxu1 %v5263_v32  ;;  %5354 = vst [vmem:[#allocation25_spill] sm:$0xff] %v4180_v53  ;;  %v4184_v39 = vld [vmem:[#allocation11 + $0x200] sm:$0xff] }
 0x5b6   :  { %1414 = vmatprep.subr.mxu0 %v4172_v18  ;;  %1485 = vmatprep.subr.mxu1 %v5265_v35  ;;  %5355 = vst [vmem:[#allocation106_spill] sm:$0xff] %v4184_v39 }
 0x5b7   :  { %1415 = vmatpush2.msra.mxu0 %v4176_v54  ;;  %1486 = vmatpush2.msra.mxu1 %v5267_v38 }
 0x5b8   :  { %1416 = vmatprep.subr.mxu0 %v4180_v53  ;;  %1487 = vmatprep.subr.mxu1 %v5269_v42 }
 0x5b9   :  { %1417 = vmatpush2.msra.mxu0 %v4184_v39  ;;  %1488 = vmatpush2.msra.mxu1 %v5271_v46 }
 0x5ba   :  { %1538 = vmatprep.subr.mxu0 %v3793_v8  ;;  %1609 = vmatprep.subr.mxu1 %v3796_v50 }
 0x63a   :  { %v1236_v32 = vpop.f32.mrf.mxu0  ;;  %v1307_v42 = vpop.f32.mrf.mxu1 }
 0x63b   :  { %v1237_v35 = vadd.f32 %v1236_v32, %v5017_v30  ;;  %v1308_v46 = vadd.f32 %v1307_v42, %v2943_v48  ;;  %v1342_v42 = vstv %s1781_s15 }
 0x63c   :  { %v1238_v38 = vpop.f32.mrf.mxu0  ;;  %v1309_v15 = vpop.f32.mrf.mxu1 }
 0x63d   :  { %v1778_v54 = vmul.f32 -1.442695, %v1237_v35  ;;  %v1239_v18 = vadd.f32 %v1238_v38, %v5272_v51  ;;  %v1310_v39 = vadd.f32 %v1309_v15, %v2941_v43 }
 0x63f   :  { %1894 = vpow2.f32 %v1778_v54  ;;  %v1779_v53 = vmul.f32 -1.442695, %v1239_v18  ;;  %v1780_v27 = vmul.f32 -1.442695, %v1310_v39 }
 0x641   :  { %1896 = vpow2.f32 %v1779_v53 }
 0x642   :  { %1898 = vtanh.f32 %v1308_v46 }
 0x643   :  { %1900 = vpow2.f32 %v1780_v27 }
 0x64c   :  { %v1895_v8 = vpop.eup %1894 }
 0x64d   :  { %v1315_v17 = vadd.f32 1.0, %v1895_v8 }
 0x64e   :  { %v1897_v50 = vpop.eup %1896 }
 0x64f   :  { %1902 = vrcp.f32 %v1315_v17  ;;  %v1321_v32 = vadd.f32 1.0, %v1897_v50  ;;  %v1899_v35 = vpop.eup %1898 }
 0x650   :  { %v1901_v54 = vpop.eup %1900 }
 0x651   :  { %1904 = vrcp.f32 %v1321_v32  ;;  %v1328_v53 = vadd.f32 1.0, %v1901_v54 }
 0x652   :  { %1906 = vtanh.f32 %v3658_v13  ;;  %v1353_v13 = vld [vmem:[#allocation4 + $0x30] sm:$0xff] }
 0x653   :  { %1908 = vrcp.f32 %v1328_v53  ;;  %v5403_v53 = vld [vmem:[#allocation77_spill] sm:$0xff] }
 0x65c   :  { %v1903_v18 = vpop.eup %1902 }
 0x65d   :  { %v1332_v43 = vmul.f32 %v1903_v18, %v1899_v35  ;;  %v5356_v35 = vstv %s3655_s12 }
 0x65e   :  { %v1905_v38 = vpop.eup %1904 }
 0x65f   :  { %v1331_v15 = vmul.f32 %v1905_v38, %v3806_v7  ;;  %v1907_v46 = vpop.eup %1906  ;;  %v5402_v38 = vld [vmem:[#allocation66_spill] sm:$0xff] }
 0x660   :  { %v1909_v8 = vpop.eup %1908  ;;  %v1346_v54 = vmul.f32 %v1907_v46, %v5356_v35  ;;  %v5408_v46 = vld [vmem:[#allocation72_spill] sm:$0xff] }
 0x661   :  { %v1333_v39 = vadd.f32 %v1332_v43, %v1331_v15  ;;  %v5357_v43 = vld [vmem:[#allocation29_spill] sm:$0xff]  ;;  %v5404_v15 = vld [vmem:[#allocation68_spill] sm:$0xff] }
 0x662   :  { %v5411_v35 = vld [vmem:[#allocation76_spill] sm:$0xff] }
 0x663   :  { %1910 = vtanh.f32 %v1333_v39  ;;  %v1348_v27 = vmul.f32 %v1342_v42, %v1333_v39  ;;  %v5406_v39 = vld [vmem:[#allocation70_spill] sm:$0xff] }
 0x665   :  { %v4197_v17 = vadd.f32 %v3662_v55, %v1348_v27  ;;  %v5358_v55 = vld [vmem:[#allocation24_spill] sm:$0xff]  ;;  %v5407_v27 = vld [vmem:[#allocation82_spill] sm:$0xff] }
 0x670   :  { %v4199_v50 = vpop.eup %1910 }
 0x671   :  { %v4202_v32 = vmul.f32 %v4199_v50, %v1909_v8  ;;  %v5409_v8 = vld [vmem:[#allocation84_spill] sm:$0xff] }
 0x673   :  { %v1343_v7 = vmul.f32 %v1342_v42, %v4202_v32  ;;  %v5405_v42 = vld [vmem:[#allocation79_spill] sm:$0xff] }
 0x675   :  { %v1347_v18 = vadd.f32 %v1346_v54, %v1343_v7  ;;  %v5410_v7 = vld [vmem:[#allocation74_spill] sm:$0xff]  ;;  %v5412_v54 = vld [vmem:[#allocation88_spill] sm:$0xff] }
 0x677   :  { %1418 = vmatprep.mubr.f32.mxu0 %v1347_v18  ;;  %1489 = vmatprep.mubr.f32.mxu1 %v1347_v18  ;;  %v5413_v18 = vld [vmem:[#allocation78_spill] sm:$0xff] }
 0x678   :  { %1419 = vmatmul.mubr.f32.vlgmr.msra.gmra.mxu0 %v1353_v13  ;;  %1490 = vmatmul.mubr.f32.vlgmr.msra.gmra.mxu1 %v1353_v13  ;;  %v5414_v13 = vld [vmem:[#allocation80_spill] sm:$0xff] }
 0x679   :  { %1539 = vmatpush1.msra.mxu0 %v3820_v37  ;;  %1610 = vmatpush1.msra.mxu1 %v3823_v61  ;;  %v5359_v37 = vld [vmem:[#allocation33_spill] sm:$0xff]  ;;  %v5360_v61 = vld [vmem:[#allocation26_spill] sm:$0xff] }
 0x67a   :  { %1540 = vmatprep.subr.mxu0 %v3826_v21  ;;  %1611 = vmatprep.subr.mxu1 %v3829_v23  ;;  %v5361_v21 = vld [vmem:[#allocation35_spill] sm:$0xff] }
 0x67b   :  { %1541 = vmatpush1.msra.mxu0 %v3832_v25  ;;  %1612 = vmatpush1.msra.mxu1 %v3835_v29  ;;  %v5362_v23 = vld [vmem:[#allocation27_spill] sm:$0xff]  ;;  %v5363_v25 = vld [vmem:[#allocation37_spill] sm:$0xff]  ;;  %v5364_v29 = vld [vmem:[#allocation28_spill] sm:$0xff] }
 0x67c   :  { %1542 = vmatprep.subr.mxu0 %v3838_v31  ;;  %1613 = vmatprep.subr.mxu1 %v3841_v33  ;;  %v5365_v31 = vld [vmem:[#allocation39_spill] sm:$0xff]  ;;  %v5366_v33 = vld [vmem:[#allocation30_spill] sm:$0xff] }
 0x67d   :  { %1543 = vmatpush1.msra.mxu0 %v3844_v36  ;;  %1614 = vmatpush1.msra.mxu1 %v3847_v40  ;;  %v5367_v36 = vld [vmem:[#allocation41_spill] sm:$0xff]  ;;  %v5368_v40 = vld [vmem:[#allocation32_spill] sm:$0xff] }
 0x67e   :  { %1544 = vmatprep.subr.mxu0 %v3850_v44  ;;  %1615 = vmatprep.subr.mxu1 %v3853_v59  ;;  %v5369_v44 = vld [vmem:[#allocation43_spill] sm:$0xff]  ;;  %v5370_v59 = vld [vmem:[#allocation34_spill] sm:$0xff] }
 0x67f   :  { %1545 = vmatpush1.msra.mxu0 %v3856_v0  ;;  %1616 = vmatpush1.msra.mxu1 %v3859_v60  ;;  %v5371_v0 = vld [vmem:[#allocation45_spill] sm:$0xff]  ;;  %v5372_v60 = vld [vmem:[#allocation36_spill] sm:$0xff] }
 0x680   :  { %1546 = vmatprep.subr.mxu0 %v3862_v63  ;;  %1617 = vmatprep.subr.mxu1 %v3865_v56  ;;  %v5373_v63 = vld [vmem:[#allocation47_spill] sm:$0xff]  ;;  %v5374_v56 = vld [vmem:[#allocation38_spill] sm:$0xff] }
 0x681   :  { %1547 = vmatpush1.msra.mxu0 %v3868_v45  ;;  %1618 = vmatpush1.msra.mxu1 %v3871_v57  ;;  %v5375_v45 = vld [vmem:[#allocation49_spill] sm:$0xff]  ;;  %v5376_v57 = vld [vmem:[#allocation40_spill] sm:$0xff] }
 0x682   :  { %1548 = vmatprep.subr.mxu0 %v3874_v47  ;;  %1619 = vmatprep.subr.mxu1 %v3877_v1  ;;  %v5377_v47 = vld [vmem:[#allocation51_spill] sm:$0xff]  ;;  %v5378_v1 = vld [vmem:[#allocation42_spill] sm:$0xff] }
 0x683   :  { %1549 = vmatpush1.msra.mxu0 %v3880_v2  ;;  %1620 = vmatpush1.msra.mxu1 %v3883_v3  ;;  %v5379_v2 = vld [vmem:[#allocation53_spill] sm:$0xff]  ;;  %v5380_v3 = vld [vmem:[#allocation44_spill] sm:$0xff] }
 0x684   :  { %1550 = vmatprep.subr.mxu0 %v3886_v4  ;;  %1621 = vmatprep.subr.mxu1 %v3889_v5  ;;  %v5381_v4 = vld [vmem:[#allocation55_spill] sm:$0xff]  ;;  %v5382_v5 = vld [vmem:[#allocation46_spill] sm:$0xff] }
 0x685   :  { %1551 = vmatpush1.msra.mxu0 %v3892_v9  ;;  %1622 = vmatpush1.msra.mxu1 %v3895_v10  ;;  %v5383_v9 = vld [vmem:[#allocation57_spill] sm:$0xff]  ;;  %v5384_v10 = vld [vmem:[#allocation48_spill] sm:$0xff] }
 0x686   :  { %1552 = vmatprep.subr.mxu0 %v3898_v62  ;;  %1623 = vmatprep.subr.mxu1 %v3901_v22  ;;  %v5385_v62 = vld [vmem:[#allocation59_spill] sm:$0xff]  ;;  %v5386_v22 = vld [vmem:[#allocation50_spill] sm:$0xff] }
 0x687   :  { %1553 = vmatpush1.msra.mxu0 %v3904_v12  ;;  %1624 = vmatpush1.msra.mxu1 %v3907_v58  ;;  %v5387_v12 = vld [vmem:[#allocation61_spill] sm:$0xff]  ;;  %v5388_v58 = vld [vmem:[#allocation52_spill] sm:$0xff] }
 0x688   :  { %1554 = vmatprep.subr.mxu0 %v3910_v34  ;;  %1625 = vmatprep.subr.mxu1 %v3913_v24  ;;  %v5389_v34 = vld [vmem:[#allocation63_spill] sm:$0xff]  ;;  %v5390_v24 = vld [vmem:[#allocation54_spill] sm:$0xff] }
 0x689   :  { %1555 = vmatpush1.msra.mxu0 %v3916_v11  ;;  %1626 = vmatpush1.msra.mxu1 %v3919_v52  ;;  %v5391_v11 = vld [vmem:[#allocation65_spill] sm:$0xff]  ;;  %v5392_v52 = vld [vmem:[#allocation56_spill] sm:$0xff] }
 0x68a   :  { %1556 = vmatprep.subr.mxu0 %v3922_v20  ;;  %1627 = vmatprep.subr.mxu1 %v3925_v28  ;;  %v5393_v20 = vld [vmem:[#allocation67_spill] sm:$0xff]  ;;  %v5394_v28 = vld [vmem:[#allocation58_spill] sm:$0xff] }
 0x68b   :  { %1557 = vmatpush1.msra.mxu0 %v3928_v19  ;;  %1628 = vmatpush1.msra.mxu1 %v3931_v49  ;;  %v5395_v19 = vld [vmem:[#allocation69_spill] sm:$0xff]  ;;  %v5396_v49 = vld [vmem:[#allocation60_spill] sm:$0xff] }
 0x68c   :  { %1558 = vmatprep.subr.mxu0 %v3934_v26  ;;  %1629 = vmatprep.subr.mxu1 %v3937_v14  ;;  %v5397_v26 = vld [vmem:[#allocation71_spill] sm:$0xff]  ;;  %v5398_v14 = vld [vmem:[#allocation62_spill] sm:$0xff] }
 0x68d   :  { %1559 = vmatpush1.msra.mxu0 %v3940_v6  ;;  %1630 = vmatpush1.msra.mxu1 %v3943_v16  ;;  %v5399_v6 = vld [vmem:[#allocation73_spill] sm:$0xff]  ;;  %v5400_v16 = vld [vmem:[#allocation64_spill] sm:$0xff] }
 0x68e   :  { %1560 = vmatprep.subr.mxu0 %v3946_v41  ;;  %1631 = vmatprep.subr.mxu1 %v5357_v43  ;;  %v5401_v41 = vld [vmem:[#allocation75_spill] sm:$0xff]  ;;  %v5415_v43 = vld [vmem:[#allocation81_spill] sm:$0xff] }
 0x68f   :  { %1561 = vmatpush1.msra.mxu0 %v5358_v55  ;;  %1632 = vmatpush1.msra.mxu1 %v5359_v37  ;;  %v5416_v55 = vld [vmem:[#allocation83_spill] sm:$0xff]  ;;  %v5417_v37 = vld [vmem:[#allocation85_spill] sm:$0xff] }
 0x690   :  { %1562 = vmatprep.subr.mxu0 %v5360_v61  ;;  %1633 = vmatprep.subr.mxu1 %v5361_v21  ;;  %v5418_v61 = vld [vmem:[#allocation97_spill] sm:$0xff]  ;;  %v5419_v21 = vld [vmem:[#allocation87_spill] sm:$0xff] }
 0x691   :  { %1563 = vmatpush1.msra.mxu0 %v5362_v23  ;;  %1634 = vmatpush1.msra.mxu1 %v5363_v25  ;;  %v5420_v23 = vld [vmem:[#allocation99_spill] sm:$0xff]  ;;  %v5421_v25 = vld [vmem:[#allocation89_spill] sm:$0xff] }
 0x692   :  { %1564 = vmatprep.subr.mxu0 %v5364_v29  ;;  %1635 = vmatprep.subr.mxu1 %v5365_v31  ;;  %v5422_v29 = vld [vmem:[#allocation101_spill] sm:$0xff]  ;;  %v5423_v31 = vld [vmem:[#allocation91_spill] sm:$0xff] }
 0x693   :  { %1565 = vmatpush1.msra.mxu0 %v5366_v33  ;;  %1636 = vmatpush1.msra.mxu1 %v5367_v36  ;;  %v5424_v33 = vld [vmem:[#allocation102_spill] sm:$0xff]  ;;  %v5425_v36 = vld [vmem:[#allocation93_spill] sm:$0xff] }
 0x694   :  { %1566 = vmatprep.subr.mxu0 %v5368_v40  ;;  %1637 = vmatprep.subr.mxu1 %v5369_v44  ;;  %v5426_v40 = vld [vmem:[#allocation103_spill] sm:$0xff] }
 0x695   :  { %1567 = vmatpush1.msra.mxu0 %v5370_v59  ;;  %1638 = vmatpush1.msra.mxu1 %v5371_v0  ;;  %v5427_v44 = vld [vmem:[#allocation95_spill] sm:$0xff]  ;;  %v5428_v59 = vld [vmem:[#allocation104_spill] sm:$0xff] }
 0x696   :  { %1568 = vmatprep.subr.mxu0 %v5372_v60  ;;  %1639 = vmatprep.subr.mxu1 %v5373_v63  ;;  %v5429_v0 = vld [vmem:[#allocation96_spill] sm:$0xff]  ;;  %v5430_v60 = vld [vmem:[#allocation105_spill] sm:$0xff]  ;;  %v2199_v63 = vld [vmem:[#allocation11 + $0x250] sm:$0xff] }
 0x697   :  { %1569 = vmatpush1.msra.mxu0 %v5374_v56  ;;  %1640 = vmatpush1.msra.mxu1 %v5375_v45  ;;  %v5431_v56 = vld [vmem:[#allocation31_spill] sm:$0xff]  ;;  %v2200_v45 = vld [vmem:[#allocation11 + $0x238] sm:$0xff] }
 0x698   :  { %1570 = vmatprep.subr.mxu0 %v5376_v57  ;;  %1641 = vmatprep.subr.mxu1 %v5377_v47  ;;  %v5432_v57 = vld [vmem:[#allocation98_spill] sm:$0xff]  ;;  %v2201_v47 = vld [vmem:[#allocation11 + $0x230] sm:$0xff] }
 0x699   :  { %1571 = vmatpush2.msra.mxu0 %v5378_v1  ;;  %1642 = vmatpush2.msra.mxu1 %v5379_v2  ;;  %v5433_v1 = vld [vmem:[#allocation25_spill] sm:$0xff]  ;;  %v2202_v2 = vld [vmem:[#allocation11 + $0x218] sm:$0xff] }
 0x69a   :  { %1572 = vmatprep.subr.mxu0 %v5380_v3  ;;  %1643 = vmatprep.subr.mxu1 %v5381_v4  ;;  %v5434_v3 = vld [vmem:[#allocation106_spill] sm:$0xff]  ;;  %v2203_v4 = vld [vmem:[#allocation11 + $0x210] sm:$0xff] }
 0x69b   :  { %1573 = vmatpush2.msra.mxu0 %v5382_v5  ;;  %1644 = vmatpush2.msra.mxu1 %v5383_v9 }
 0x69c   :  { %1574 = vmatprep.subr.mxu0 %v5384_v10  ;;  %1645 = vmatprep.subr.mxu1 %v5385_v62 }
 0x69d   :  { %1575 = vmatpush2.msra.mxu0 %v5386_v22  ;;  %1646 = vmatpush2.msra.mxu1 %v5387_v12 }
 0x69e   :  { %1576 = vmatprep.subr.mxu0 %v5388_v58  ;;  %1647 = vmatprep.subr.mxu1 %v5389_v34 }
 0x69f   :  { %1577 = vmatpush2.msra.mxu0 %v5390_v24  ;;  %1648 = vmatpush2.msra.mxu1 %v5391_v11  ;;  %v5435_v24 = vld [vmem:[#allocation92_spill] sm:$0xff] }
 0x6a0   :  { %1578 = vmatprep.subr.mxu0 %v5392_v52  ;;  %1649 = vmatprep.subr.mxu1 %v5393_v20 }
 0x6a1   :  { %1579 = vmatpush2.msra.mxu0 %v5394_v28  ;;  %1650 = vmatpush2.msra.mxu1 %v5395_v19 }
 0x6a2   :  { %1580 = vmatprep.subr.mxu0 %v5396_v49  ;;  %1651 = vmatprep.subr.mxu1 %v5397_v26 }
 0x6a3   :  { %1581 = vmatpush2.msra.mxu0 %v5398_v14  ;;  %1652 = vmatpush2.msra.mxu1 %v5399_v6 }
 0x6a4   :  { %1582 = vmatprep.subr.mxu0 %v5400_v16  ;;  %1653 = vmatprep.subr.mxu1 %v5401_v41 }
 0x6a5   :  { %1583 = vmatpush2.msra.mxu0 %v5402_v38  ;;  %1654 = vmatpush2.msra.mxu1 %v5403_v53 }
 0x6a6   :  { %1584 = vmatprep.subr.mxu0 %v5404_v15  ;;  %1655 = vmatprep.subr.mxu1 %v5405_v42  ;;  %v1526_v42 = vstv %s1786_s16 }
 0x6a7   :  { %1585 = vmatpush2.msra.mxu0 %v5406_v39  ;;  %1656 = vmatpush2.msra.mxu1 %v5407_v27  ;;  %v5436_v39 = vld [vmem:[#allocation94_spill] sm:$0xff] }
 0x6a8   :  { %1586 = vmatprep.subr.mxu0 %v5408_v46  ;;  %1657 = vmatprep.subr.mxu1 %v5409_v8  ;;  %v5437_v8 = vld [vmem:[#allocation23_spill] sm:$0xff] }
 0x6a9   :  { %1587 = vmatpush2.msra.mxu0 %v5410_v7  ;;  %1658 = vmatpush2.msra.mxu1 %v5411_v35 }
 0x6aa   :  { %1588 = vmatprep.subr.mxu0 %v5412_v54  ;;  %1659 = vmatprep.subr.mxu1 %v5413_v18 }
 0x6ab   :  { %1589 = vmatpush2.msra.mxu0 %v5414_v13  ;;  %1660 = vmatpush2.msra.mxu1 %v5415_v43 }
 0x6ac   :  { %1590 = vmatprep.subr.mxu0 %v5416_v55  ;;  %1661 = vmatprep.subr.mxu1 %v5417_v37  ;;  %v5438_v55 = vstv %s3808_s14 }
 0x6ad   :  { %1591 = vmatpush2.msra.mxu0 %v5418_v61  ;;  %1662 = vmatpush2.msra.mxu1 %v5419_v21  ;;  %v1537_v21 = vld [vmem:[#allocation4 + $0x38] sm:$0xff] }
 0x6ae   :  { %1592 = vmatprep.subr.mxu0 %v5420_v23  ;;  %1663 = vmatprep.subr.mxu1 %v5421_v25 }
 0x6af   :  { %1593 = vmatpush2.msra.mxu0 %v5422_v29  ;;  %1664 = vmatpush2.msra.mxu1 %v5423_v31 }
 0x6b0   :  { %1594 = vmatprep.subr.mxu0 %v5424_v33  ;;  %1665 = vmatprep.subr.mxu1 %v5425_v36 }
 0x6b1   :  { %1595 = vmatpush2.msra.mxu0 %v5426_v40  ;;  %1666 = vmatpush2.msra.mxu1 %v5427_v44 }
 0x6b2   :  { %1596 = vmatprep.subr.mxu0 %v5428_v59  ;;  %1667 = vmatprep.subr.mxu1 %v5429_v0 }
 0x6b3   :  { %1597 = vmatpush2.msra.mxu0 %v5430_v60  ;;  %1668 = vmatpush2.msra.mxu1 %v2199_v63 }
 0x6b4   :  { %1598 = vmatprep.subr.mxu0 %v5431_v56  ;;  %1669 = vmatprep.subr.mxu1 %v2200_v45 }
 0x6b5   :  { %1599 = vmatpush2.msra.mxu0 %v5432_v57  ;;  %1670 = vmatpush2.msra.mxu1 %v2201_v47 }
 0x6b6   :  { %1600 = vmatprep.subr.mxu0 %v5433_v1  ;;  %1671 = vmatprep.subr.mxu1 %v2202_v2 }
 0x6b7   :  { %1601 = vmatpush2.msra.mxu0 %v5434_v3  ;;  %1672 = vmatpush2.msra.mxu1 %v2203_v4  ;;  %v1710_v3 = vstv %s4343_s17  ;;  %v1713_v4 = vstv %s4341_s1 }
 0x738   :  { %v1420_v5 = vpop.f32.mrf.mxu0  ;;  %v1491_v58 = vpop.f32.mrf.mxu1 }
 0x739   :  { %v1421_v9 = vadd.f32 %v1420_v5, %v5017_v30  ;;  %v1492_v52 = vadd.f32 %v1491_v58, %v2943_v48 }
 0x73a   :  { %v1422_v10 = vpop.f32.mrf.mxu0  ;;  %v1493_v34 = vpop.f32.mrf.mxu1 }
 0x73b   :  { %v1783_v62 = vmul.f32 -1.442695, %v1421_v9  ;;  %v1423_v22 = vadd.f32 %v1422_v10, %v5272_v51  ;;  %v1494_v11 = vadd.f32 %v1493_v34, %v5435_v24  ;;  %v1718_v10 = vmul.f32 %v4199_v50, %v1713_v4 }
 0x73d   :  { %1912 = vpow2.f32 %v1783_v62  ;;  %v1784_v12 = vmul.f32 -1.442695, %v1423_v22  ;;  %v1785_v20 = vmul.f32 -1.442695, %v1494_v11 }
 0x73f   :  { %1914 = vpow2.f32 %v1784_v12 }
 0x740   :  { %1916 = vtanh.f32 %v1492_v52 }
 0x741   :  { %1918 = vpow2.f32 %v1785_v20 }
 0x74a   :  { %v1913_v28 = vpop.eup %1912 }
 0x74b   :  { %v1499_v19 = vadd.f32 1.0, %v1913_v28 }
 0x74c   :  { %v1915_v49 = vpop.eup %1914 }
 0x74d   :  { %1920 = vrcp.f32 %v1499_v19  ;;  %v1505_v26 = vadd.f32 1.0, %v1915_v49  ;;  %v1917_v14 = vpop.eup %1916 }
 0x74e   :  { %v1919_v6 = vpop.eup %1918 }
 0x74f   :  { %1922 = vrcp.f32 %v1505_v26  ;;  %v1512_v38 = vadd.f32 1.0, %v1919_v6 }
 0x750   :  { %1924 = vtanh.f32 %v5436_v39 }
 0x751   :  { %1926 = vrcp.f32 %v1512_v38 }
 0x75a   :  { %v1921_v16 = vpop.eup %1920 }
 0x75b   :  { %v1516_v15 = vmul.f32 %v1921_v16, %v1917_v14 }
 0x75c   :  { %v1923_v41 = vpop.eup %1922 }
 0x75d   :  { %v1515_v53 = vmul.f32 %v1923_v41, %v4197_v17  ;;  %v1925_v35 = vpop.eup %1924 }
 0x75e   :  { %v1927_v54 = vpop.eup %1926  ;;  %v1530_v37 = vmul.f32 %v1925_v35, %v5438_v55 }
 0x75f   :  { %v1517_v27 = vadd.f32 %v1516_v15, %v1515_v53 }
 0x761   :  { %1928 = vtanh.f32 %v1517_v27  ;;  %v1532_v46 = vmul.f32 %v1526_v42, %v1517_v27 }
 0x763   :  { %v1535_v7 = vadd.f32 %v5437_v8, %v1532_v46 }
 0x76e   :  { %v1929_v18 = vpop.eup %1928 }
 0x76f   :  { %v1519_v13 = vmul.f32 %v1929_v18, %v1927_v54 }
 0x771   :  { %v1527_v43 = vmul.f32 %v1526_v42, %v1519_v13 }
 0x773   :  { %v1531_v61 = vadd.f32 %v1530_v37, %v1527_v43 }
 0x775   :  { %1602 = vmatprep.mubr.f32.mxu0 %v1531_v61  ;;  %1673 = vmatprep.mubr.f32.mxu1 %v1531_v61 }
 0x776   :  { %1603 = vmatmul.mubr.f32.vlgmr.msra.gmra.mxu0 %v1537_v21  ;;  %1674 = vmatmul.mubr.f32.vlgmr.msra.gmra.mxu1 %v1537_v21 }
 0x836   :  { %v1604_v17 = vpop.f32.mrf.mxu0  ;;  %v1675_v36 = vpop.f32.mrf.mxu1 }
 0x837   :  { %v1605_v23 = vadd.f32 %v1604_v17, %v5017_v30  ;;  %v1676_v59 = vadd.f32 %v1675_v36, %v2943_v48 }
 0x838   :  { %v1606_v25 = vpop.f32.mrf.mxu0  ;;  %v1677_v40 = vpop.f32.mrf.mxu1 }
 0x839   :  { %v1788_v29 = vmul.f32 -1.442695, %v1605_v23  ;;  %v1607_v31 = vadd.f32 %v1606_v25, %v5272_v51  ;;  %v1678_v44 = vadd.f32 %v1677_v40, %v5435_v24 }
 0x83b   :  { %1930 = vpow2.f32 %v1788_v29  ;;  %v1789_v33 = vmul.f32 -1.442695, %v1607_v31  ;;  %v1790_v0 = vmul.f32 -1.442695, %v1678_v44 }
 0x83d   :  { %1932 = vpow2.f32 %v1789_v33 }
 0x83e   :  { %1934 = vtanh.f32 %v1676_v59 }
 0x83f   :  { %1936 = vpow2.f32 %v1790_v0 }
 0x848   :  { %v1931_v60 = vpop.eup %1930 }
 0x849   :  { %v1683_v63 = vadd.f32 1.0, %v1931_v60 }
 0x84a   :  { %v1933_v56 = vpop.eup %1932 }
 0x84b   :  { %1938 = vrcp.f32 %v1683_v63  ;;  %v1689_v30 = vadd.f32 1.0, %v1933_v56  ;;  %v1935_v51 = vpop.eup %1934 }
 0x84c   :  { %v1937_v45 = vpop.eup %1936 }
 0x84d   :  { %1940 = vrcp.f32 %v1689_v30  ;;  %v1696_v48 = vadd.f32 1.0, %v1937_v45 }
 0x84e   :  { %1942 = vtanh.f32 %v4202_v32 }
 0x84f   :  { %1944 = vrcp.f32 %v1696_v48 }
 0x858   :  { %v1939_v57 = vpop.eup %1938 }
 0x859   :  { %v1700_v2 = vmul.f32 %v1939_v57, %v1935_v51 }
 0x85a   :  { %v1941_v47 = vpop.eup %1940 }
 0x85b   :  { %v1699_v1 = vmul.f32 %v1941_v47, %v1535_v7 }
 0x85d   :  { %v1701_v5 = vadd.f32 %v1700_v2, %v1699_v1 }
 0x85f   :  { %1946 = vtanh.f32 %v1701_v5  ;;  %v1716_v9 = vmul.f32 %v1710_v3, %v1701_v5 }
 0x861   :  { %v1719_v62 = vadd.f32 %v1718_v10, %v1716_v9 }
 0x863   :  { %1721 = vst [vmem:[#allocation15] sm:$0xff] %v1719_v62 }
 0x864   :  { %2307 = shalt.err (!%p2304_p1)
}
 0x865   :  { %1741 = dma.vmem_to_hbm [thread:$0]  %s1739_s19, 128, %s4362_s7, [#allocation16]   ;;  %v1943_v32 = vpop.eup %1942 }
 0x866   :  { %v1945_v22 = vpop.eup %1944  ;;  %s2358_s22 = smov [#allocation14]   ;;  %v1714_v34 = vmul.f32 %v1943_v32, %v1713_v4 }
 0x867   :  { %s1728_s23 = sshll.u32 %s2358_s22, 4  ;;  %s1729_s23 = int_to_ptr.vmem [resolvable:$true] %s1728_s23 }
 0x868   :  { %s2316_s24 = scalar_lea.vmem %s1729_s23, 128  ;;  %p2321_p3 = scmp.lt.s32.totalorder %s1729_s23, %s1729_s23 }
 0x869   :  { %p2317_p2 = scmp.ne.s32.totalorder %s1729_s23, %s2316_s24  ;;  %p2322_p4 = scmp.lt.s32.totalorder %s2316_s24, %s2316_s24 }
 0x86b   :  { %p2323_p5 = por %p2322_p4, %p2321_p3 }
 0x86c   :  { %v1947_v12 = vpop.eup %1946 }
 0x86d   :  { %v1703_v58 = vmul.f32 %v1947_v12, %v1945_v22  ;;  %p2324_p6 = pnand %p2323_p5, %p2317_p2 }
 0x86f   :  { %v1711_v50 = vmul.f32 %v1710_v3, %v1703_v58 }
 0x871   :  { %v1715_v24 = vadd.f32 %v1714_v34, %v1711_v50 }
 0x873   :  { %1720 = vst [vmem:[#allocation14] sm:$0xff] %v1715_v24 }
 0x874   :  { %2327 = shalt.err (!%p2324_p6)
}
 0x875   :  { %1731 = dma.vmem_to_hbm [thread:$0]  %s1729_s23, 128, %s4361_s6, [#allocation6]  }
 0x876   :  { %2344 = dma.done.wait [#allocation6], 128  }
 0x877   :  { %2345 = vsyncadd [#allocation6], 4294967168 }
 0x878   :  { %2346 = dma.done.wait [#allocation16], 128  }
 0x879   :  { %2347 = vsyncadd [#allocation16], 4294967168 }
 0x87a   :  { %1748 = vsyncpa [#allocation5], 1 }
 0x87b   :  { %1749 = vsyncpa [#allocation9], 1 }
 0x87c   :  { %1750 = vsyncpa [#allocation12], 1 }
 0x87d   :  { %1751 = vsyncpa [#allocation6], 1 }
 0x87e   :  { %1752 = vsyncpa [#allocation16], 1 }
 0x87f   :  { %1753 = vsyncpa [#allocation7], 1 }

</bundles_post_ra>
